<compile_context>
chip_gen: v7x
topology: tpu7x:2x2x1
jax: 0.10.0
libtpu: 0.0.40
codegen_flags: <defaults>
</compile_context>

<pallas_src>
import jax
import jax.numpy as jnp
from jax.experimental import pallas as pl
from jax.experimental.pallas import tpu as pltpu

IN_FEATURES = 67
OUT_FEATURES = 128 * 4  # 512

# Row-tile size.  4*TM*(67+512) B per tile * 2 buffers ≈ 4.6 KB * TM.
DEFAULT_ROW_TILE = 2048
# Below this many rows the pallas_call fixed overhead dominates; use XLA dot.
MIN_PALLAS_ROWS = 256


def _linear_kernel(x_ref, w_ref, b_ref, o_ref):
    # x_ref: (TM, 67)  w_ref: (67, 512)  b_ref: (1, 512)  o_ref: (TM, 512)
    acc = jnp.dot(x_ref[...], w_ref[...], preferred_element_type=jnp.float32)
    o_ref[...] = (acc + b_ref[...]).astype(o_ref.dtype)


def pre_net_linear(x2d, w_t, b2d, *, row_tile=DEFAULT_ROW_TILE):
    """x2d: (N, 67) f32, w_t: (67, 512) f32, b2d: (1, 512) f32 -> (N, 512) f32."""
    n = x2d.shape[0]
    tm = min(row_tile, n)           # tm == n (full dim) or a multiple of 8
    grid = (pl.cdiv(n, tm),)

    cost = pl.CostEstimate(
        flops=2 * n * IN_FEATURES * OUT_FEATURES,
        transcendentals=0,
        bytes_accessed=4 * (n * IN_FEATURES
                            + IN_FEATURES * OUT_FEATURES
                            + OUT_FEATURES
                            + n * OUT_FEATURES),
    )

    return pl.pallas_call(
        _linear_kernel,
        out_shape=jax.ShapeDtypeStruct((n, OUT_FEATURES), jnp.float32),
        grid=grid,
        in_specs=[
            # Row tiles of x are pipelined over the grid.
            pl.BlockSpec((tm, IN_FEATURES), lambda i: (i, 0)),
            # Weight + bias: same block every step -> VMEM-resident.
            pl.BlockSpec((IN_FEATURES, OUT_FEATURES), lambda i: (0, 0)),
            pl.BlockSpec((1, OUT_FEATURES), lambda i: (0, 0)),
        ],
        out_specs=pl.BlockSpec((tm, OUT_FEATURES), lambda i: (i, 0)),
        compiler_params=pltpu.CompilerParams(
            dimension_semantics=("parallel",),      # shard rows across v7x TCs
            vmem_limit_bytes=32 * 1024 * 1024,
        ),
        cost_estimate=cost,
    )(x2d, w_t, b2d)


def soh_mode_forward(x, w_t, b2d):
    """Forward pass of SOHMode with input_type == 'handcraft_features'.

    x:   (N, 1, 67) float32
    w_t: (67, 512)  float32   (pre-transposed nn.Linear weight)
    b2d: (1, 512)   float32
    returns: (N, 4, 128) float32
    """
    n = x.shape[0]
    x2d = x.reshape(n, IN_FEATURES)
    if n < MIN_PALLAS_ROWS:
        # Tiny batch: fused XLA dot is as fast and avoids masked partial stores.
        y = x2d @ w_t + b2d
    else:
        y = pre_net_linear(x2d, w_t, b2d)
    y = y.reshape(-1, 4, 128)            # x.view(-1, 4, 128)
    # TODO(synk): backbone = eval(args.model)() is unspecified -> identity.
    return y


def init_params(key):
    """nn.Linear init from _initialize_weights: weight ~ N(0, 0.01), bias = 0.

    Returns the PyTorch-layout weight (512, 67) and bias (512,).
    """
    kw, _ = jax.random.split(key)
    w = 0.01 * jax.random.normal(kw, (OUT_FEATURES, IN_FEATURES), dtype=jnp.float32)
    b = jnp.zeros((OUT_FEATURES,), dtype=jnp.float32)
    return w, b


def prepare_params(w, b):
    """One-time prep (outside the per-call hot path): transpose + reshape."""
    w_t = jnp.transpose(w)               # (67, 512) -> lane-dense output dim
    b2d = b.reshape(1, OUT_FEATURES)
    return w_t, b2d


if __name__ == "__main__":
    key = jax.random.PRNGKey(0)
    k_small, k_big, k_p = jax.random.split(key, 3)

    w, b = init_params(k_p)
    w_t, b2d = prepare_params(w, b)      # hoisted out of the forward path

    # Small batch consistent with the module's feature shape (N, 1, 67):
    # exercises the tiny-N fallback path.
    N_SMALL = 2
    x_small = jax.random.normal(k_small, (N_SMALL, 1, IN_FEATURES), dtype=jnp.float32)
    out_small = jax.block_until_ready(soh_mode_forward(x_small, w_t, b2d))

    # Larger batch: exercises the tiled Pallas path (grid over row tiles).
    N_BIG = 1024
    x_big = jax.random.normal(k_big, (N_BIG, 1, IN_FEATURES), dtype=jnp.float32)
    out_big = jax.block_until_ready(soh_mode_forward(x_big, w_t, b2d))

    # Sanity checks against plain-JAX reference.
    ref_small = (x_small.reshape(N_SMALL, IN_FEATURES) @ w.T + b).reshape(-1, 4, 128)
    ref_big = (x_big.reshape(N_BIG, IN_FEATURES) @ w.T + b).reshape(-1, 4, 128)

    assert out_small.shape == (N_SMALL, 4, 128)
    assert out_big.shape == (N_BIG, 4, 128)
    assert jnp.allclose(out_small, ref_small, atol=1e-5, rtol=1e-5)
    assert jnp.allclose(out_big, ref_big, atol=1e-5, rtol=1e-5)

    print("KERNEL_OK")
</pallas_src>

<mosaic_0001>
module attributes {stable_mosaic.version = 11 : i64} {
  func.func @_linear_kernel(%arg0: i32, %arg1: memref<1024x67xf32, #tpu.memory_space<vmem>>, %arg2: memref<67x512xf32, #tpu.memory_space<vmem>>, %arg3: memref<1x512xf32, #tpu.memory_space<vmem>>, %arg4: memref<1024x512xf32, #tpu.memory_space<vmem>>) attributes {dimension_semantics = [#tpu.dimension_semantics<parallel>], iteration_bounds = array<i64: 1>, scalar_prefetch = 0 : i64, scratch_operands = 0 : i64, tpu.core_type = #tpu.core_type<tc>, window_params = [{transform_indices = @transform_0, window_bounds = array<i64: 1024, 67>}, {pipeline_mode = #tpu.pipeline_mode<synchronous>, transform_indices = @transform_1, window_bounds = array<i64: 67, 512>}, {pipeline_mode = #tpu.pipeline_mode<synchronous>, transform_indices = @transform_2, window_bounds = array<i64: 1, 512>}, {transform_indices = @transform_3, window_bounds = array<i64: 1024, 512>}]} {
    %c0 = arith.constant 0 : index
    %c0_0 = arith.constant 0 : index
    %0 = vector.load %arg1[%c0, %c0_0] : memref<1024x67xf32, #tpu.memory_space<vmem>>, vector<1024x67xf32>
    %c0_1 = arith.constant 0 : index
    %c0_2 = arith.constant 0 : index
    %1 = vector.load %arg2[%c0_1, %c0_2] : memref<67x512xf32, #tpu.memory_space<vmem>>, vector<67x512xf32>
    %cst = arith.constant dense<0.000000e+00> : vector<1024x512xf32>
    %2 = tpu.matmul %0, %1, %cst {dimension_numbers = #tpu.dot_dimension_numbers<[1], [0], [0], [1], [0, 0, 1, 1], [], []>} : vector<1024x67xf32>, vector<67x512xf32>, vector<1024x512xf32> -> vector<1024x512xf32>
    %c0_3 = arith.constant 0 : index
    %c0_4 = arith.constant 0 : index
    %3 = vector.load %arg3[%c0_3, %c0_4] : memref<1x512xf32, #tpu.memory_space<vmem>>, vector<1x512xf32>
    %4 = vector.broadcast %3 : vector<1x512xf32> to vector<1024x512xf32>
    %5 = arith.addf %2, %4 : vector<1024x512xf32>
    %c0_5 = arith.constant 0 : index
    %c0_6 = arith.constant 0 : index
    %6 = vector.load %arg4[%c0_5, %c0_6] : memref<1024x512xf32, #tpu.memory_space<vmem>>, vector<1024x512xf32>
    tpu.vector_store %arg4[%c0_5, %c0_6], %5 {strides = array<i32>} : memref<1024x512xf32, #tpu.memory_space<vmem>>, vector<1024x512xf32>,
    return
  }
  func.func @transform_0(%arg0: i32) -> (i32, i32) {
    %c0_i32 = arith.constant 0 : i32
    %c0_i32_0 = arith.constant 0 : i32
    return %arg0, %c0_i32 : i32, i32
  }
  func.func @transform_1(%arg0: i32) -> (i32, i32) {
    %c0_i32 = arith.constant 0 : i32
    %c0_i32_0 = arith.constant 0 : i32
    %c0_i32_1 = arith.constant 0 : i32
    return %c0_i32, %c0_i32_0 : i32, i32
  }
  func.func @transform_2(%arg0: i32) -> (i32, i32) {
    %c0_i32 = arith.constant 0 : i32
    %c0_i32_0 = arith.constant 0 : i32
    %c0_i32_1 = arith.constant 0 : i32
    return %c0_i32, %c0_i32_0 : i32, i32
  }
  func.func @transform_3(%arg0: i32) -> (i32, i32) {
    %c0_i32 = arith.constant 0 : i32
    %c0_i32_0 = arith.constant 0 : i32
    return %arg0, %c0_i32 : i32, i32
  }
}

</mosaic_0001>

<bundles_post_ra>
// kernel: tpu_custom_call.1
= control target key start
LH: loop header
LB: loop body
LE: loop exit
PB: predicated region body
PF: predicated region fallthrough
CT: control target
= control target key end

     0   :  { %8 = vsyncpa [#allocation3], 0  ;;  %s4675_s0 = inlined_call_operand.vmem [shape: f32[1024,67], index: 0, kind: input, shape index: {}]   ;;  %s4676_s1 = inlined_call_operand.hbm [shape: f32[67,512], index: 1, kind: input, shape index: {}]   ;;  %s4677_s2 = inlined_call_operand.hbm [shape: f32[1,512], index: 2, kind: input, shape index: {}]   ;;  %s4678_s3 = inlined_call_operand.hbm [shape: f32[1024,512], index: 3, kind: output, shape index: {}]  }
   0x1   :  { %9 = vsyncpa [#allocation6], 0 }
   0x2   :  { %10 = vsyncpa [#allocation4], 0  ;;  %s3191_s12 = smov [#allocation2]   ;;  %s3119_s16 = scalar_lea.hbm %s4676_s1, 4608 }
   0x3   :  { %s18_s13 = sshll.u32 %s3191_s12, 4  ;;  %p3120_p0 = scmp.ne.s32.totalorder %s4676_s1, %s3119_s16  ;;  %s19_s13 = int_to_ptr.vmem [resolvable:$true] %s18_s13 }
   0x4   :  { %p3123_p1 = scmp.lt.u32.totalorder %s3119_s16, %s4676_s1 }
   0x6   :  { %p3125_p2 = pnand %p3123_p1, %p3120_p0 }
   0x8   :  { %3128 = shalt.err (!%p3125_p2)
}
   0x9   :  { %s3129_s21 = scalar_lea.vmem %s19_s13, 4608  ;;  %p3134_p4 = scmp.lt.s32.totalorder %s19_s13, %s19_s13 }
   0xa   :  { %p3130_p3 = scmp.ne.s32.totalorder %s19_s13, %s3129_s21  ;;  %p3135_p5 = scmp.lt.s32.totalorder %s3129_s21, %s3129_s21 }
   0xc   :  { %p3136_p6 = por %p3135_p5, %p3134_p4 }
   0xe   :  { %p3137_p7 = pnand %p3136_p6, %p3130_p3 }
  0x10   :  { %3140 = shalt.err (!%p3137_p7)
}
  0x11   :  { %s3192_s22 = smov 512   ;;  %s3193_s23 = smov 32  }
  0x12   :  { %24 = dma.hbm_to_vmem [thread:$0]  %s4676_s1, 4608, %s19_s13, [#allocation3], %s3192_s22, %s3192_s22, %s3193_s23  }
  0x13   :  { %s3194_s26 = smov [#allocation5]   ;;  %s3141_s30 = scalar_lea.hbm %s4677_s2, 64 }
  0x14   :  { %s31_s27 = sshll.u32 %s3194_s26, 4  ;;  %p3142_p8 = scmp.ne.s32.totalorder %s4677_s2, %s3141_s30  ;;  %s32_s27 = int_to_ptr.vmem [resolvable:$true] %s31_s27 }
  0x15   :  { %p3145_p9 = scmp.lt.u32.totalorder %s3141_s30, %s4677_s2 }
  0x17   :  { %p3147_p10 = pnand %p3145_p9, %p3142_p8 }
  0x19   :  { %3150 = shalt.err (!%p3147_p10)
}
  0x1a   :  { %s3151_s8 = scalar_lea.vmem %s32_s27, 64  ;;  %p3156_p12 = scmp.lt.s32.totalorder %s32_s27, %s32_s27 }
  0x1b   :  { %p3152_p11 = scmp.ne.s32.totalorder %s32_s27, %s3151_s8  ;;  %p3157_p13 = scmp.lt.s32.totalorder %s3151_s8, %s3151_s8 }
  0x1d   :  { %p3158_p0 = por %p3157_p13, %p3156_p12 }
  0x1f   :  { %p3159_p1 = pnand %p3158_p0, %p3152_p11 }
  0x21   :  { %3162 = shalt.err (!%p3159_p1)
}
  0x22   :  { %34 = dma.hbm_to_vmem [thread:$0]  %s4677_s2, 64, %s32_s27, [#allocation6]  }
  0x23   :  { %3185 = dma.done.wait [#allocation3], 4608  }
  0x24   :  { %3186 = vsyncadd [#allocation3], 4294962688 }
  0x25   :  { %3187 = dma.done.wait [#allocation6], 64  }
  0x26   :  { %3188 = vsyncadd [#allocation6], 4294967232  ;;  %v3195_v0 = vmov 0.0   ;;  %v170_v1 = vld [vmem:[#allocation2 + $0x8] sm:$0xff]  ;;  %v172_v3 = vld [vmem:[#allocation2 + $0x18] sm:$0xff]  ;;  %vm612_vm0 = vcmask 1042432  }
  0x27   :  { %689 = vmatprep.mubr.f32.mxu0 %v3195_v0  ;;  %1522 = vmatprep.mubr.f32.mxu1 %v3195_v0  ;;  %v174_v2 = vld [vmem:[#allocation2 + $0x28] sm:$0xff]  ;;  %v176_v5 = vld [vmem:[#allocation2 + $0x38] sm:$0xff]  ;;  %v169_v6 = vld [vmem:[#allocation2] sm:$0xff]  ;;  %vm227_vm1 = vcmask 547840  }
  0x28   :  { %v3081_v4 = vpack.c.bf16 %v174_v2, %v170_v1  ;;  %v173_v7 = vld [vmem:[#allocation2 + $0x20] sm:$0xff]  ;;  %v3097_v8 = vpack.c.bf16 %v176_v5, %v172_v3  ;;  %v171_v10 = vld [vmem:[#allocation2 + $0x10] sm:$0xff]  ;;  %v178_v12 = vld [vmem:[#allocation2 + $0x48] sm:$0xff] }
  0x29   :  { %v3083_v9 = vpack.c.bf16 %v173_v7, %v169_v6  ;;  %v175_v11 = vld [vmem:[#allocation2 + $0x30] sm:$0xff]  ;;  %v182_v14 = vld [vmem:[#allocation2 + $0x68] sm:$0xff]  ;;  %v180_v15 = vld [vmem:[#allocation2 + $0x58] sm:$0xff] }
  0x2a   :  { %3082 = vmatprep.subr.bf16.mxu0 %v3081_v4  ;;  %v3099_v13 = vpack.c.bf16 %v175_v11, %v171_v10  ;;  %v184_v16 = vld [vmem:[#allocation2 + $0x78] sm:$0xff]  ;;  %3098 = vmatprep.subr.bf16.mxu1 %v3097_v8  ;;  %v3085_v17 = vpack.c.bf16 %v182_v14, %v178_v12  ;;  %v177_v19 = vld [vmem:[#allocation2 + $0x40] sm:$0xff]  ;;  %v179_v21 = vld [vmem:[#allocation2 + $0x50] sm:$0xff] }
  0x2b   :  { %3084 = vmatpush1.bf16.msra.mxu0 %v3083_v9  ;;  %v3101_v18 = vpack.c.bf16 %v184_v16, %v180_v15  ;;  %v181_v20 = vld [vmem:[#allocation2 + $0x60] sm:$0xff]  ;;  %v183_v23 = vld [vmem:[#allocation2 + $0x70] sm:$0xff]  ;;  %v186_v24 = vld [vmem:[#allocation2 + $0x88] sm:$0xff] }
  0x2c   :  { %3100 = vmatpush1.bf16.msra.mxu1 %v3099_v13  ;;  %v3087_v22 = vpack.c.bf16 %v181_v20, %v177_v19  ;;  %v190_v25 = vld [vmem:[#allocation2 + $0xa8] sm:$0xff]  ;;  %3086 = vmatprep.subr.bf16.mxu0 %v3085_v17  ;;  %v3103_v26 = vpack.c.bf16 %v183_v23, %v179_v21  ;;  %v188_v28 = vld [vmem:[#allocation2 + $0x98] sm:$0xff]  ;;  %v185_v30 = vld [vmem:[#allocation2 + $0x80] sm:$0xff] }
  0x2d   :  { %3102 = vmatprep.subr.bf16.mxu1 %v3101_v18  ;;  %v3089_v27 = vpack.c.bf16 %v190_v25, %v186_v24  ;;  %v192_v29 = vld [vmem:[#allocation2 + $0xb8] sm:$0xff]  ;;  %v189_v32 = vld [vmem:[#allocation2 + $0xa0] sm:$0xff]  ;;  %v187_v33 = vld [vmem:[#allocation2 + $0x90] sm:$0xff] }
  0x2e   :  { %v3105_v31 = vpack.c.bf16 %v192_v29, %v188_v28  ;;  %v191_v34 = vld [vmem:[#allocation2 + $0xb0] sm:$0xff]  ;;  %v3091_v35 = vpack.c.bf16 %v189_v32, %v185_v30  ;;  %v194_v36 = vld [vmem:[#allocation2 + $0xc8] sm:$0xff]  ;;  %v196_v38 = vld [vmem:[#allocation2 + $0xd8] sm:$0xff] }
  0x2f   :  { %3088 = vmatpush1.bf16.msra.mxu0 %v3087_v22  ;;  %v198_v37 = vld [vmem:[#allocation2 + $0xe8] sm:$0xff]  ;;  %v3107_v39 = vpack.c.bf16 %v191_v34, %v187_v33  ;;  %v200_v41 = vld [vmem:[#allocation2 + $0xf8] sm:$0xff]  ;;  %v193_v42 = vld [vmem:[#allocation2 + $0xc0] sm:$0xff] }
  0x30   :  { %3104 = vmatpush1.bf16.msra.mxu1 %v3103_v26  ;;  %3090 = vmatprep.subr.bf16.mxu0 %v3089_v27  ;;  %v3093_v40 = vpack.c.bf16 %v198_v37, %v194_v36  ;;  %v197_v43 = vld [vmem:[#allocation2 + $0xe0] sm:$0xff]  ;;  %v3109_v44 = vpack.c.bf16 %v200_v41, %v196_v38  ;;  %v195_v45 = vld [vmem:[#allocation2 + $0xd0] sm:$0xff]  ;;  %v202_v49 = vld [vmem:[#allocation2 + $0x108] sm:$0x7] }
  0x31   :  { %3106 = vmatprep.subr.bf16.mxu1 %v3105_v31  ;;  %v199_v46 = vld [vmem:[#allocation2 + $0xf0] sm:$0xff]  ;;  %v3095_v47 = vpack.c.bf16 %v197_v43, %v193_v42  ;;  %v204_v50 = vld [vmem:[#allocation2 + $0x118] sm:$0x7]  ;;  %v201_v51 = vld [vmem:[#allocation2 + $0x100] sm:$0x7] }
  0x32   :  { %v3111_v48 = vpack.c.bf16 %v199_v46, %v195_v45  ;;  %v203_v52 = vld [vmem:[#allocation2 + $0x110] sm:$0x7]  ;;  %v41_v53 = vld [vmem:[%s4675_s0] sm:$0xff]  ;;  %v42_v54 = vld [vmem:[%s4675_s0 + $0x8] sm:$0xff] }
  0x33   :  { %3092 = vmatpush1.bf16.msra.mxu0 %v3091_v35  ;;  %v43_v55 = vld [vmem:[%s4675_s0 + $0x10] sm:$0xff]  ;;  %v44_v56 = vld [vmem:[%s4675_s0 + $0x18] sm:$0xff]  ;;  %v45_v57 = vld [vmem:[%s4675_s0 + $0x20] sm:$0xff] }
  0x34   :  { %3108 = vmatpush1.bf16.msra.mxu1 %v3107_v39  ;;  %3094 = vmatprep.subr.bf16.mxu0 %v3093_v40  ;;  %v46_v58 = vld [vmem:[%s4675_s0 + $0x28] sm:$0xff]  ;;  %v47_v59 = vld [vmem:[%s4675_s0 + $0x30] sm:$0xff]  ;;  %v48_v60 = vld [vmem:[%s4675_s0 + $0x38] sm:$0xff]  ;;  %v207_v40 = vlaneseq }
  0x35   :  { %3110 = vmatprep.subr.bf16.mxu1 %v3109_v44  ;;  %v49_v61 = vld [vmem:[%s4675_s0 + $0x40] sm:$0xff]  ;;  %v50_v62 = vld [vmem:[%s4675_s0 + $0x48] sm:$0xff]  ;;  %v51_v63 = vld [vmem:[%s4675_s0 + $0x50] sm:$0xff] }
  0x36   :  { %v52_v1 = vld [vmem:[%s4675_s0 + $0x58] sm:$0xff]  ;;  %v53_v2 = vld [vmem:[%s4675_s0 + $0x60] sm:$0xff]  ;;  %v54_v3 = vld [vmem:[%s4675_s0 + $0x68] sm:$0xff]  ;;  %v208_v42 = vshrl.u32 %v207_v40, 7 }
  0x37   :  { %3096 = vmatpush1.bf16.msra.mxu0 %v3095_v47  ;;  %v55_v4 = vld [vmem:[%s4675_s0 + $0x70] sm:$0xff]  ;;  %v56_v5 = vld [vmem:[%s4675_s0 + $0x78] sm:$0xff]  ;;  %v57_v6 = vld [vmem:[%s4675_s0 + $0x80] sm:$0xff] }
  0x38   :  { %3112 = vmatpush1.bf16.msra.mxu1 %v3111_v48  ;;  %2821 = vmatprep.subr.msk.mxu0 %vm612_vm0, %v202_v49  ;;  %v58_v7 = vld [vmem:[%s4675_s0 + $0x88] sm:$0xff]  ;;  %v59_v8 = vld [vmem:[%s4675_s0 + $0x90] sm:$0xff]  ;;  %v60_v9 = vld [vmem:[%s4675_s0 + $0x98] sm:$0xff]  ;;  %v209_v44 = vsub.s32 0, %v208_v42  ;;  %v217_v47 = vsub.s32 2, %v208_v42  ;;  %v213_v48 = vsub.s32 1, %v208_v42 }
  0x39   :  { %2951 = vmatprep.subr.msk.mxu1 %vm612_vm0, %v204_v50  ;;  %v61_v10 = vld [vmem:[%s4675_s0 + $0xa0] sm:$0xff]  ;;  %v62_v11 = vld [vmem:[%s4675_s0 + $0xa8] sm:$0xff]  ;;  %v63_v12 = vld [vmem:[%s4675_s0 + $0xb0] sm:$0xff]  ;;  %v221_v49 = vsub.s32 3, %v208_v42 }
  0x3a   :  { %v64_v13 = vld [vmem:[%s4675_s0 + $0xb8] sm:$0xff]  ;;  %v65_v14 = vld [vmem:[%s4675_s0 + $0xc0] sm:$0xff]  ;;  %v66_v15 = vld [vmem:[%s4675_s0 + $0xc8] sm:$0xff] }
  0x3b   :  { %2822 = vmatpush1.msk.msra.mxu0 %vm612_vm0, %v201_v51  ;;  %v67_v16 = vld [vmem:[%s4675_s0 + $0xd0] sm:$0xff]  ;;  %v68_v17 = vld [vmem:[%s4675_s0 + $0xd8] sm:$0xff]  ;;  %v69_v18 = vld [vmem:[%s4675_s0 + $0xe0] sm:$0xff] }
  0x3c   :  { %2952 = vmatpush1.msk.msra.mxu1 %vm612_vm0, %v203_v52  ;;  %2823 = vmatmul.mubr.msk.f32.vlgmr.msra.gmra.mrb[0].mxu0 %vm227_vm1, %v41_v53  ;;  %v70_v19 = vld [vmem:[%s4675_s0 + $0xe8] sm:$0xff]  ;;  %v71_v20 = vld [vmem:[%s4675_s0 + $0xf0] sm:$0xff]  ;;  %v72_v21 = vld [vmem:[%s4675_s0 + $0xf8] sm:$0xff] }
  0x3d   :  { %2953 = vmatmul.mubr.msk.f32.vlgmr.msra.gmra.mrb[0].mxu1 %vm227_vm1, %v41_v53  ;;  %695 = vmatprep.mubr.f32.mxu0 %v3195_v0  ;;  %v73_v22 = vld [vmem:[%s4675_s0 + $0x100] sm:$0xff]  ;;  %v74_v23 = vld [vmem:[%s4675_s0 + $0x108] sm:$0xff]  ;;  %v75_v24 = vld [vmem:[%s4675_s0 + $0x110] sm:$0xff] }
  0x3e   :  { %1528 = vmatprep.mubr.f32.mxu1 %v3195_v0  ;;  %v76_v25 = vld [vmem:[%s4675_s0 + $0x118] sm:$0xff]  ;;  %v77_v26 = vld [vmem:[%s4675_s0 + $0x120] sm:$0xff]  ;;  %v78_v27 = vld [vmem:[%s4675_s0 + $0x128] sm:$0xff] }
  0x3f   :  { %v79_v28 = vld [vmem:[%s4675_s0 + $0x130] sm:$0xff]  ;;  %v80_v29 = vld [vmem:[%s4675_s0 + $0x138] sm:$0xff]  ;;  %v81_v30 = vld [vmem:[%s4675_s0 + $0x140] sm:$0xff] }
  0x40   :  { %2824 = vmatmul.mubr.msk.f32.gmra.mrb[2].mxu0 %vm227_vm1, %v42_v54  ;;  %v82_v31 = vld [vmem:[%s4675_s0 + $0x148] sm:$0xff]  ;;  %v83_v32 = vld [vmem:[%s4675_s0 + $0x150] sm:$0xff]  ;;  %v84_v33 = vld [vmem:[%s4675_s0 + $0x158] sm:$0xff] }
  0x41   :  { %2954 = vmatmul.mubr.msk.f32.gmra.mrb[2].mxu1 %vm227_vm1, %v42_v54  ;;  %701 = vmatprep.mubr.f32.mxu0 %v3195_v0  ;;  %v85_v34 = vld [vmem:[%s4675_s0 + $0x160] sm:$0xff]  ;;  %v86_v35 = vld [vmem:[%s4675_s0 + $0x168] sm:$0xff]  ;;  %v87_v36 = vld [vmem:[%s4675_s0 + $0x170] sm:$0xff] }
  0x42   :  { %1534 = vmatprep.mubr.f32.mxu1 %v3195_v0  ;;  %v88_v37 = vld [vmem:[%s4675_s0 + $0x178] sm:$0xff]  ;;  %v89_v38 = vld [vmem:[%s4675_s0 + $0x180] sm:$0xff]  ;;  %v90_v39 = vld [vmem:[%s4675_s0 + $0x188] sm:$0xff] }
  0x43   :  { %v91_v41 = vld [vmem:[%s4675_s0 + $0x190] sm:$0xff]  ;;  %v92_v43 = vld [vmem:[%s4675_s0 + $0x198] sm:$0xff]  ;;  %v93_v45 = vld [vmem:[%s4675_s0 + $0x1a0] sm:$0xff] }
  0x44   :  { %2825 = vmatmul.mubr.msk.f32.gmra.mrb[4].mxu0 %vm227_vm1, %v43_v55  ;;  %v205_v46 = vld [vmem:[#allocation5] sm:$0xf]  ;;  %v94_v53 = vld [vmem:[%s4675_s0 + $0x1a8] sm:$0xff] }
  0x45   :  { %2955 = vmatmul.mubr.msk.f32.gmra.mrb[4].mxu1 %vm227_vm1, %v43_v55  ;;  %707 = vmatprep.mubr.f32.mxu0 %v3195_v0  ;;  %v3614_v50 = vrot.slane %v205_v46, %v209_v44  ;;  %v3618_v51 = vrot.slane %v205_v46, %v217_v47  ;;  %v3620_v52 = vrot.slane %v205_v46, %v213_v48  ;;  %v100_v44 = vld [vmem:[%s4675_s0 + $0x1d8] sm:$0xff] }
  0x46   :  { %1540 = vmatprep.mubr.f32.mxu1 %v3195_v0  ;;  %v3626_v54 = vrot.slane %v205_v46, %v221_v49 }
  0x48   :  { %2826 = vmatmul.mubr.msk.f32.gmra.mrb[6].mxu0 %vm227_vm1, %v44_v56 }
  0x49   :  { %2956 = vmatmul.mubr.msk.f32.gmra.mrb[6].mxu1 %vm227_vm1, %v44_v56  ;;  %713 = vmatprep.mubr.f32.mxu0 %v3195_v0 }
  0x4a   :  { %1546 = vmatprep.mubr.f32.mxu1 %v3195_v0 }
  0x4c   :  { %2827 = vmatmul.mubr.msk.f32.gmra.mrb[8].mxu0 %vm227_vm1, %v45_v57 }
  0x4d   :  { %2957 = vmatmul.mubr.msk.f32.gmra.mrb[8].mxu1 %vm227_vm1, %v45_v57  ;;  %719 = vmatprep.mubr.f32.mxu0 %v3195_v0 }
  0x4e   :  { %1552 = vmatprep.mubr.f32.mxu1 %v3195_v0 }
  0x50   :  { %2828 = vmatmul.mubr.msk.f32.gmra.mrb[10].mxu0 %vm227_vm1, %v46_v58 }
  0x51   :  { %2958 = vmatmul.mubr.msk.f32.gmra.mrb[10].mxu1 %vm227_vm1, %v46_v58  ;;  %725 = vmatprep.mubr.f32.mxu0 %v3195_v0 }
  0x52   :  { %1558 = vmatprep.mubr.f32.mxu1 %v3195_v0 }
  0x54   :  { %2829 = vmatmul.mubr.msk.f32.gmra.mrb[12].mxu0 %vm227_vm1, %v47_v59 }
  0x55   :  { %2959 = vmatmul.mubr.msk.f32.gmra.mrb[12].mxu1 %vm227_vm1, %v47_v59  ;;  %731 = vmatprep.mubr.f32.mxu0 %v3195_v0 }
  0x56   :  { %1564 = vmatprep.mubr.f32.mxu1 %v3195_v0 }
  0x58   :  { %2830 = vmatmul.mubr.msk.f32.gmra.mrb[14].mxu0 %vm227_vm1, %v48_v60 }
  0x59   :  { %2960 = vmatmul.mubr.msk.f32.gmra.mrb[14].mxu1 %vm227_vm1, %v48_v60  ;;  %737 = vmatprep.mubr.f32.mxu0 %v3195_v0 }
  0x5a   :  { %1570 = vmatprep.mubr.f32.mxu1 %v3195_v0 }
  0x5c   :  { %2831 = vmatmul.mubr.msk.f32.gmra.mrb[16].mxu0 %vm227_vm1, %v49_v61 }
  0x5d   :  { %2961 = vmatmul.mubr.msk.f32.gmra.mrb[16].mxu1 %vm227_vm1, %v49_v61  ;;  %743 = vmatprep.mubr.f32.mxu0 %v3195_v0 }
  0x5e   :  { %1576 = vmatprep.mubr.f32.mxu1 %v3195_v0 }
  0x60   :  { %2832 = vmatmul.mubr.msk.f32.gmra.mrb[18].mxu0 %vm227_vm1, %v50_v62 }
  0x61   :  { %2962 = vmatmul.mubr.msk.f32.gmra.mrb[18].mxu1 %vm227_vm1, %v50_v62  ;;  %749 = vmatprep.mubr.f32.mxu0 %v3195_v0  ;;  %v95_v62 = vld [vmem:[%s4675_s0 + $0x1b0] sm:$0xff] }
  0x62   :  { %1582 = vmatprep.mubr.f32.mxu1 %v3195_v0 }
  0x64   :  { %2833 = vmatmul.mubr.msk.f32.gmra.mrb[20].mxu0 %vm227_vm1, %v51_v63 }
  0x65   :  { %2963 = vmatmul.mubr.msk.f32.gmra.mrb[20].mxu1 %vm227_vm1, %v51_v63  ;;  %755 = vmatprep.mubr.f32.mxu0 %v3195_v0 }
  0x66   :  { %1588 = vmatprep.mubr.f32.mxu1 %v3195_v0 }
  0x68   :  { %2834 = vmatmul.mubr.msk.f32.gmra.mrb[22].mxu0 %vm227_vm1, %v52_v1 }
  0x69   :  { %2964 = vmatmul.mubr.msk.f32.gmra.mrb[22].mxu1 %vm227_vm1, %v52_v1  ;;  %761 = vmatprep.mubr.f32.mxu0 %v3195_v0 }
  0x6a   :  { %1594 = vmatprep.mubr.f32.mxu1 %v3195_v0 }
  0x6c   :  { %2835 = vmatmul.mubr.msk.f32.gmra.mrb[24].mxu0 %vm227_vm1, %v53_v2 }
  0x6d   :  { %2965 = vmatmul.mubr.msk.f32.gmra.mrb[24].mxu1 %vm227_vm1, %v53_v2  ;;  %767 = vmatprep.mubr.f32.mxu0 %v3195_v0 }
  0x6e   :  { %1600 = vmatprep.mubr.f32.mxu1 %v3195_v0 }
  0x70   :  { %2836 = vmatmul.mubr.msk.f32.gmra.mrb[26].mxu0 %vm227_vm1, %v54_v3 }
  0x71   :  { %2966 = vmatmul.mubr.msk.f32.gmra.mrb[26].mxu1 %vm227_vm1, %v54_v3  ;;  %773 = vmatprep.mubr.f32.mxu0 %v3195_v0 }
  0x72   :  { %1606 = vmatprep.mubr.f32.mxu1 %v3195_v0 }
  0x74   :  { %2837 = vmatmul.mubr.msk.f32.gmra.mrb[28].mxu0 %vm227_vm1, %v55_v4 }
  0x75   :  { %2967 = vmatmul.mubr.msk.f32.gmra.mrb[28].mxu1 %vm227_vm1, %v55_v4  ;;  %779 = vmatprep.mubr.f32.mxu0 %v3195_v0 }
  0x76   :  { %1612 = vmatprep.mubr.f32.mxu1 %v3195_v0 }
  0x78   :  { %2838 = vmatmul.mubr.msk.f32.gmra.mrb[30].mxu0 %vm227_vm1, %v56_v5 }
  0x79   :  { %2968 = vmatmul.mubr.msk.f32.gmra.mrb[30].mxu1 %vm227_vm1, %v56_v5  ;;  %785 = vmatprep.mubr.f32.mxu0 %v3195_v0 }
  0x7a   :  { %1618 = vmatprep.mubr.f32.mxu1 %v3195_v0 }
  0x7c   :  { %2839 = vmatmul.mubr.msk.f32.gmra.mrb[32].mxu0 %vm227_vm1, %v57_v6 }
  0x7d   :  { %2969 = vmatmul.mubr.msk.f32.gmra.mrb[32].mxu1 %vm227_vm1, %v57_v6  ;;  %791 = vmatprep.mubr.f32.mxu0 %v3195_v0 }
  0x7e   :  { %1624 = vmatprep.mubr.f32.mxu1 %v3195_v0 }
  0x80   :  { %2840 = vmatmul.mubr.msk.f32.gmra.mrb[34].mxu0 %vm227_vm1, %v58_v7 }
  0x81   :  { %2970 = vmatmul.mubr.msk.f32.gmra.mrb[34].mxu1 %vm227_vm1, %v58_v7  ;;  %797 = vmatprep.mubr.f32.mxu0 %v3195_v0 }
  0x82   :  { %1630 = vmatprep.mubr.f32.mxu1 %v3195_v0 }
  0x84   :  { %2841 = vmatmul.mubr.msk.f32.gmra.mrb[36].mxu0 %vm227_vm1, %v59_v8 }
  0x85   :  { %2971 = vmatmul.mubr.msk.f32.gmra.mrb[36].mxu1 %vm227_vm1, %v59_v8  ;;  %803 = vmatprep.mubr.f32.mxu0 %v3195_v0  ;;  %v96_v8 = vld [vmem:[%s4675_s0 + $0x1b8] sm:$0xff] }
  0x86   :  { %1636 = vmatprep.mubr.f32.mxu1 %v3195_v0 }
  0x88   :  { %2842 = vmatmul.mubr.msk.f32.gmra.mrb[38].mxu0 %vm227_vm1, %v60_v9 }
  0x89   :  { %2972 = vmatmul.mubr.msk.f32.gmra.mrb[38].mxu1 %vm227_vm1, %v60_v9  ;;  %809 = vmatprep.mubr.f32.mxu0 %v3195_v0 }
  0x8a   :  { %1642 = vmatprep.mubr.f32.mxu1 %v3195_v0 }
  0x8c   :  { %2843 = vmatmul.mubr.msk.f32.gmra.mrb[40].mxu0 %vm227_vm1, %v61_v10 }
  0x8d   :  { %2973 = vmatmul.mubr.msk.f32.gmra.mrb[40].mxu1 %vm227_vm1, %v61_v10  ;;  %815 = vmatprep.mubr.f32.mxu0 %v3195_v0 }
  0x8e   :  { %1648 = vmatprep.mubr.f32.mxu1 %v3195_v0 }
  0x90   :  { %2844 = vmatmul.mubr.msk.f32.gmra.mrb[42].mxu0 %vm227_vm1, %v62_v11 }
  0x91   :  { %2974 = vmatmul.mubr.msk.f32.gmra.mrb[42].mxu1 %vm227_vm1, %v62_v11  ;;  %821 = vmatprep.mubr.f32.mxu0 %v3195_v0 }
  0x92   :  { %1654 = vmatprep.mubr.f32.mxu1 %v3195_v0 }
  0x94   :  { %2845 = vmatmul.mubr.msk.f32.gmra.mrb[44].mxu0 %vm227_vm1, %v63_v12 }
  0x95   :  { %2975 = vmatmul.mubr.msk.f32.gmra.mrb[44].mxu1 %vm227_vm1, %v63_v12  ;;  %827 = vmatprep.mubr.f32.mxu0 %v3195_v0 }
  0x96   :  { %1660 = vmatprep.mubr.f32.mxu1 %v3195_v0 }
  0x98   :  { %2846 = vmatmul.mubr.msk.f32.gmra.mrb[46].mxu0 %vm227_vm1, %v64_v13 }
  0x99   :  { %2976 = vmatmul.mubr.msk.f32.gmra.mrb[46].mxu1 %vm227_vm1, %v64_v13  ;;  %833 = vmatprep.mubr.f32.mxu0 %v3195_v0 }
  0x9a   :  { %1666 = vmatprep.mubr.f32.mxu1 %v3195_v0 }
  0x9c   :  { %2847 = vmatmul.mubr.msk.f32.gmra.mrb[48].mxu0 %vm227_vm1, %v65_v14 }
  0x9d   :  { %2977 = vmatmul.mubr.msk.f32.gmra.mrb[48].mxu1 %vm227_vm1, %v65_v14  ;;  %839 = vmatprep.mubr.f32.mxu0 %v3195_v0 }
  0x9e   :  { %1672 = vmatprep.mubr.f32.mxu1 %v3195_v0 }
  0xa0   :  { %2848 = vmatmul.mubr.msk.f32.gmra.mrb[50].mxu0 %vm227_vm1, %v66_v15 }
  0xa1   :  { %2978 = vmatmul.mubr.msk.f32.gmra.mrb[50].mxu1 %vm227_vm1, %v66_v15  ;;  %845 = vmatprep.mubr.f32.mxu0 %v3195_v0 }
  0xa2   :  { %1678 = vmatprep.mubr.f32.mxu1 %v3195_v0 }
  0xa4   :  { %2849 = vmatmul.mubr.msk.f32.gmra.mrb[52].mxu0 %vm227_vm1, %v67_v16 }
  0xa5   :  { %2979 = vmatmul.mubr.msk.f32.gmra.mrb[52].mxu1 %vm227_vm1, %v67_v16  ;;  %851 = vmatprep.mubr.f32.mxu0 %v3195_v0 }
  0xa6   :  { %1684 = vmatprep.mubr.f32.mxu1 %v3195_v0 }
  0xa8   :  { %2850 = vmatmul.mubr.msk.f32.gmra.mrb[54].mxu0 %vm227_vm1, %v68_v17 }
  0xa9   :  { %2980 = vmatmul.mubr.msk.f32.gmra.mrb[54].mxu1 %vm227_vm1, %v68_v17  ;;  %857 = vmatprep.mubr.f32.mxu0 %v3195_v0  ;;  %v97_v17 = vld [vmem:[%s4675_s0 + $0x1c0] sm:$0xff] }
  0xaa   :  { %1690 = vmatprep.mubr.f32.mxu1 %v3195_v0 }
  0xac   :  { %2851 = vmatmul.mubr.msk.f32.gmra.mrb[56].mxu0 %vm227_vm1, %v69_v18 }
  0xad   :  { %2981 = vmatmul.mubr.msk.f32.gmra.mrb[56].mxu1 %vm227_vm1, %v69_v18  ;;  %863 = vmatprep.mubr.f32.mxu0 %v3195_v0 }
  0xae   :  { %1696 = vmatprep.mubr.f32.mxu1 %v3195_v0 }
  0xb0   :  { %2852 = vmatmul.mubr.msk.f32.gmra.mrb[58].mxu0 %vm227_vm1, %v70_v19 }
  0xb1   :  { %2982 = vmatmul.mubr.msk.f32.gmra.mrb[58].mxu1 %vm227_vm1, %v70_v19  ;;  %869 = vmatprep.mubr.f32.mxu0 %v3195_v0 }
  0xb2   :  { %1702 = vmatprep.mubr.f32.mxu1 %v3195_v0 }
  0xb4   :  { %2853 = vmatmul.mubr.msk.f32.gmra.mrb[60].mxu0 %vm227_vm1, %v71_v20 }
  0xb5   :  { %2983 = vmatmul.mubr.msk.f32.gmra.mrb[60].mxu1 %vm227_vm1, %v71_v20  ;;  %875 = vmatprep.mubr.f32.mxu0 %v3195_v0 }
  0xb6   :  { %1708 = vmatprep.mubr.f32.mxu1 %v3195_v0 }
  0xb8   :  { %2854 = vmatmul.mubr.msk.f32.gmra.mrb[62].mxu0 %vm227_vm1, %v72_v21 }
  0xb9   :  { %2984 = vmatmul.mubr.msk.f32.gmra.mrb[62].mxu1 %vm227_vm1, %v72_v21  ;;  %881 = vmatprep.mubr.f32.mxu0 %v3195_v0 }
  0xba   :  { %1714 = vmatprep.mubr.f32.mxu1 %v3195_v0 }
  0xbc   :  { %2855 = vmatmul.mubr.msk.f32.gmra.mrb[64].mxu0 %vm227_vm1, %v73_v22 }
  0xbd   :  { %2985 = vmatmul.mubr.msk.f32.gmra.mrb[64].mxu1 %vm227_vm1, %v73_v22  ;;  %887 = vmatprep.mubr.f32.mxu0 %v3195_v0 }
  0xbe   :  { %1720 = vmatprep.mubr.f32.mxu1 %v3195_v0 }
  0xc0   :  { %2856 = vmatmul.mubr.msk.f32.gmra.mrb[66].mxu0 %vm227_vm1, %v74_v23 }
  0xc1   :  { %2986 = vmatmul.mubr.msk.f32.gmra.mrb[66].mxu1 %vm227_vm1, %v74_v23  ;;  %893 = vmatprep.mubr.f32.mxu0 %v3195_v0 }
  0xc2   :  { %1726 = vmatprep.mubr.f32.mxu1 %v3195_v0 }
  0xc4   :  { %2857 = vmatmul.mubr.msk.f32.gmra.mrb[68].mxu0 %vm227_vm1, %v75_v24 }
  0xc5   :  { %2987 = vmatmul.mubr.msk.f32.gmra.mrb[68].mxu1 %vm227_vm1, %v75_v24  ;;  %899 = vmatprep.mubr.f32.mxu0 %v3195_v0 }
  0xc6   :  { %1732 = vmatprep.mubr.f32.mxu1 %v3195_v0 }
  0xc8   :  { %2858 = vmatmul.mubr.msk.f32.gmra.mrb[70].mxu0 %vm227_vm1, %v76_v25 }
  0xc9   :  { %2988 = vmatmul.mubr.msk.f32.gmra.mrb[70].mxu1 %vm227_vm1, %v76_v25  ;;  %905 = vmatprep.mubr.f32.mxu0 %v3195_v0 }
  0xca   :  { %1738 = vmatprep.mubr.f32.mxu1 %v3195_v0 }
  0xcc   :  { %2859 = vmatmul.mubr.msk.f32.gmra.mrb[72].mxu0 %vm227_vm1, %v77_v26 }
  0xcd   :  { %2989 = vmatmul.mubr.msk.f32.gmra.mrb[72].mxu1 %vm227_vm1, %v77_v26  ;;  %911 = vmatprep.mubr.f32.mxu0 %v3195_v0  ;;  %v98_v26 = vld [vmem:[%s4675_s0 + $0x1c8] sm:$0xff] }
  0xce   :  { %1744 = vmatprep.mubr.f32.mxu1 %v3195_v0 }
  0xd0   :  { %2860 = vmatmul.mubr.msk.f32.gmra.mrb[74].mxu0 %vm227_vm1, %v78_v27 }
  0xd1   :  { %2990 = vmatmul.mubr.msk.f32.gmra.mrb[74].mxu1 %vm227_vm1, %v78_v27  ;;  %917 = vmatprep.mubr.f32.mxu0 %v3195_v0 }
  0xd2   :  { %1750 = vmatprep.mubr.f32.mxu1 %v3195_v0 }
  0xd4   :  { %2861 = vmatmul.mubr.msk.f32.gmra.mrb[76].mxu0 %vm227_vm1, %v79_v28 }
  0xd5   :  { %2991 = vmatmul.mubr.msk.f32.gmra.mrb[76].mxu1 %vm227_vm1, %v79_v28  ;;  %923 = vmatprep.mubr.f32.mxu0 %v3195_v0 }
  0xd6   :  { %1756 = vmatprep.mubr.f32.mxu1 %v3195_v0 }
  0xd8   :  { %2862 = vmatmul.mubr.msk.f32.gmra.mrb[78].mxu0 %vm227_vm1, %v80_v29 }
  0xd9   :  { %2992 = vmatmul.mubr.msk.f32.gmra.mrb[78].mxu1 %vm227_vm1, %v80_v29  ;;  %929 = vmatprep.mubr.f32.mxu0 %v3195_v0 }
  0xda   :  { %1762 = vmatprep.mubr.f32.mxu1 %v3195_v0 }
  0xdc   :  { %2863 = vmatmul.mubr.msk.f32.gmra.mrb[80].mxu0 %vm227_vm1, %v81_v30 }
  0xdd   :  { %2993 = vmatmul.mubr.msk.f32.gmra.mrb[80].mxu1 %vm227_vm1, %v81_v30  ;;  %935 = vmatprep.mubr.f32.mxu0 %v3195_v0 }
  0xde   :  { %1768 = vmatprep.mubr.f32.mxu1 %v3195_v0 }
  0xe0   :  { %2864 = vmatmul.mubr.msk.f32.gmra.mrb[82].mxu0 %vm227_vm1, %v82_v31 }
  0xe1   :  { %2994 = vmatmul.mubr.msk.f32.gmra.mrb[82].mxu1 %vm227_vm1, %v82_v31  ;;  %941 = vmatprep.mubr.f32.mxu0 %v3195_v0 }
  0xe2   :  { %1774 = vmatprep.mubr.f32.mxu1 %v3195_v0 }
  0xe4   :  { %2865 = vmatmul.mubr.msk.f32.gmra.mrb[84].mxu0 %vm227_vm1, %v83_v32 }
  0xe5   :  { %2995 = vmatmul.mubr.msk.f32.gmra.mrb[84].mxu1 %vm227_vm1, %v83_v32  ;;  %947 = vmatprep.mubr.f32.mxu0 %v3195_v0 }
  0xe6   :  { %1780 = vmatprep.mubr.f32.mxu1 %v3195_v0 }
  0xe8   :  { %2866 = vmatmul.mubr.msk.f32.gmra.mrb[86].mxu0 %vm227_vm1, %v84_v33 }
  0xe9   :  { %2996 = vmatmul.mubr.msk.f32.gmra.mrb[86].mxu1 %vm227_vm1, %v84_v33  ;;  %953 = vmatprep.mubr.f32.mxu0 %v3195_v0 }
  0xea   :  { %1786 = vmatprep.mubr.f32.mxu1 %v3195_v0 }
  0xec   :  { %2867 = vmatmul.mubr.msk.f32.gmra.mrb[88].mxu0 %vm227_vm1, %v85_v34 }
  0xed   :  { %2997 = vmatmul.mubr.msk.f32.gmra.mrb[88].mxu1 %vm227_vm1, %v85_v34  ;;  %959 = vmatprep.mubr.f32.mxu0 %v3195_v0 }
  0xee   :  { %1792 = vmatprep.mubr.f32.mxu1 %v3195_v0 }
  0xf0   :  { %2868 = vmatmul.mubr.msk.f32.gmra.mrb[90].mxu0 %vm227_vm1, %v86_v35 }
  0xf1   :  { %2998 = vmatmul.mubr.msk.f32.gmra.mrb[90].mxu1 %vm227_vm1, %v86_v35  ;;  %965 = vmatprep.mubr.f32.mxu0 %v3195_v0  ;;  %v99_v35 = vld [vmem:[%s4675_s0 + $0x1d0] sm:$0xff] }
  0xf2   :  { %1798 = vmatprep.mubr.f32.mxu1 %v3195_v0 }
  0xf4   :  { %2869 = vmatmul.mubr.msk.f32.gmra.mrb[92].mxu0 %vm227_vm1, %v87_v36 }
  0xf5   :  { %2999 = vmatmul.mubr.msk.f32.gmra.mrb[92].mxu1 %vm227_vm1, %v87_v36  ;;  %971 = vmatprep.mubr.f32.mxu0 %v3195_v0 }
  0xf6   :  { %1804 = vmatprep.mubr.f32.mxu1 %v3195_v0 }
  0xf8   :  { %2870 = vmatmul.mubr.msk.f32.gmra.mrb[94].mxu0 %vm227_vm1, %v88_v37 }
  0xf9   :  { %3000 = vmatmul.mubr.msk.f32.gmra.mrb[94].mxu1 %vm227_vm1, %v88_v37  ;;  %977 = vmatprep.mubr.f32.mxu0 %v3195_v0 }
  0xfa   :  { %1810 = vmatprep.mubr.f32.mxu1 %v3195_v0 }
  0xfc   :  { %2871 = vmatmul.mubr.msk.f32.gmra.mrb[96].mxu0 %vm227_vm1, %v89_v38 }
  0xfd   :  { %3001 = vmatmul.mubr.msk.f32.gmra.mrb[96].mxu1 %vm227_vm1, %v89_v38  ;;  %983 = vmatprep.mubr.f32.mxu0 %v3195_v0 }
  0xfe   :  { %1816 = vmatprep.mubr.f32.mxu1 %v3195_v0 }
 0x100   :  { %2872 = vmatmul.mubr.msk.f32.gmra.mrb[98].mxu0 %vm227_vm1, %v90_v39 }
 0x101   :  { %3002 = vmatmul.mubr.msk.f32.gmra.mrb[98].mxu1 %vm227_vm1, %v90_v39  ;;  %989 = vmatprep.mubr.f32.mxu0 %v3195_v0 }
 0x102   :  { %1822 = vmatprep.mubr.f32.mxu1 %v3195_v0 }
 0x104   :  { %2873 = vmatmul.mubr.msk.f32.gmra.mrb[100].mxu0 %vm227_vm1, %v91_v41 }
 0x105   :  { %3003 = vmatmul.mubr.msk.f32.gmra.mrb[100].mxu1 %vm227_vm1, %v91_v41  ;;  %995 = vmatprep.mubr.f32.mxu0 %v3195_v0 }
 0x106   :  { %1828 = vmatprep.mubr.f32.mxu1 %v3195_v0 }
 0x108   :  { %2874 = vmatmul.mubr.msk.f32.gmra.mrb[102].mxu0 %vm227_vm1, %v92_v43 }
 0x109   :  { %3004 = vmatmul.mubr.msk.f32.gmra.mrb[102].mxu1 %vm227_vm1, %v92_v43  ;;  %1001 = vmatprep.mubr.f32.mxu0 %v3195_v0 }
 0x10a   :  { %1834 = vmatprep.mubr.f32.mxu1 %v3195_v0 }
 0x10c   :  { %2875 = vmatmul.mubr.msk.f32.gmra.mrb[104].mxu0 %vm227_vm1, %v93_v45 }
 0x10d   :  { %3005 = vmatmul.mubr.msk.f32.gmra.mrb[104].mxu1 %vm227_vm1, %v93_v45  ;;  %1007 = vmatprep.mubr.f32.mxu0 %v3195_v0 }
 0x10e   :  { %1840 = vmatprep.mubr.f32.mxu1 %v3195_v0 }
 0x10f   :  { %v691_v55 = vpop.f32.mrb[0].mxu0 }
 0x110   :  { %v692_v56 = vadd.f32 %v691_v55, %v3614_v50  ;;  %v1524_v57 = vpop.f32.mrb[0].mxu1  ;;  %v693_v58 = vpop.f32.mrb[1].mxu0  ;;  %2876 = vmatmul.mubr.msk.f32.gmra.mrb[106].mxu0 %vm227_vm1, %v94_v53 }
 0x111   :  { %v1525_v59 = vadd.f32 %v1524_v57, %v3618_v51  ;;  %v694_v60 = vadd.f32 %v693_v58, %v3620_v52  ;;  %v1526_v61 = vpop.f32.mrb[1].mxu1  ;;  %3006 = vmatmul.mubr.msk.f32.gmra.mrb[106].mxu1 %vm227_vm1, %v94_v53  ;;  %1013 = vmatprep.mubr.f32.mxu0 %v3195_v0  ;;  %v101_v57 = vld [vmem:[%s4675_s0 + $0x1e0] sm:$0xff] }
 0x112   :  { %2291 = vst [vmem:[#allocation7] sm:$0xff] %v692_v56  ;;  %v1527_v63 = vadd.f32 %v1526_v61, %v3626_v54  ;;  %1846 = vmatprep.mubr.f32.mxu1 %v3195_v0 }
 0x113   :  { %2293 = vst [vmem:[#allocation7 + $0x10] sm:$0xff] %v1525_v59  ;;  %2292 = vst [vmem:[#allocation7 + $0x8] sm:$0xff] %v694_v60  ;;  %v697_v1 = vpop.f32.mrb[2].mxu0 }
 0x114   :  { %2294 = vst [vmem:[#allocation7 + $0x18] sm:$0xff] %v1527_v63  ;;  %v698_v2 = vadd.f32 %v697_v1, %v3614_v50  ;;  %v1530_v3 = vpop.f32.mrb[2].mxu1  ;;  %v699_v4 = vpop.f32.mrb[3].mxu0  ;;  %2877 = vmatmul.mubr.msk.f32.gmra.mrb[108].mxu0 %vm227_vm1, %v95_v62 }
 0x115   :  { %v1531_v5 = vadd.f32 %v1530_v3, %v3618_v51  ;;  %v700_v6 = vadd.f32 %v699_v4, %v3620_v52  ;;  %v1532_v7 = vpop.f32.mrb[3].mxu1  ;;  %3007 = vmatmul.mubr.msk.f32.gmra.mrb[108].mxu1 %vm227_vm1, %v95_v62  ;;  %1019 = vmatprep.mubr.f32.mxu0 %v3195_v0  ;;  %v102_v3 = vld [vmem:[%s4675_s0 + $0x1e8] sm:$0xff] }
 0x116   :  { %2295 = vst [vmem:[#allocation7 + $0x20] sm:$0xff] %v698_v2  ;;  %v1533_v9 = vadd.f32 %v1532_v7, %v3626_v54  ;;  %1852 = vmatprep.mubr.f32.mxu1 %v3195_v0 }
 0x117   :  { %2297 = vst [vmem:[#allocation7 + $0x30] sm:$0xff] %v1531_v5  ;;  %2296 = vst [vmem:[#allocation7 + $0x28] sm:$0xff] %v700_v6  ;;  %v703_v10 = vpop.f32.mrb[4].mxu0 }
 0x118   :  { %2298 = vst [vmem:[#allocation7 + $0x38] sm:$0xff] %v1533_v9  ;;  %v704_v11 = vadd.f32 %v703_v10, %v3614_v50  ;;  %v1536_v12 = vpop.f32.mrb[4].mxu1  ;;  %v705_v13 = vpop.f32.mrb[5].mxu0  ;;  %2878 = vmatmul.mubr.msk.f32.gmra.mrb[110].mxu0 %vm227_vm1, %v96_v8 }
 0x119   :  { %v1537_v14 = vadd.f32 %v1536_v12, %v3618_v51  ;;  %v706_v15 = vadd.f32 %v705_v13, %v3620_v52  ;;  %v1538_v16 = vpop.f32.mrb[5].mxu1  ;;  %3008 = vmatmul.mubr.msk.f32.gmra.mrb[110].mxu1 %vm227_vm1, %v96_v8  ;;  %1025 = vmatprep.mubr.f32.mxu0 %v3195_v0  ;;  %v103_v12 = vld [vmem:[%s4675_s0 + $0x1f0] sm:$0xff] }
 0x11a   :  { %2299 = vst [vmem:[#allocation7 + $0x40] sm:$0xff] %v704_v11  ;;  %v1539_v18 = vadd.f32 %v1538_v16, %v3626_v54  ;;  %1858 = vmatprep.mubr.f32.mxu1 %v3195_v0 }
 0x11b   :  { %2301 = vst [vmem:[#allocation7 + $0x50] sm:$0xff] %v1537_v14  ;;  %2300 = vst [vmem:[#allocation7 + $0x48] sm:$0xff] %v706_v15  ;;  %v709_v19 = vpop.f32.mrb[6].mxu0 }
 0x11c   :  { %2302 = vst [vmem:[#allocation7 + $0x58] sm:$0xff] %v1539_v18  ;;  %v710_v20 = vadd.f32 %v709_v19, %v3614_v50  ;;  %v1542_v21 = vpop.f32.mrb[6].mxu1  ;;  %v711_v22 = vpop.f32.mrb[7].mxu0  ;;  %2879 = vmatmul.mubr.msk.f32.gmra.mrb[112].mxu0 %vm227_vm1, %v97_v17 }
 0x11d   :  { %v1543_v23 = vadd.f32 %v1542_v21, %v3618_v51  ;;  %v712_v24 = vadd.f32 %v711_v22, %v3620_v52  ;;  %v1544_v25 = vpop.f32.mrb[7].mxu1  ;;  %3009 = vmatmul.mubr.msk.f32.gmra.mrb[112].mxu1 %vm227_vm1, %v97_v17  ;;  %1031 = vmatprep.mubr.f32.mxu0 %v3195_v0  ;;  %v104_v21 = vld [vmem:[%s4675_s0 + $0x1f8] sm:$0xff] }
 0x11e   :  { %2303 = vst [vmem:[#allocation7 + $0x60] sm:$0xff] %v710_v20  ;;  %v1545_v27 = vadd.f32 %v1544_v25, %v3626_v54  ;;  %1864 = vmatprep.mubr.f32.mxu1 %v3195_v0 }
 0x11f   :  { %2305 = vst [vmem:[#allocation7 + $0x70] sm:$0xff] %v1543_v23  ;;  %2304 = vst [vmem:[#allocation7 + $0x68] sm:$0xff] %v712_v24  ;;  %v715_v28 = vpop.f32.mrb[8].mxu0 }
 0x120   :  { %2306 = vst [vmem:[#allocation7 + $0x78] sm:$0xff] %v1545_v27  ;;  %v716_v29 = vadd.f32 %v715_v28, %v3614_v50  ;;  %v1548_v30 = vpop.f32.mrb[8].mxu1  ;;  %v717_v31 = vpop.f32.mrb[9].mxu0  ;;  %2880 = vmatmul.mubr.msk.f32.gmra.mrb[114].mxu0 %vm227_vm1, %v98_v26 }
 0x121   :  { %v1549_v32 = vadd.f32 %v1548_v30, %v3618_v51  ;;  %v718_v33 = vadd.f32 %v717_v31, %v3620_v52  ;;  %v1550_v34 = vpop.f32.mrb[9].mxu1  ;;  %3010 = vmatmul.mubr.msk.f32.gmra.mrb[114].mxu1 %vm227_vm1, %v98_v26  ;;  %1037 = vmatprep.mubr.f32.mxu0 %v3195_v0  ;;  %v105_v30 = vld [vmem:[%s4675_s0 + $0x200] sm:$0xff] }
 0x122   :  { %2307 = vst [vmem:[#allocation7 + $0x80] sm:$0xff] %v716_v29  ;;  %v1551_v36 = vadd.f32 %v1550_v34, %v3626_v54  ;;  %1870 = vmatprep.mubr.f32.mxu1 %v3195_v0 }
 0x123   :  { %2309 = vst [vmem:[#allocation7 + $0x90] sm:$0xff] %v1549_v32  ;;  %2308 = vst [vmem:[#allocation7 + $0x88] sm:$0xff] %v718_v33  ;;  %v721_v37 = vpop.f32.mrb[10].mxu0 }
 0x124   :  { %2310 = vst [vmem:[#allocation7 + $0x98] sm:$0xff] %v1551_v36  ;;  %v722_v38 = vadd.f32 %v721_v37, %v3614_v50  ;;  %v1554_v39 = vpop.f32.mrb[10].mxu1  ;;  %v723_v40 = vpop.f32.mrb[11].mxu0  ;;  %2881 = vmatmul.mubr.msk.f32.gmra.mrb[116].mxu0 %vm227_vm1, %v99_v35 }
 0x125   :  { %v1555_v41 = vadd.f32 %v1554_v39, %v3618_v51  ;;  %v724_v42 = vadd.f32 %v723_v40, %v3620_v52  ;;  %v1556_v43 = vpop.f32.mrb[11].mxu1  ;;  %3011 = vmatmul.mubr.msk.f32.gmra.mrb[116].mxu1 %vm227_vm1, %v99_v35  ;;  %1043 = vmatprep.mubr.f32.mxu0 %v3195_v0  ;;  %v106_v39 = vld [vmem:[%s4675_s0 + $0x208] sm:$0xff] }
 0x126   :  { %2311 = vst [vmem:[#allocation7 + $0xa0] sm:$0xff] %v722_v38  ;;  %v1557_v45 = vadd.f32 %v1556_v43, %v3626_v54  ;;  %1876 = vmatprep.mubr.f32.mxu1 %v3195_v0 }
 0x127   :  { %2313 = vst [vmem:[#allocation7 + $0xb0] sm:$0xff] %v1555_v41  ;;  %2312 = vst [vmem:[#allocation7 + $0xa8] sm:$0xff] %v724_v42  ;;  %v727_v46 = vpop.f32.mrb[12].mxu0 }
 0x128   :  { %2314 = vst [vmem:[#allocation7 + $0xb8] sm:$0xff] %v1557_v45  ;;  %v728_v47 = vadd.f32 %v727_v46, %v3614_v50  ;;  %v1560_v48 = vpop.f32.mrb[12].mxu1  ;;  %v729_v49 = vpop.f32.mrb[13].mxu0  ;;  %2882 = vmatmul.mubr.msk.f32.gmra.mrb[118].mxu0 %vm227_vm1, %v100_v44 }
 0x129   :  { %v1561_v53 = vadd.f32 %v1560_v48, %v3618_v51  ;;  %v730_v55 = vadd.f32 %v729_v49, %v3620_v52  ;;  %v1562_v56 = vpop.f32.mrb[13].mxu1  ;;  %3012 = vmatmul.mubr.msk.f32.gmra.mrb[118].mxu1 %vm227_vm1, %v100_v44  ;;  %1049 = vmatprep.mubr.f32.mxu0 %v3195_v0  ;;  %v107_v48 = vld [vmem:[%s4675_s0 + $0x210] sm:$0xff] }
 0x12a   :  { %2315 = vst [vmem:[#allocation7 + $0xc0] sm:$0xff] %v728_v47  ;;  %v1563_v58 = vadd.f32 %v1562_v56, %v3626_v54  ;;  %1882 = vmatprep.mubr.f32.mxu1 %v3195_v0 }
 0x12b   :  { %2317 = vst [vmem:[#allocation7 + $0xd0] sm:$0xff] %v1561_v53  ;;  %2316 = vst [vmem:[#allocation7 + $0xc8] sm:$0xff] %v730_v55  ;;  %v733_v59 = vpop.f32.mrb[14].mxu0 }
 0x12c   :  { %2318 = vst [vmem:[#allocation7 + $0xd8] sm:$0xff] %v1563_v58  ;;  %v734_v60 = vadd.f32 %v733_v59, %v3614_v50  ;;  %v1566_v61 = vpop.f32.mrb[14].mxu1  ;;  %v735_v62 = vpop.f32.mrb[15].mxu0  ;;  %2883 = vmatmul.mubr.msk.f32.gmra.mrb[120].mxu0 %vm227_vm1, %v101_v57 }
 0x12d   :  { %v1567_v63 = vadd.f32 %v1566_v61, %v3618_v51  ;;  %v736_v1 = vadd.f32 %v735_v62, %v3620_v52  ;;  %v1568_v2 = vpop.f32.mrb[15].mxu1  ;;  %3013 = vmatmul.mubr.msk.f32.gmra.mrb[120].mxu1 %vm227_vm1, %v101_v57  ;;  %1055 = vmatprep.mubr.f32.mxu0 %v3195_v0  ;;  %v108_v61 = vld [vmem:[%s4675_s0 + $0x218] sm:$0xff] }
 0x12e   :  { %2319 = vst [vmem:[#allocation7 + $0xe0] sm:$0xff] %v734_v60  ;;  %v1569_v4 = vadd.f32 %v1568_v2, %v3626_v54  ;;  %1888 = vmatprep.mubr.f32.mxu1 %v3195_v0 }
 0x12f   :  { %2321 = vst [vmem:[#allocation7 + $0xf0] sm:$0xff] %v1567_v63  ;;  %2320 = vst [vmem:[#allocation7 + $0xe8] sm:$0xff] %v736_v1  ;;  %v739_v5 = vpop.f32.mrb[16].mxu0 }
 0x130   :  { %2322 = vst [vmem:[#allocation7 + $0xf8] sm:$0xff] %v1569_v4  ;;  %v740_v6 = vadd.f32 %v739_v5, %v3614_v50  ;;  %v1572_v7 = vpop.f32.mrb[16].mxu1  ;;  %v741_v8 = vpop.f32.mrb[17].mxu0  ;;  %2884 = vmatmul.mubr.msk.f32.gmra.mrb[122].mxu0 %vm227_vm1, %v102_v3 }
 0x131   :  { %v1573_v9 = vadd.f32 %v1572_v7, %v3618_v51  ;;  %v742_v10 = vadd.f32 %v741_v8, %v3620_v52  ;;  %v1574_v11 = vpop.f32.mrb[17].mxu1  ;;  %3014 = vmatmul.mubr.msk.f32.gmra.mrb[122].mxu1 %vm227_vm1, %v102_v3  ;;  %1061 = vmatprep.mubr.f32.mxu0 %v3195_v0  ;;  %v109_v7 = vld [vmem:[%s4675_s0 + $0x220] sm:$0xff] }
 0x132   :  { %2323 = vst [vmem:[#allocation7 + $0x100] sm:$0xff] %v740_v6  ;;  %v1575_v13 = vadd.f32 %v1574_v11, %v3626_v54  ;;  %1894 = vmatprep.mubr.f32.mxu1 %v3195_v0 }
 0x133   :  { %2325 = vst [vmem:[#allocation7 + $0x110] sm:$0xff] %v1573_v9  ;;  %2324 = vst [vmem:[#allocation7 + $0x108] sm:$0xff] %v742_v10  ;;  %v745_v14 = vpop.f32.mrb[18].mxu0 }
 0x134   :  { %2326 = vst [vmem:[#allocation7 + $0x118] sm:$0xff] %v1575_v13  ;;  %v746_v15 = vadd.f32 %v745_v14, %v3614_v50  ;;  %v1578_v16 = vpop.f32.mrb[18].mxu1  ;;  %v747_v17 = vpop.f32.mrb[19].mxu0  ;;  %2885 = vmatmul.mubr.msk.f32.gmra.mrb[124].mxu0 %vm227_vm1, %v103_v12 }
 0x135   :  { %v1579_v18 = vadd.f32 %v1578_v16, %v3618_v51  ;;  %v748_v19 = vadd.f32 %v747_v17, %v3620_v52  ;;  %v1580_v20 = vpop.f32.mrb[19].mxu1  ;;  %3015 = vmatmul.mubr.msk.f32.gmra.mrb[124].mxu1 %vm227_vm1, %v103_v12  ;;  %1067 = vmatprep.mubr.f32.mxu0 %v3195_v0  ;;  %v110_v16 = vld [vmem:[%s4675_s0 + $0x228] sm:$0xff] }
 0x136   :  { %2327 = vst [vmem:[#allocation7 + $0x120] sm:$0xff] %v746_v15  ;;  %v1581_v22 = vadd.f32 %v1580_v20, %v3626_v54  ;;  %1900 = vmatprep.mubr.f32.mxu1 %v3195_v0 }
 0x137   :  { %2329 = vst [vmem:[#allocation7 + $0x130] sm:$0xff] %v1579_v18  ;;  %2328 = vst [vmem:[#allocation7 + $0x128] sm:$0xff] %v748_v19  ;;  %v751_v23 = vpop.f32.mrb[20].mxu0 }
 0x138   :  { %2330 = vst [vmem:[#allocation7 + $0x138] sm:$0xff] %v1581_v22  ;;  %v752_v24 = vadd.f32 %v751_v23, %v3614_v50  ;;  %v1584_v25 = vpop.f32.mrb[20].mxu1  ;;  %v753_v26 = vpop.f32.mrb[21].mxu0  ;;  %2886 = vmatmul.mubr.msk.f32.gmra.mrb[126].mxu0 %vm227_vm1, %v104_v21 }
 0x139   :  { %v1585_v27 = vadd.f32 %v1584_v25, %v3618_v51  ;;  %v754_v28 = vadd.f32 %v753_v26, %v3620_v52  ;;  %v1586_v29 = vpop.f32.mrb[21].mxu1  ;;  %3016 = vmatmul.mubr.msk.f32.gmra.mrb[126].mxu1 %vm227_vm1, %v104_v21  ;;  %1073 = vmatprep.mubr.f32.mxu0 %v3195_v0  ;;  %v111_v25 = vld [vmem:[%s4675_s0 + $0x230] sm:$0xff] }
 0x13a   :  { %2331 = vst [vmem:[#allocation7 + $0x140] sm:$0xff] %v752_v24  ;;  %v1587_v31 = vadd.f32 %v1586_v29, %v3626_v54  ;;  %1906 = vmatprep.mubr.f32.mxu1 %v3195_v0 }
 0x13b   :  { %2333 = vst [vmem:[#allocation7 + $0x150] sm:$0xff] %v1585_v27  ;;  %2332 = vst [vmem:[#allocation7 + $0x148] sm:$0xff] %v754_v28  ;;  %v757_v32 = vpop.f32.mrb[22].mxu0 }
 0x13c   :  { %2334 = vst [vmem:[#allocation7 + $0x158] sm:$0xff] %v1587_v31  ;;  %v758_v33 = vadd.f32 %v757_v32, %v3614_v50  ;;  %v1590_v34 = vpop.f32.mrb[22].mxu1  ;;  %v759_v35 = vpop.f32.mrb[23].mxu0  ;;  %2887 = vmatmul.mubr.msk.f32.gmra.mrb[128].mxu0 %vm227_vm1, %v105_v30 }
 0x13d   :  { %v1591_v36 = vadd.f32 %v1590_v34, %v3618_v51  ;;  %v760_v37 = vadd.f32 %v759_v35, %v3620_v52  ;;  %v1592_v38 = vpop.f32.mrb[23].mxu1  ;;  %3017 = vmatmul.mubr.msk.f32.gmra.mrb[128].mxu1 %vm227_vm1, %v105_v30  ;;  %1079 = vmatprep.mubr.f32.mxu0 %v3195_v0  ;;  %v112_v34 = vld [vmem:[%s4675_s0 + $0x238] sm:$0xff] }
 0x13e   :  { %2335 = vst [vmem:[#allocation7 + $0x160] sm:$0xff] %v758_v33  ;;  %v1593_v40 = vadd.f32 %v1592_v38, %v3626_v54  ;;  %1912 = vmatprep.mubr.f32.mxu1 %v3195_v0 }
 0x13f   :  { %2337 = vst [vmem:[#allocation7 + $0x170] sm:$0xff] %v1591_v36  ;;  %2336 = vst [vmem:[#allocation7 + $0x168] sm:$0xff] %v760_v37  ;;  %v763_v41 = vpop.f32.mrb[24].mxu0 }
 0x140   :  { %2338 = vst [vmem:[#allocation7 + $0x178] sm:$0xff] %v1593_v40  ;;  %v764_v42 = vadd.f32 %v763_v41, %v3614_v50  ;;  %v1596_v43 = vpop.f32.mrb[24].mxu1  ;;  %v765_v44 = vpop.f32.mrb[25].mxu0  ;;  %2888 = vmatmul.mubr.msk.f32.gmra.mrb[130].mxu0 %vm227_vm1, %v106_v39 }
 0x141   :  { %v1597_v45 = vadd.f32 %v1596_v43, %v3618_v51  ;;  %v766_v46 = vadd.f32 %v765_v44, %v3620_v52  ;;  %v1598_v47 = vpop.f32.mrb[25].mxu1  ;;  %3018 = vmatmul.mubr.msk.f32.gmra.mrb[130].mxu1 %vm227_vm1, %v106_v39  ;;  %1085 = vmatprep.mubr.f32.mxu0 %v3195_v0  ;;  %v113_v43 = vld [vmem:[%s4675_s0 + $0x240] sm:$0xff] }
 0x142   :  { %2339 = vst [vmem:[#allocation7 + $0x180] sm:$0xff] %v764_v42  ;;  %v1599_v49 = vadd.f32 %v1598_v47, %v3626_v54  ;;  %1918 = vmatprep.mubr.f32.mxu1 %v3195_v0 }
 0x143   :  { %2341 = vst [vmem:[#allocation7 + $0x190] sm:$0xff] %v1597_v45  ;;  %2340 = vst [vmem:[#allocation7 + $0x188] sm:$0xff] %v766_v46  ;;  %v769_v53 = vpop.f32.mrb[26].mxu0 }
 0x144   :  { %2342 = vst [vmem:[#allocation7 + $0x198] sm:$0xff] %v1599_v49  ;;  %v770_v55 = vadd.f32 %v769_v53, %v3614_v50  ;;  %v1602_v56 = vpop.f32.mrb[26].mxu1  ;;  %v771_v57 = vpop.f32.mrb[27].mxu0  ;;  %2889 = vmatmul.mubr.msk.f32.gmra.mrb[132].mxu0 %vm227_vm1, %v107_v48 }
 0x145   :  { %v1603_v58 = vadd.f32 %v1602_v56, %v3618_v51  ;;  %v772_v59 = vadd.f32 %v771_v57, %v3620_v52  ;;  %v1604_v60 = vpop.f32.mrb[27].mxu1  ;;  %3019 = vmatmul.mubr.msk.f32.gmra.mrb[132].mxu1 %vm227_vm1, %v107_v48  ;;  %1091 = vmatprep.mubr.f32.mxu0 %v3195_v0  ;;  %v114_v56 = vld [vmem:[%s4675_s0 + $0x248] sm:$0xff] }
 0x146   :  { %2343 = vst [vmem:[#allocation7 + $0x1a0] sm:$0xff] %v770_v55  ;;  %v1605_v62 = vadd.f32 %v1604_v60, %v3626_v54  ;;  %1924 = vmatprep.mubr.f32.mxu1 %v3195_v0 }
 0x147   :  { %2345 = vst [vmem:[#allocation7 + $0x1b0] sm:$0xff] %v1603_v58  ;;  %2344 = vst [vmem:[#allocation7 + $0x1a8] sm:$0xff] %v772_v59  ;;  %v775_v63 = vpop.f32.mrb[28].mxu0 }
 0x148   :  { %2346 = vst [vmem:[#allocation7 + $0x1b8] sm:$0xff] %v1605_v62  ;;  %v776_v1 = vadd.f32 %v775_v63, %v3614_v50  ;;  %v1608_v2 = vpop.f32.mrb[28].mxu1  ;;  %v777_v3 = vpop.f32.mrb[29].mxu0  ;;  %2890 = vmatmul.mubr.msk.f32.gmra.mrb[134].mxu0 %vm227_vm1, %v108_v61 }
 0x149   :  { %v1609_v4 = vadd.f32 %v1608_v2, %v3618_v51  ;;  %v778_v5 = vadd.f32 %v777_v3, %v3620_v52  ;;  %v1610_v6 = vpop.f32.mrb[29].mxu1  ;;  %3020 = vmatmul.mubr.msk.f32.gmra.mrb[134].mxu1 %vm227_vm1, %v108_v61  ;;  %1097 = vmatprep.mubr.f32.mxu0 %v3195_v0  ;;  %v115_v2 = vld [vmem:[%s4675_s0 + $0x250] sm:$0xff] }
 0x14a   :  { %2347 = vst [vmem:[#allocation7 + $0x1c0] sm:$0xff] %v776_v1  ;;  %v1611_v8 = vadd.f32 %v1610_v6, %v3626_v54  ;;  %1930 = vmatprep.mubr.f32.mxu1 %v3195_v0 }
 0x14b   :  { %2349 = vst [vmem:[#allocation7 + $0x1d0] sm:$0xff] %v1609_v4  ;;  %2348 = vst [vmem:[#allocation7 + $0x1c8] sm:$0xff] %v778_v5  ;;  %v781_v9 = vpop.f32.mrb[30].mxu0 }
 0x14c   :  { %2350 = vst [vmem:[#allocation7 + $0x1d8] sm:$0xff] %v1611_v8  ;;  %v782_v10 = vadd.f32 %v781_v9, %v3614_v50  ;;  %v1614_v11 = vpop.f32.mrb[30].mxu1  ;;  %v783_v12 = vpop.f32.mrb[31].mxu0  ;;  %2891 = vmatmul.mubr.msk.f32.gmra.mrb[136].mxu0 %vm227_vm1, %v109_v7 }
 0x14d   :  { %v1615_v13 = vadd.f32 %v1614_v11, %v3618_v51  ;;  %v784_v14 = vadd.f32 %v783_v12, %v3620_v52  ;;  %v1616_v15 = vpop.f32.mrb[31].mxu1  ;;  %3021 = vmatmul.mubr.msk.f32.gmra.mrb[136].mxu1 %vm227_vm1, %v109_v7  ;;  %1103 = vmatprep.mubr.f32.mxu0 %v3195_v0  ;;  %v116_v11 = vld [vmem:[%s4675_s0 + $0x258] sm:$0xff] }
 0x14e   :  { %2351 = vst [vmem:[#allocation7 + $0x1e0] sm:$0xff] %v782_v10  ;;  %v1617_v17 = vadd.f32 %v1616_v15, %v3626_v54  ;;  %1936 = vmatprep.mubr.f32.mxu1 %v3195_v0 }
 0x14f   :  { %2353 = vst [vmem:[#allocation7 + $0x1f0] sm:$0xff] %v1615_v13  ;;  %2352 = vst [vmem:[#allocation7 + $0x1e8] sm:$0xff] %v784_v14  ;;  %v787_v18 = vpop.f32.mrb[32].mxu0 }
 0x150   :  { %2354 = vst [vmem:[#allocation7 + $0x1f8] sm:$0xff] %v1617_v17  ;;  %v788_v19 = vadd.f32 %v787_v18, %v3614_v50  ;;  %v1620_v20 = vpop.f32.mrb[32].mxu1  ;;  %v789_v21 = vpop.f32.mrb[33].mxu0  ;;  %2892 = vmatmul.mubr.msk.f32.gmra.mrb[138].mxu0 %vm227_vm1, %v110_v16 }
 0x151   :  { %v1621_v22 = vadd.f32 %v1620_v20, %v3618_v51  ;;  %v790_v23 = vadd.f32 %v789_v21, %v3620_v52  ;;  %v1622_v24 = vpop.f32.mrb[33].mxu1  ;;  %3022 = vmatmul.mubr.msk.f32.gmra.mrb[138].mxu1 %vm227_vm1, %v110_v16  ;;  %1109 = vmatprep.mubr.f32.mxu0 %v3195_v0  ;;  %v117_v20 = vld [vmem:[%s4675_s0 + $0x260] sm:$0xff] }
 0x152   :  { %2355 = vst [vmem:[#allocation7 + $0x200] sm:$0xff] %v788_v19  ;;  %v1623_v26 = vadd.f32 %v1622_v24, %v3626_v54  ;;  %1942 = vmatprep.mubr.f32.mxu1 %v3195_v0 }
 0x153   :  { %2357 = vst [vmem:[#allocation7 + $0x210] sm:$0xff] %v1621_v22  ;;  %2356 = vst [vmem:[#allocation7 + $0x208] sm:$0xff] %v790_v23  ;;  %v793_v27 = vpop.f32.mrb[34].mxu0 }
 0x154   :  { %2358 = vst [vmem:[#allocation7 + $0x218] sm:$0xff] %v1623_v26  ;;  %v794_v28 = vadd.f32 %v793_v27, %v3614_v50  ;;  %v1626_v29 = vpop.f32.mrb[34].mxu1  ;;  %v795_v30 = vpop.f32.mrb[35].mxu0  ;;  %2893 = vmatmul.mubr.msk.f32.gmra.mrb[140].mxu0 %vm227_vm1, %v111_v25 }
 0x155   :  { %v1627_v31 = vadd.f32 %v1626_v29, %v3618_v51  ;;  %v796_v32 = vadd.f32 %v795_v30, %v3620_v52  ;;  %v1628_v33 = vpop.f32.mrb[35].mxu1  ;;  %3023 = vmatmul.mubr.msk.f32.gmra.mrb[140].mxu1 %vm227_vm1, %v111_v25  ;;  %1115 = vmatprep.mubr.f32.mxu0 %v3195_v0  ;;  %v118_v29 = vld [vmem:[%s4675_s0 + $0x268] sm:$0xff] }
 0x156   :  { %2359 = vst [vmem:[#allocation7 + $0x220] sm:$0xff] %v794_v28  ;;  %v1629_v35 = vadd.f32 %v1628_v33, %v3626_v54  ;;  %1948 = vmatprep.mubr.f32.mxu1 %v3195_v0 }
 0x157   :  { %2361 = vst [vmem:[#allocation7 + $0x230] sm:$0xff] %v1627_v31  ;;  %2360 = vst [vmem:[#allocation7 + $0x228] sm:$0xff] %v796_v32  ;;  %v799_v36 = vpop.f32.mrb[36].mxu0 }
 0x158   :  { %2362 = vst [vmem:[#allocation7 + $0x238] sm:$0xff] %v1629_v35  ;;  %v800_v37 = vadd.f32 %v799_v36, %v3614_v50  ;;  %v1632_v38 = vpop.f32.mrb[36].mxu1  ;;  %v801_v39 = vpop.f32.mrb[37].mxu0  ;;  %2894 = vmatmul.mubr.msk.f32.gmra.mrb[142].mxu0 %vm227_vm1, %v112_v34 }
 0x159   :  { %v1633_v40 = vadd.f32 %v1632_v38, %v3618_v51  ;;  %v802_v41 = vadd.f32 %v801_v39, %v3620_v52  ;;  %v1634_v42 = vpop.f32.mrb[37].mxu1  ;;  %3024 = vmatmul.mubr.msk.f32.gmra.mrb[142].mxu1 %vm227_vm1, %v112_v34  ;;  %1121 = vmatprep.mubr.f32.mxu0 %v3195_v0  ;;  %v119_v38 = vld [vmem:[%s4675_s0 + $0x270] sm:$0xff] }
 0x15a   :  { %2363 = vst [vmem:[#allocation7 + $0x240] sm:$0xff] %v800_v37  ;;  %v1635_v44 = vadd.f32 %v1634_v42, %v3626_v54  ;;  %1954 = vmatprep.mubr.f32.mxu1 %v3195_v0 }
 0x15b   :  { %2365 = vst [vmem:[#allocation7 + $0x250] sm:$0xff] %v1633_v40  ;;  %2364 = vst [vmem:[#allocation7 + $0x248] sm:$0xff] %v802_v41  ;;  %v805_v45 = vpop.f32.mrb[38].mxu0 }
 0x15c   :  { %2366 = vst [vmem:[#allocation7 + $0x258] sm:$0xff] %v1635_v44  ;;  %v806_v46 = vadd.f32 %v805_v45, %v3614_v50  ;;  %v1638_v47 = vpop.f32.mrb[38].mxu1  ;;  %v807_v48 = vpop.f32.mrb[39].mxu0  ;;  %2895 = vmatmul.mubr.msk.f32.gmra.mrb[144].mxu0 %vm227_vm1, %v113_v43 }
 0x15d   :  { %v1639_v49 = vadd.f32 %v1638_v47, %v3618_v51  ;;  %v808_v53 = vadd.f32 %v807_v48, %v3620_v52  ;;  %v1640_v55 = vpop.f32.mrb[39].mxu1  ;;  %3025 = vmatmul.mubr.msk.f32.gmra.mrb[144].mxu1 %vm227_vm1, %v113_v43  ;;  %1127 = vmatprep.mubr.f32.mxu0 %v3195_v0  ;;  %v120_v47 = vld [vmem:[%s4675_s0 + $0x278] sm:$0xff] }
 0x15e   :  { %2367 = vst [vmem:[#allocation7 + $0x260] sm:$0xff] %v806_v46  ;;  %v1641_v57 = vadd.f32 %v1640_v55, %v3626_v54  ;;  %1960 = vmatprep.mubr.f32.mxu1 %v3195_v0 }
 0x15f   :  { %2369 = vst [vmem:[#allocation7 + $0x270] sm:$0xff] %v1639_v49  ;;  %2368 = vst [vmem:[#allocation7 + $0x268] sm:$0xff] %v808_v53  ;;  %v811_v58 = vpop.f32.mrb[40].mxu0 }
 0x160   :  { %2370 = vst [vmem:[#allocation7 + $0x278] sm:$0xff] %v1641_v57  ;;  %v812_v59 = vadd.f32 %v811_v58, %v3614_v50  ;;  %v1644_v60 = vpop.f32.mrb[40].mxu1  ;;  %v813_v61 = vpop.f32.mrb[41].mxu0  ;;  %2896 = vmatmul.mubr.msk.f32.gmra.mrb[146].mxu0 %vm227_vm1, %v114_v56 }
 0x161   :  { %v1645_v62 = vadd.f32 %v1644_v60, %v3618_v51  ;;  %v814_v63 = vadd.f32 %v813_v61, %v3620_v52  ;;  %v1646_v1 = vpop.f32.mrb[41].mxu1  ;;  %3026 = vmatmul.mubr.msk.f32.gmra.mrb[146].mxu1 %vm227_vm1, %v114_v56  ;;  %1133 = vmatprep.mubr.f32.mxu0 %v3195_v0  ;;  %v121_v60 = vld [vmem:[%s4675_s0 + $0x280] sm:$0xff] }
 0x162   :  { %2371 = vst [vmem:[#allocation7 + $0x280] sm:$0xff] %v812_v59  ;;  %v1647_v3 = vadd.f32 %v1646_v1, %v3626_v54  ;;  %1966 = vmatprep.mubr.f32.mxu1 %v3195_v0 }
 0x163   :  { %2373 = vst [vmem:[#allocation7 + $0x290] sm:$0xff] %v1645_v62  ;;  %2372 = vst [vmem:[#allocation7 + $0x288] sm:$0xff] %v814_v63  ;;  %v817_v4 = vpop.f32.mrb[42].mxu0 }
 0x164   :  { %2374 = vst [vmem:[#allocation7 + $0x298] sm:$0xff] %v1647_v3  ;;  %v818_v5 = vadd.f32 %v817_v4, %v3614_v50  ;;  %v1650_v6 = vpop.f32.mrb[42].mxu1  ;;  %v819_v7 = vpop.f32.mrb[43].mxu0  ;;  %2897 = vmatmul.mubr.msk.f32.gmra.mrb[148].mxu0 %vm227_vm1, %v115_v2 }
 0x165   :  { %v1651_v8 = vadd.f32 %v1650_v6, %v3618_v51  ;;  %v820_v9 = vadd.f32 %v819_v7, %v3620_v52  ;;  %v1652_v10 = vpop.f32.mrb[43].mxu1  ;;  %3027 = vmatmul.mubr.msk.f32.gmra.mrb[148].mxu1 %vm227_vm1, %v115_v2  ;;  %1139 = vmatprep.mubr.f32.mxu0 %v3195_v0  ;;  %v122_v6 = vld [vmem:[%s4675_s0 + $0x288] sm:$0xff] }
 0x166   :  { %2375 = vst [vmem:[#allocation7 + $0x2a0] sm:$0xff] %v818_v5  ;;  %v1653_v12 = vadd.f32 %v1652_v10, %v3626_v54  ;;  %1972 = vmatprep.mubr.f32.mxu1 %v3195_v0 }
 0x167   :  { %2377 = vst [vmem:[#allocation7 + $0x2b0] sm:$0xff] %v1651_v8  ;;  %2376 = vst [vmem:[#allocation7 + $0x2a8] sm:$0xff] %v820_v9  ;;  %v823_v13 = vpop.f32.mrb[44].mxu0 }
 0x168   :  { %2378 = vst [vmem:[#allocation7 + $0x2b8] sm:$0xff] %v1653_v12  ;;  %v824_v14 = vadd.f32 %v823_v13, %v3614_v50  ;;  %v1656_v15 = vpop.f32.mrb[44].mxu1  ;;  %v825_v16 = vpop.f32.mrb[45].mxu0  ;;  %2898 = vmatmul.mubr.msk.f32.gmra.mrb[150].mxu0 %vm227_vm1, %v116_v11 }
 0x169   :  { %v1657_v17 = vadd.f32 %v1656_v15, %v3618_v51  ;;  %v826_v18 = vadd.f32 %v825_v16, %v3620_v52  ;;  %v1658_v19 = vpop.f32.mrb[45].mxu1  ;;  %3028 = vmatmul.mubr.msk.f32.gmra.mrb[150].mxu1 %vm227_vm1, %v116_v11  ;;  %1145 = vmatprep.mubr.f32.mxu0 %v3195_v0  ;;  %v123_v15 = vld [vmem:[%s4675_s0 + $0x290] sm:$0xff] }
 0x16a   :  { %2379 = vst [vmem:[#allocation7 + $0x2c0] sm:$0xff] %v824_v14  ;;  %v1659_v21 = vadd.f32 %v1658_v19, %v3626_v54  ;;  %1978 = vmatprep.mubr.f32.mxu1 %v3195_v0 }
 0x16b   :  { %2381 = vst [vmem:[#allocation7 + $0x2d0] sm:$0xff] %v1657_v17  ;;  %2380 = vst [vmem:[#allocation7 + $0x2c8] sm:$0xff] %v826_v18  ;;  %v829_v22 = vpop.f32.mrb[46].mxu0 }
 0x16c   :  { %2382 = vst [vmem:[#allocation7 + $0x2d8] sm:$0xff] %v1659_v21  ;;  %v830_v23 = vadd.f32 %v829_v22, %v3614_v50  ;;  %v1662_v24 = vpop.f32.mrb[46].mxu1  ;;  %v831_v25 = vpop.f32.mrb[47].mxu0  ;;  %2899 = vmatmul.mubr.msk.f32.gmra.mrb[152].mxu0 %vm227_vm1, %v117_v20 }
 0x16d   :  { %v1663_v26 = vadd.f32 %v1662_v24, %v3618_v51  ;;  %v832_v27 = vadd.f32 %v831_v25, %v3620_v52  ;;  %v1664_v28 = vpop.f32.mrb[47].mxu1  ;;  %3029 = vmatmul.mubr.msk.f32.gmra.mrb[152].mxu1 %vm227_vm1, %v117_v20  ;;  %1151 = vmatprep.mubr.f32.mxu0 %v3195_v0  ;;  %v124_v24 = vld [vmem:[%s4675_s0 + $0x298] sm:$0xff] }
 0x16e   :  { %2383 = vst [vmem:[#allocation7 + $0x2e0] sm:$0xff] %v830_v23  ;;  %v1665_v30 = vadd.f32 %v1664_v28, %v3626_v54  ;;  %1984 = vmatprep.mubr.f32.mxu1 %v3195_v0 }
 0x16f   :  { %2385 = vst [vmem:[#allocation7 + $0x2f0] sm:$0xff] %v1663_v26  ;;  %2384 = vst [vmem:[#allocation7 + $0x2e8] sm:$0xff] %v832_v27  ;;  %v835_v31 = vpop.f32.mrb[48].mxu0 }
 0x170   :  { %2386 = vst [vmem:[#allocation7 + $0x2f8] sm:$0xff] %v1665_v30  ;;  %v836_v32 = vadd.f32 %v835_v31, %v3614_v50  ;;  %v1668_v33 = vpop.f32.mrb[48].mxu1  ;;  %v837_v34 = vpop.f32.mrb[49].mxu0  ;;  %2900 = vmatmul.mubr.msk.f32.gmra.mrb[154].mxu0 %vm227_vm1, %v118_v29 }
 0x171   :  { %v1669_v35 = vadd.f32 %v1668_v33, %v3618_v51  ;;  %v838_v36 = vadd.f32 %v837_v34, %v3620_v52  ;;  %v1670_v37 = vpop.f32.mrb[49].mxu1  ;;  %3030 = vmatmul.mubr.msk.f32.gmra.mrb[154].mxu1 %vm227_vm1, %v118_v29  ;;  %1157 = vmatprep.mubr.f32.mxu0 %v3195_v0  ;;  %v125_v33 = vld [vmem:[%s4675_s0 + $0x2a0] sm:$0xff] }
 0x172   :  { %2387 = vst [vmem:[#allocation7 + $0x300] sm:$0xff] %v836_v32  ;;  %v1671_v39 = vadd.f32 %v1670_v37, %v3626_v54  ;;  %1990 = vmatprep.mubr.f32.mxu1 %v3195_v0 }
 0x173   :  { %2389 = vst [vmem:[#allocation7 + $0x310] sm:$0xff] %v1669_v35  ;;  %2388 = vst [vmem:[#allocation7 + $0x308] sm:$0xff] %v838_v36  ;;  %v841_v40 = vpop.f32.mrb[50].mxu0 }
 0x174   :  { %2390 = vst [vmem:[#allocation7 + $0x318] sm:$0xff] %v1671_v39  ;;  %v842_v41 = vadd.f32 %v841_v40, %v3614_v50  ;;  %v1674_v42 = vpop.f32.mrb[50].mxu1  ;;  %v843_v43 = vpop.f32.mrb[51].mxu0  ;;  %2901 = vmatmul.mubr.msk.f32.gmra.mrb[156].mxu0 %vm227_vm1, %v119_v38 }
 0x175   :  { %v1675_v44 = vadd.f32 %v1674_v42, %v3618_v51  ;;  %v844_v45 = vadd.f32 %v843_v43, %v3620_v52  ;;  %v1676_v46 = vpop.f32.mrb[51].mxu1  ;;  %3031 = vmatmul.mubr.msk.f32.gmra.mrb[156].mxu1 %vm227_vm1, %v119_v38  ;;  %1163 = vmatprep.mubr.f32.mxu0 %v3195_v0  ;;  %v126_v42 = vld [vmem:[%s4675_s0 + $0x2a8] sm:$0xff] }
 0x176   :  { %2391 = vst [vmem:[#allocation7 + $0x320] sm:$0xff] %v842_v41  ;;  %v1677_v48 = vadd.f32 %v1676_v46, %v3626_v54  ;;  %1996 = vmatprep.mubr.f32.mxu1 %v3195_v0 }
 0x177   :  { %2393 = vst [vmem:[#allocation7 + $0x330] sm:$0xff] %v1675_v44  ;;  %2392 = vst [vmem:[#allocation7 + $0x328] sm:$0xff] %v844_v45  ;;  %v847_v49 = vpop.f32.mrb[52].mxu0 }
 0x178   :  { %2394 = vst [vmem:[#allocation7 + $0x338] sm:$0xff] %v1677_v48  ;;  %v848_v53 = vadd.f32 %v847_v49, %v3614_v50  ;;  %v1680_v55 = vpop.f32.mrb[52].mxu1  ;;  %v849_v56 = vpop.f32.mrb[53].mxu0  ;;  %2902 = vmatmul.mubr.msk.f32.gmra.mrb[158].mxu0 %vm227_vm1, %v120_v47 }
 0x179   :  { %v1681_v57 = vadd.f32 %v1680_v55, %v3618_v51  ;;  %v850_v58 = vadd.f32 %v849_v56, %v3620_v52  ;;  %v1682_v59 = vpop.f32.mrb[53].mxu1  ;;  %3032 = vmatmul.mubr.msk.f32.gmra.mrb[158].mxu1 %vm227_vm1, %v120_v47  ;;  %1169 = vmatprep.mubr.f32.mxu0 %v3195_v0  ;;  %v127_v55 = vld [vmem:[%s4675_s0 + $0x2b0] sm:$0xff] }
 0x17a   :  { %2395 = vst [vmem:[#allocation7 + $0x340] sm:$0xff] %v848_v53  ;;  %v1683_v61 = vadd.f32 %v1682_v59, %v3626_v54  ;;  %2002 = vmatprep.mubr.f32.mxu1 %v3195_v0 }
 0x17b   :  { %2397 = vst [vmem:[#allocation7 + $0x350] sm:$0xff] %v1681_v57  ;;  %2396 = vst [vmem:[#allocation7 + $0x348] sm:$0xff] %v850_v58  ;;  %v853_v62 = vpop.f32.mrb[54].mxu0 }
 0x17c   :  { %2398 = vst [vmem:[#allocation7 + $0x358] sm:$0xff] %v1683_v61  ;;  %v854_v63 = vadd.f32 %v853_v62, %v3614_v50  ;;  %v1686_v1 = vpop.f32.mrb[54].mxu1  ;;  %v855_v2 = vpop.f32.mrb[55].mxu0  ;;  %2903 = vmatmul.mubr.msk.f32.gmra.mrb[160].mxu0 %vm227_vm1, %v121_v60 }
 0x17d   :  { %v1687_v3 = vadd.f32 %v1686_v1, %v3618_v51  ;;  %v856_v4 = vadd.f32 %v855_v2, %v3620_v52  ;;  %v1688_v5 = vpop.f32.mrb[55].mxu1  ;;  %3033 = vmatmul.mubr.msk.f32.gmra.mrb[160].mxu1 %vm227_vm1, %v121_v60  ;;  %1175 = vmatprep.mubr.f32.mxu0 %v3195_v0  ;;  %v128_v1 = vld [vmem:[%s4675_s0 + $0x2b8] sm:$0xff] }
 0x17e   :  { %2399 = vst [vmem:[#allocation7 + $0x360] sm:$0xff] %v854_v63  ;;  %v1689_v7 = vadd.f32 %v1688_v5, %v3626_v54  ;;  %2008 = vmatprep.mubr.f32.mxu1 %v3195_v0 }
 0x17f   :  { %2401 = vst [vmem:[#allocation7 + $0x370] sm:$0xff] %v1687_v3  ;;  %2400 = vst [vmem:[#allocation7 + $0x368] sm:$0xff] %v856_v4  ;;  %v859_v8 = vpop.f32.mrb[56].mxu0 }
 0x180   :  { %2402 = vst [vmem:[#allocation7 + $0x378] sm:$0xff] %v1689_v7  ;;  %v860_v9 = vadd.f32 %v859_v8, %v3614_v50  ;;  %v1692_v10 = vpop.f32.mrb[56].mxu1  ;;  %v861_v11 = vpop.f32.mrb[57].mxu0  ;;  %2904 = vmatmul.mubr.msk.f32.gmra.mrb[162].mxu0 %vm227_vm1, %v122_v6 }
 0x181   :  { %v1693_v12 = vadd.f32 %v1692_v10, %v3618_v51  ;;  %v862_v13 = vadd.f32 %v861_v11, %v3620_v52  ;;  %v1694_v14 = vpop.f32.mrb[57].mxu1  ;;  %3034 = vmatmul.mubr.msk.f32.gmra.mrb[162].mxu1 %vm227_vm1, %v122_v6  ;;  %1181 = vmatprep.mubr.f32.mxu0 %v3195_v0  ;;  %v129_v10 = vld [vmem:[%s4675_s0 + $0x2c0] sm:$0xff] }
 0x182   :  { %2403 = vst [vmem:[#allocation7 + $0x380] sm:$0xff] %v860_v9  ;;  %v1695_v16 = vadd.f32 %v1694_v14, %v3626_v54  ;;  %2014 = vmatprep.mubr.f32.mxu1 %v3195_v0 }
 0x183   :  { %2405 = vst [vmem:[#allocation7 + $0x390] sm:$0xff] %v1693_v12  ;;  %2404 = vst [vmem:[#allocation7 + $0x388] sm:$0xff] %v862_v13  ;;  %v865_v17 = vpop.f32.mrb[58].mxu0 }
 0x184   :  { %2406 = vst [vmem:[#allocation7 + $0x398] sm:$0xff] %v1695_v16  ;;  %v866_v18 = vadd.f32 %v865_v17, %v3614_v50  ;;  %v1698_v19 = vpop.f32.mrb[58].mxu1  ;;  %v867_v20 = vpop.f32.mrb[59].mxu0  ;;  %2905 = vmatmul.mubr.msk.f32.gmra.mrb[164].mxu0 %vm227_vm1, %v123_v15 }
 0x185   :  { %v1699_v21 = vadd.f32 %v1698_v19, %v3618_v51  ;;  %v868_v22 = vadd.f32 %v867_v20, %v3620_v52  ;;  %v1700_v23 = vpop.f32.mrb[59].mxu1  ;;  %3035 = vmatmul.mubr.msk.f32.gmra.mrb[164].mxu1 %vm227_vm1, %v123_v15  ;;  %1187 = vmatprep.mubr.f32.mxu0 %v3195_v0  ;;  %v130_v19 = vld [vmem:[%s4675_s0 + $0x2c8] sm:$0xff] }
 0x186   :  { %2407 = vst [vmem:[#allocation7 + $0x3a0] sm:$0xff] %v866_v18  ;;  %v1701_v25 = vadd.f32 %v1700_v23, %v3626_v54  ;;  %2020 = vmatprep.mubr.f32.mxu1 %v3195_v0 }
 0x187   :  { %2409 = vst [vmem:[#allocation7 + $0x3b0] sm:$0xff] %v1699_v21  ;;  %2408 = vst [vmem:[#allocation7 + $0x3a8] sm:$0xff] %v868_v22  ;;  %v871_v26 = vpop.f32.mrb[60].mxu0 }
 0x188   :  { %2410 = vst [vmem:[#allocation7 + $0x3b8] sm:$0xff] %v1701_v25  ;;  %v872_v27 = vadd.f32 %v871_v26, %v3614_v50  ;;  %v1704_v28 = vpop.f32.mrb[60].mxu1  ;;  %v873_v29 = vpop.f32.mrb[61].mxu0  ;;  %2906 = vmatmul.mubr.msk.f32.gmra.mrb[166].mxu0 %vm227_vm1, %v124_v24 }
 0x189   :  { %v1705_v30 = vadd.f32 %v1704_v28, %v3618_v51  ;;  %v874_v31 = vadd.f32 %v873_v29, %v3620_v52  ;;  %v1706_v32 = vpop.f32.mrb[61].mxu1  ;;  %3036 = vmatmul.mubr.msk.f32.gmra.mrb[166].mxu1 %vm227_vm1, %v124_v24  ;;  %1193 = vmatprep.mubr.f32.mxu0 %v3195_v0  ;;  %v131_v28 = vld [vmem:[%s4675_s0 + $0x2d0] sm:$0xff] }
 0x18a   :  { %2411 = vst [vmem:[#allocation7 + $0x3c0] sm:$0xff] %v872_v27  ;;  %v1707_v34 = vadd.f32 %v1706_v32, %v3626_v54  ;;  %2026 = vmatprep.mubr.f32.mxu1 %v3195_v0 }
 0x18b   :  { %2413 = vst [vmem:[#allocation7 + $0x3d0] sm:$0xff] %v1705_v30  ;;  %2412 = vst [vmem:[#allocation7 + $0x3c8] sm:$0xff] %v874_v31  ;;  %v877_v35 = vpop.f32.mrb[62].mxu0 }
 0x18c   :  { %2414 = vst [vmem:[#allocation7 + $0x3d8] sm:$0xff] %v1707_v34  ;;  %v878_v36 = vadd.f32 %v877_v35, %v3614_v50  ;;  %v1710_v37 = vpop.f32.mrb[62].mxu1  ;;  %v879_v38 = vpop.f32.mrb[63].mxu0  ;;  %2907 = vmatmul.mubr.msk.f32.gmra.mrb[168].mxu0 %vm227_vm1, %v125_v33 }
 0x18d   :  { %v1711_v39 = vadd.f32 %v1710_v37, %v3618_v51  ;;  %v880_v40 = vadd.f32 %v879_v38, %v3620_v52  ;;  %v1712_v41 = vpop.f32.mrb[63].mxu1  ;;  %3037 = vmatmul.mubr.msk.f32.gmra.mrb[168].mxu1 %vm227_vm1, %v125_v33  ;;  %1199 = vmatprep.mubr.f32.mxu0 %v3195_v0  ;;  %v132_v37 = vld [vmem:[%s4675_s0 + $0x2d8] sm:$0xff] }
 0x18e   :  { %2415 = vst [vmem:[#allocation7 + $0x3e0] sm:$0xff] %v878_v36  ;;  %v1713_v43 = vadd.f32 %v1712_v41, %v3626_v54  ;;  %2032 = vmatprep.mubr.f32.mxu1 %v3195_v0 }
 0x18f   :  { %2417 = vst [vmem:[#allocation7 + $0x3f0] sm:$0xff] %v1711_v39  ;;  %2416 = vst [vmem:[#allocation7 + $0x3e8] sm:$0xff] %v880_v40  ;;  %v883_v44 = vpop.f32.mrb[64].mxu0 }
 0x190   :  { %2418 = vst [vmem:[#allocation7 + $0x3f8] sm:$0xff] %v1713_v43  ;;  %v884_v45 = vadd.f32 %v883_v44, %v3614_v50  ;;  %v1716_v46 = vpop.f32.mrb[64].mxu1  ;;  %v885_v47 = vpop.f32.mrb[65].mxu0  ;;  %2908 = vmatmul.mubr.msk.f32.gmra.mrb[170].mxu0 %vm227_vm1, %v126_v42 }
 0x191   :  { %v1717_v48 = vadd.f32 %v1716_v46, %v3618_v51  ;;  %v886_v49 = vadd.f32 %v885_v47, %v3620_v52  ;;  %v1718_v53 = vpop.f32.mrb[65].mxu1  ;;  %3038 = vmatmul.mubr.msk.f32.gmra.mrb[170].mxu1 %vm227_vm1, %v126_v42  ;;  %1205 = vmatprep.mubr.f32.mxu0 %v3195_v0  ;;  %v133_v46 = vld [vmem:[%s4675_s0 + $0x2e0] sm:$0xff] }
 0x192   :  { %2419 = vst [vmem:[#allocation7 + $0x400] sm:$0xff] %v884_v45  ;;  %v1719_v56 = vadd.f32 %v1718_v53, %v3626_v54  ;;  %2038 = vmatprep.mubr.f32.mxu1 %v3195_v0 }
 0x193   :  { %2421 = vst [vmem:[#allocation7 + $0x410] sm:$0xff] %v1717_v48  ;;  %2420 = vst [vmem:[#allocation7 + $0x408] sm:$0xff] %v886_v49  ;;  %v889_v57 = vpop.f32.mrb[66].mxu0 }
 0x194   :  { %2422 = vst [vmem:[#allocation7 + $0x418] sm:$0xff] %v1719_v56  ;;  %v890_v58 = vadd.f32 %v889_v57, %v3614_v50  ;;  %v1722_v59 = vpop.f32.mrb[66].mxu1  ;;  %v891_v60 = vpop.f32.mrb[67].mxu0  ;;  %2909 = vmatmul.mubr.msk.f32.gmra.mrb[172].mxu0 %vm227_vm1, %v127_v55 }
 0x195   :  { %v1723_v61 = vadd.f32 %v1722_v59, %v3618_v51  ;;  %v892_v62 = vadd.f32 %v891_v60, %v3620_v52  ;;  %v1724_v63 = vpop.f32.mrb[67].mxu1  ;;  %3039 = vmatmul.mubr.msk.f32.gmra.mrb[172].mxu1 %vm227_vm1, %v127_v55  ;;  %1211 = vmatprep.mubr.f32.mxu0 %v3195_v0  ;;  %v134_v59 = vld [vmem:[%s4675_s0 + $0x2e8] sm:$0xff] }
 0x196   :  { %2423 = vst [vmem:[#allocation7 + $0x420] sm:$0xff] %v890_v58  ;;  %v1725_v2 = vadd.f32 %v1724_v63, %v3626_v54  ;;  %2044 = vmatprep.mubr.f32.mxu1 %v3195_v0 }
 0x197   :  { %2425 = vst [vmem:[#allocation7 + $0x430] sm:$0xff] %v1723_v61  ;;  %2424 = vst [vmem:[#allocation7 + $0x428] sm:$0xff] %v892_v62  ;;  %v895_v3 = vpop.f32.mrb[68].mxu0 }
 0x198   :  { %2426 = vst [vmem:[#allocation7 + $0x438] sm:$0xff] %v1725_v2  ;;  %v896_v4 = vadd.f32 %v895_v3, %v3614_v50  ;;  %v1728_v5 = vpop.f32.mrb[68].mxu1  ;;  %v897_v6 = vpop.f32.mrb[69].mxu0  ;;  %2910 = vmatmul.mubr.msk.f32.gmra.mrb[174].mxu0 %vm227_vm1, %v128_v1 }
 0x199   :  { %v1729_v7 = vadd.f32 %v1728_v5, %v3618_v51  ;;  %v898_v8 = vadd.f32 %v897_v6, %v3620_v52  ;;  %v1730_v9 = vpop.f32.mrb[69].mxu1  ;;  %3040 = vmatmul.mubr.msk.f32.gmra.mrb[174].mxu1 %vm227_vm1, %v128_v1  ;;  %1217 = vmatprep.mubr.f32.mxu0 %v3195_v0  ;;  %v135_v5 = vld [vmem:[%s4675_s0 + $0x2f0] sm:$0xff] }
 0x19a   :  { %2427 = vst [vmem:[#allocation7 + $0x440] sm:$0xff] %v896_v4  ;;  %v1731_v11 = vadd.f32 %v1730_v9, %v3626_v54  ;;  %2050 = vmatprep.mubr.f32.mxu1 %v3195_v0 }
 0x19b   :  { %2429 = vst [vmem:[#allocation7 + $0x450] sm:$0xff] %v1729_v7  ;;  %2428 = vst [vmem:[#allocation7 + $0x448] sm:$0xff] %v898_v8  ;;  %v901_v12 = vpop.f32.mrb[70].mxu0 }
 0x19c   :  { %2430 = vst [vmem:[#allocation7 + $0x458] sm:$0xff] %v1731_v11  ;;  %v902_v13 = vadd.f32 %v901_v12, %v3614_v50  ;;  %v1734_v14 = vpop.f32.mrb[70].mxu1  ;;  %v903_v15 = vpop.f32.mrb[71].mxu0  ;;  %2911 = vmatmul.mubr.msk.f32.gmra.mrb[176].mxu0 %vm227_vm1, %v129_v10 }
 0x19d   :  { %v1735_v16 = vadd.f32 %v1734_v14, %v3618_v51  ;;  %v904_v17 = vadd.f32 %v903_v15, %v3620_v52  ;;  %v1736_v18 = vpop.f32.mrb[71].mxu1  ;;  %3041 = vmatmul.mubr.msk.f32.gmra.mrb[176].mxu1 %vm227_vm1, %v129_v10  ;;  %1223 = vmatprep.mubr.f32.mxu0 %v3195_v0  ;;  %v136_v14 = vld [vmem:[%s4675_s0 + $0x2f8] sm:$0xff] }
 0x19e   :  { %2431 = vst [vmem:[#allocation7 + $0x460] sm:$0xff] %v902_v13  ;;  %v1737_v20 = vadd.f32 %v1736_v18, %v3626_v54  ;;  %2056 = vmatprep.mubr.f32.mxu1 %v3195_v0 }
 0x19f   :  { %2433 = vst [vmem:[#allocation7 + $0x470] sm:$0xff] %v1735_v16  ;;  %2432 = vst [vmem:[#allocation7 + $0x468] sm:$0xff] %v904_v17  ;;  %v907_v21 = vpop.f32.mrb[72].mxu0 }
 0x1a0   :  { %2434 = vst [vmem:[#allocation7 + $0x478] sm:$0xff] %v1737_v20  ;;  %v908_v22 = vadd.f32 %v907_v21, %v3614_v50  ;;  %v1740_v23 = vpop.f32.mrb[72].mxu1  ;;  %v909_v24 = vpop.f32.mrb[73].mxu0  ;;  %2912 = vmatmul.mubr.msk.f32.gmra.mrb[178].mxu0 %vm227_vm1, %v130_v19 }
 0x1a1   :  { %v1741_v25 = vadd.f32 %v1740_v23, %v3618_v51  ;;  %v910_v26 = vadd.f32 %v909_v24, %v3620_v52  ;;  %v1742_v27 = vpop.f32.mrb[73].mxu1  ;;  %3042 = vmatmul.mubr.msk.f32.gmra.mrb[178].mxu1 %vm227_vm1, %v130_v19  ;;  %1229 = vmatprep.mubr.f32.mxu0 %v3195_v0  ;;  %v137_v23 = vld [vmem:[%s4675_s0 + $0x300] sm:$0xff] }
 0x1a2   :  { %2435 = vst [vmem:[#allocation7 + $0x480] sm:$0xff] %v908_v22  ;;  %v1743_v29 = vadd.f32 %v1742_v27, %v3626_v54  ;;  %2062 = vmatprep.mubr.f32.mxu1 %v3195_v0 }
 0x1a3   :  { %2437 = vst [vmem:[#allocation7 + $0x490] sm:$0xff] %v1741_v25  ;;  %2436 = vst [vmem:[#allocation7 + $0x488] sm:$0xff] %v910_v26  ;;  %v913_v30 = vpop.f32.mrb[74].mxu0 }
 0x1a4   :  { %2438 = vst [vmem:[#allocation7 + $0x498] sm:$0xff] %v1743_v29  ;;  %v914_v31 = vadd.f32 %v913_v30, %v3614_v50  ;;  %v1746_v32 = vpop.f32.mrb[74].mxu1  ;;  %v915_v33 = vpop.f32.mrb[75].mxu0  ;;  %2913 = vmatmul.mubr.msk.f32.gmra.mrb[180].mxu0 %vm227_vm1, %v131_v28 }
 0x1a5   :  { %v1747_v34 = vadd.f32 %v1746_v32, %v3618_v51  ;;  %v916_v35 = vadd.f32 %v915_v33, %v3620_v52  ;;  %v1748_v36 = vpop.f32.mrb[75].mxu1  ;;  %3043 = vmatmul.mubr.msk.f32.gmra.mrb[180].mxu1 %vm227_vm1, %v131_v28  ;;  %1235 = vmatprep.mubr.f32.mxu0 %v3195_v0  ;;  %v138_v32 = vld [vmem:[%s4675_s0 + $0x308] sm:$0xff] }
 0x1a6   :  { %2439 = vst [vmem:[#allocation7 + $0x4a0] sm:$0xff] %v914_v31  ;;  %v1749_v38 = vadd.f32 %v1748_v36, %v3626_v54  ;;  %2068 = vmatprep.mubr.f32.mxu1 %v3195_v0 }
 0x1a7   :  { %2441 = vst [vmem:[#allocation7 + $0x4b0] sm:$0xff] %v1747_v34  ;;  %2440 = vst [vmem:[#allocation7 + $0x4a8] sm:$0xff] %v916_v35  ;;  %v919_v39 = vpop.f32.mrb[76].mxu0 }
 0x1a8   :  { %2442 = vst [vmem:[#allocation7 + $0x4b8] sm:$0xff] %v1749_v38  ;;  %v920_v40 = vadd.f32 %v919_v39, %v3614_v50  ;;  %v1752_v41 = vpop.f32.mrb[76].mxu1  ;;  %v921_v42 = vpop.f32.mrb[77].mxu0  ;;  %2914 = vmatmul.mubr.msk.f32.gmra.mrb[182].mxu0 %vm227_vm1, %v132_v37 }
 0x1a9   :  { %v1753_v43 = vadd.f32 %v1752_v41, %v3618_v51  ;;  %v922_v44 = vadd.f32 %v921_v42, %v3620_v52  ;;  %v1754_v45 = vpop.f32.mrb[77].mxu1  ;;  %3044 = vmatmul.mubr.msk.f32.gmra.mrb[182].mxu1 %vm227_vm1, %v132_v37  ;;  %1241 = vmatprep.mubr.f32.mxu0 %v3195_v0  ;;  %v139_v41 = vld [vmem:[%s4675_s0 + $0x310] sm:$0xff] }
 0x1aa   :  { %2443 = vst [vmem:[#allocation7 + $0x4c0] sm:$0xff] %v920_v40  ;;  %v1755_v47 = vadd.f32 %v1754_v45, %v3626_v54  ;;  %2074 = vmatprep.mubr.f32.mxu1 %v3195_v0 }
 0x1ab   :  { %2445 = vst [vmem:[#allocation7 + $0x4d0] sm:$0xff] %v1753_v43  ;;  %2444 = vst [vmem:[#allocation7 + $0x4c8] sm:$0xff] %v922_v44  ;;  %v925_v48 = vpop.f32.mrb[78].mxu0 }
 0x1ac   :  { %2446 = vst [vmem:[#allocation7 + $0x4d8] sm:$0xff] %v1755_v47  ;;  %v926_v49 = vadd.f32 %v925_v48, %v3614_v50  ;;  %v1758_v53 = vpop.f32.mrb[78].mxu1  ;;  %v927_v55 = vpop.f32.mrb[79].mxu0  ;;  %2915 = vmatmul.mubr.msk.f32.gmra.mrb[184].mxu0 %vm227_vm1, %v133_v46 }
 0x1ad   :  { %v1759_v56 = vadd.f32 %v1758_v53, %v3618_v51  ;;  %v928_v57 = vadd.f32 %v927_v55, %v3620_v52  ;;  %v1760_v58 = vpop.f32.mrb[79].mxu1  ;;  %3045 = vmatmul.mubr.msk.f32.gmra.mrb[184].mxu1 %vm227_vm1, %v133_v46  ;;  %1247 = vmatprep.mubr.f32.mxu0 %v3195_v0  ;;  %v140_v53 = vld [vmem:[%s4675_s0 + $0x318] sm:$0xff] }
 0x1ae   :  { %2447 = vst [vmem:[#allocation7 + $0x4e0] sm:$0xff] %v926_v49  ;;  %v1761_v60 = vadd.f32 %v1760_v58, %v3626_v54  ;;  %2080 = vmatprep.mubr.f32.mxu1 %v3195_v0 }
 0x1af   :  { %2449 = vst [vmem:[#allocation7 + $0x4f0] sm:$0xff] %v1759_v56  ;;  %2448 = vst [vmem:[#allocation7 + $0x4e8] sm:$0xff] %v928_v57  ;;  %v931_v61 = vpop.f32.mrb[80].mxu0 }
 0x1b0   :  { %2450 = vst [vmem:[#allocation7 + $0x4f8] sm:$0xff] %v1761_v60  ;;  %v932_v62 = vadd.f32 %v931_v61, %v3614_v50  ;;  %v1764_v63 = vpop.f32.mrb[80].mxu1  ;;  %v933_v1 = vpop.f32.mrb[81].mxu0  ;;  %2916 = vmatmul.mubr.msk.f32.gmra.mrb[186].mxu0 %vm227_vm1, %v134_v59 }
 0x1b1   :  { %v1765_v2 = vadd.f32 %v1764_v63, %v3618_v51  ;;  %v934_v3 = vadd.f32 %v933_v1, %v3620_v52  ;;  %v1766_v4 = vpop.f32.mrb[81].mxu1  ;;  %3046 = vmatmul.mubr.msk.f32.gmra.mrb[186].mxu1 %vm227_vm1, %v134_v59  ;;  %1253 = vmatprep.mubr.f32.mxu0 %v3195_v0  ;;  %v141_v63 = vld [vmem:[%s4675_s0 + $0x320] sm:$0xff] }
 0x1b2   :  { %2451 = vst [vmem:[#allocation7 + $0x500] sm:$0xff] %v932_v62  ;;  %v1767_v6 = vadd.f32 %v1766_v4, %v3626_v54  ;;  %2086 = vmatprep.mubr.f32.mxu1 %v3195_v0 }
 0x1b3   :  { %2453 = vst [vmem:[#allocation7 + $0x510] sm:$0xff] %v1765_v2  ;;  %2452 = vst [vmem:[#allocation7 + $0x508] sm:$0xff] %v934_v3  ;;  %v937_v7 = vpop.f32.mrb[82].mxu0 }
 0x1b4   :  { %2454 = vst [vmem:[#allocation7 + $0x518] sm:$0xff] %v1767_v6  ;;  %v938_v8 = vadd.f32 %v937_v7, %v3614_v50  ;;  %v1770_v9 = vpop.f32.mrb[82].mxu1  ;;  %v939_v10 = vpop.f32.mrb[83].mxu0  ;;  %2917 = vmatmul.mubr.msk.f32.gmra.mrb[188].mxu0 %vm227_vm1, %v135_v5 }
 0x1b5   :  { %v1771_v11 = vadd.f32 %v1770_v9, %v3618_v51  ;;  %v940_v12 = vadd.f32 %v939_v10, %v3620_v52  ;;  %v1772_v13 = vpop.f32.mrb[83].mxu1  ;;  %3047 = vmatmul.mubr.msk.f32.gmra.mrb[188].mxu1 %vm227_vm1, %v135_v5  ;;  %1259 = vmatprep.mubr.f32.mxu0 %v3195_v0  ;;  %v142_v9 = vld [vmem:[%s4675_s0 + $0x328] sm:$0xff] }
 0x1b6   :  { %2455 = vst [vmem:[#allocation7 + $0x520] sm:$0xff] %v938_v8  ;;  %v1773_v15 = vadd.f32 %v1772_v13, %v3626_v54  ;;  %2092 = vmatprep.mubr.f32.mxu1 %v3195_v0 }
 0x1b7   :  { %2457 = vst [vmem:[#allocation7 + $0x530] sm:$0xff] %v1771_v11  ;;  %2456 = vst [vmem:[#allocation7 + $0x528] sm:$0xff] %v940_v12  ;;  %v943_v16 = vpop.f32.mrb[84].mxu0 }
 0x1b8   :  { %2458 = vst [vmem:[#allocation7 + $0x538] sm:$0xff] %v1773_v15  ;;  %v944_v17 = vadd.f32 %v943_v16, %v3614_v50  ;;  %v1776_v18 = vpop.f32.mrb[84].mxu1  ;;  %v945_v19 = vpop.f32.mrb[85].mxu0  ;;  %2918 = vmatmul.mubr.msk.f32.gmra.mrb[190].mxu0 %vm227_vm1, %v136_v14 }
 0x1b9   :  { %v1777_v20 = vadd.f32 %v1776_v18, %v3618_v51  ;;  %v946_v21 = vadd.f32 %v945_v19, %v3620_v52  ;;  %v1778_v22 = vpop.f32.mrb[85].mxu1  ;;  %3048 = vmatmul.mubr.msk.f32.gmra.mrb[190].mxu1 %vm227_vm1, %v136_v14  ;;  %1265 = vmatprep.mubr.f32.mxu0 %v3195_v0  ;;  %v143_v18 = vld [vmem:[%s4675_s0 + $0x330] sm:$0xff] }
 0x1ba   :  { %2459 = vst [vmem:[#allocation7 + $0x540] sm:$0xff] %v944_v17  ;;  %v1779_v24 = vadd.f32 %v1778_v22, %v3626_v54  ;;  %2098 = vmatprep.mubr.f32.mxu1 %v3195_v0 }
 0x1bb   :  { %2461 = vst [vmem:[#allocation7 + $0x550] sm:$0xff] %v1777_v20  ;;  %2460 = vst [vmem:[#allocation7 + $0x548] sm:$0xff] %v946_v21  ;;  %v949_v25 = vpop.f32.mrb[86].mxu0 }
 0x1bc   :  { %2462 = vst [vmem:[#allocation7 + $0x558] sm:$0xff] %v1779_v24  ;;  %v950_v26 = vadd.f32 %v949_v25, %v3614_v50  ;;  %v1782_v27 = vpop.f32.mrb[86].mxu1  ;;  %v951_v28 = vpop.f32.mrb[87].mxu0  ;;  %2919 = vmatmul.mubr.msk.f32.gmra.mrb[192].mxu0 %vm227_vm1, %v137_v23 }
 0x1bd   :  { %v1783_v29 = vadd.f32 %v1782_v27, %v3618_v51  ;;  %v952_v30 = vadd.f32 %v951_v28, %v3620_v52  ;;  %v1784_v31 = vpop.f32.mrb[87].mxu1  ;;  %3049 = vmatmul.mubr.msk.f32.gmra.mrb[192].mxu1 %vm227_vm1, %v137_v23  ;;  %1271 = vmatprep.mubr.f32.mxu0 %v3195_v0  ;;  %v144_v27 = vld [vmem:[%s4675_s0 + $0x338] sm:$0xff] }
 0x1be   :  { %2463 = vst [vmem:[#allocation7 + $0x560] sm:$0xff] %v950_v26  ;;  %v1785_v33 = vadd.f32 %v1784_v31, %v3626_v54  ;;  %2104 = vmatprep.mubr.f32.mxu1 %v3195_v0 }
 0x1bf   :  { %2465 = vst [vmem:[#allocation7 + $0x570] sm:$0xff] %v1783_v29  ;;  %2464 = vst [vmem:[#allocation7 + $0x568] sm:$0xff] %v952_v30  ;;  %v955_v34 = vpop.f32.mrb[88].mxu0 }
 0x1c0   :  { %2466 = vst [vmem:[#allocation7 + $0x578] sm:$0xff] %v1785_v33  ;;  %v956_v35 = vadd.f32 %v955_v34, %v3614_v50  ;;  %v1788_v36 = vpop.f32.mrb[88].mxu1  ;;  %v957_v37 = vpop.f32.mrb[89].mxu0  ;;  %2920 = vmatmul.mubr.msk.f32.gmra.mrb[194].mxu0 %vm227_vm1, %v138_v32 }
 0x1c1   :  { %v1789_v38 = vadd.f32 %v1788_v36, %v3618_v51  ;;  %v958_v39 = vadd.f32 %v957_v37, %v3620_v52  ;;  %v1790_v40 = vpop.f32.mrb[89].mxu1  ;;  %3050 = vmatmul.mubr.msk.f32.gmra.mrb[194].mxu1 %vm227_vm1, %v138_v32  ;;  %1277 = vmatprep.mubr.f32.mxu0 %v3195_v0  ;;  %v145_v36 = vld [vmem:[%s4675_s0 + $0x340] sm:$0xff] }
 0x1c2   :  { %2467 = vst [vmem:[#allocation7 + $0x580] sm:$0xff] %v956_v35  ;;  %v1791_v42 = vadd.f32 %v1790_v40, %v3626_v54  ;;  %2110 = vmatprep.mubr.f32.mxu1 %v3195_v0 }
 0x1c3   :  { %2469 = vst [vmem:[#allocation7 + $0x590] sm:$0xff] %v1789_v38  ;;  %2468 = vst [vmem:[#allocation7 + $0x588] sm:$0xff] %v958_v39  ;;  %v961_v43 = vpop.f32.mrb[90].mxu0 }
 0x1c4   :  { %2470 = vst [vmem:[#allocation7 + $0x598] sm:$0xff] %v1791_v42  ;;  %v962_v44 = vadd.f32 %v961_v43, %v3614_v50  ;;  %v1794_v45 = vpop.f32.mrb[90].mxu1  ;;  %v963_v46 = vpop.f32.mrb[91].mxu0  ;;  %2921 = vmatmul.mubr.msk.f32.gmra.mrb[196].mxu0 %vm227_vm1, %v139_v41 }
 0x1c5   :  { %v1795_v47 = vadd.f32 %v1794_v45, %v3618_v51  ;;  %v964_v48 = vadd.f32 %v963_v46, %v3620_v52  ;;  %v1796_v49 = vpop.f32.mrb[91].mxu1  ;;  %3051 = vmatmul.mubr.msk.f32.gmra.mrb[196].mxu1 %vm227_vm1, %v139_v41  ;;  %1283 = vmatprep.mubr.f32.mxu0 %v3195_v0  ;;  %v146_v45 = vld [vmem:[%s4675_s0 + $0x348] sm:$0xff] }
 0x1c6   :  { %2471 = vst [vmem:[#allocation7 + $0x5a0] sm:$0xff] %v962_v44  ;;  %v1797_v55 = vadd.f32 %v1796_v49, %v3626_v54  ;;  %2116 = vmatprep.mubr.f32.mxu1 %v3195_v0 }
 0x1c7   :  { %2473 = vst [vmem:[#allocation7 + $0x5b0] sm:$0xff] %v1795_v47  ;;  %2472 = vst [vmem:[#allocation7 + $0x5a8] sm:$0xff] %v964_v48  ;;  %v967_v56 = vpop.f32.mrb[92].mxu0 }
 0x1c8   :  { %2474 = vst [vmem:[#allocation7 + $0x5b8] sm:$0xff] %v1797_v55  ;;  %v968_v57 = vadd.f32 %v967_v56, %v3614_v50  ;;  %v1800_v58 = vpop.f32.mrb[92].mxu1  ;;  %v969_v59 = vpop.f32.mrb[93].mxu0  ;;  %2922 = vmatmul.mubr.msk.f32.gmra.mrb[198].mxu0 %vm227_vm1, %v140_v53 }
 0x1c9   :  { %v1801_v60 = vadd.f32 %v1800_v58, %v3618_v51  ;;  %v970_v61 = vadd.f32 %v969_v59, %v3620_v52  ;;  %v1802_v62 = vpop.f32.mrb[93].mxu1  ;;  %3052 = vmatmul.mubr.msk.f32.gmra.mrb[198].mxu1 %vm227_vm1, %v140_v53  ;;  %1289 = vmatprep.mubr.f32.mxu0 %v3195_v0  ;;  %v147_v58 = vld [vmem:[%s4675_s0 + $0x350] sm:$0xff] }
 0x1ca   :  { %2475 = vst [vmem:[#allocation7 + $0x5c0] sm:$0xff] %v968_v57  ;;  %v1803_v1 = vadd.f32 %v1802_v62, %v3626_v54  ;;  %2122 = vmatprep.mubr.f32.mxu1 %v3195_v0 }
 0x1cb   :  { %2477 = vst [vmem:[#allocation7 + $0x5d0] sm:$0xff] %v1801_v60  ;;  %2476 = vst [vmem:[#allocation7 + $0x5c8] sm:$0xff] %v970_v61  ;;  %v973_v2 = vpop.f32.mrb[94].mxu0 }
 0x1cc   :  { %2478 = vst [vmem:[#allocation7 + $0x5d8] sm:$0xff] %v1803_v1  ;;  %v974_v3 = vadd.f32 %v973_v2, %v3614_v50  ;;  %v1806_v4 = vpop.f32.mrb[94].mxu1  ;;  %v975_v5 = vpop.f32.mrb[95].mxu0  ;;  %2923 = vmatmul.mubr.msk.f32.gmra.mrb[200].mxu0 %vm227_vm1, %v141_v63 }
 0x1cd   :  { %v1807_v6 = vadd.f32 %v1806_v4, %v3618_v51  ;;  %v976_v7 = vadd.f32 %v975_v5, %v3620_v52  ;;  %v1808_v8 = vpop.f32.mrb[95].mxu1  ;;  %3053 = vmatmul.mubr.msk.f32.gmra.mrb[200].mxu1 %vm227_vm1, %v141_v63  ;;  %1295 = vmatprep.mubr.f32.mxu0 %v3195_v0  ;;  %v148_v4 = vld [vmem:[%s4675_s0 + $0x358] sm:$0xff] }
 0x1ce   :  { %2479 = vst [vmem:[#allocation7 + $0x5e0] sm:$0xff] %v974_v3  ;;  %v1809_v10 = vadd.f32 %v1808_v8, %v3626_v54  ;;  %2128 = vmatprep.mubr.f32.mxu1 %v3195_v0 }
 0x1cf   :  { %2481 = vst [vmem:[#allocation7 + $0x5f0] sm:$0xff] %v1807_v6  ;;  %2480 = vst [vmem:[#allocation7 + $0x5e8] sm:$0xff] %v976_v7  ;;  %v979_v11 = vpop.f32.mrb[96].mxu0 }
 0x1d0   :  { %2482 = vst [vmem:[#allocation7 + $0x5f8] sm:$0xff] %v1809_v10  ;;  %v980_v12 = vadd.f32 %v979_v11, %v3614_v50  ;;  %v1812_v13 = vpop.f32.mrb[96].mxu1  ;;  %v981_v14 = vpop.f32.mrb[97].mxu0  ;;  %2924 = vmatmul.mubr.msk.f32.gmra.mrb[202].mxu0 %vm227_vm1, %v142_v9 }
 0x1d1   :  { %v1813_v15 = vadd.f32 %v1812_v13, %v3618_v51  ;;  %v982_v16 = vadd.f32 %v981_v14, %v3620_v52  ;;  %v1814_v17 = vpop.f32.mrb[97].mxu1  ;;  %3054 = vmatmul.mubr.msk.f32.gmra.mrb[202].mxu1 %vm227_vm1, %v142_v9  ;;  %1301 = vmatprep.mubr.f32.mxu0 %v3195_v0  ;;  %v149_v13 = vld [vmem:[%s4675_s0 + $0x360] sm:$0xff] }
 0x1d2   :  { %2483 = vst [vmem:[#allocation7 + $0x600] sm:$0xff] %v980_v12  ;;  %v1815_v19 = vadd.f32 %v1814_v17, %v3626_v54  ;;  %2134 = vmatprep.mubr.f32.mxu1 %v3195_v0 }
 0x1d3   :  { %2485 = vst [vmem:[#allocation7 + $0x610] sm:$0xff] %v1813_v15  ;;  %2484 = vst [vmem:[#allocation7 + $0x608] sm:$0xff] %v982_v16  ;;  %v985_v20 = vpop.f32.mrb[98].mxu0 }
 0x1d4   :  { %2486 = vst [vmem:[#allocation7 + $0x618] sm:$0xff] %v1815_v19  ;;  %v986_v21 = vadd.f32 %v985_v20, %v3614_v50  ;;  %v1818_v22 = vpop.f32.mrb[98].mxu1  ;;  %v987_v23 = vpop.f32.mrb[99].mxu0  ;;  %2925 = vmatmul.mubr.msk.f32.gmra.mrb[204].mxu0 %vm227_vm1, %v143_v18 }
 0x1d5   :  { %v1819_v24 = vadd.f32 %v1818_v22, %v3618_v51  ;;  %v988_v25 = vadd.f32 %v987_v23, %v3620_v52  ;;  %v1820_v26 = vpop.f32.mrb[99].mxu1  ;;  %3055 = vmatmul.mubr.msk.f32.gmra.mrb[204].mxu1 %vm227_vm1, %v143_v18  ;;  %1307 = vmatprep.mubr.f32.mxu0 %v3195_v0  ;;  %v150_v22 = vld [vmem:[%s4675_s0 + $0x368] sm:$0xff] }
 0x1d6   :  { %2487 = vst [vmem:[#allocation7 + $0x620] sm:$0xff] %v986_v21  ;;  %v1821_v28 = vadd.f32 %v1820_v26, %v3626_v54  ;;  %2140 = vmatprep.mubr.f32.mxu1 %v3195_v0 }
 0x1d7   :  { %2489 = vst [vmem:[#allocation7 + $0x630] sm:$0xff] %v1819_v24  ;;  %2488 = vst [vmem:[#allocation7 + $0x628] sm:$0xff] %v988_v25  ;;  %v991_v29 = vpop.f32.mrb[100].mxu0 }
 0x1d8   :  { %2490 = vst [vmem:[#allocation7 + $0x638] sm:$0xff] %v1821_v28  ;;  %v992_v30 = vadd.f32 %v991_v29, %v3614_v50  ;;  %v1824_v31 = vpop.f32.mrb[100].mxu1  ;;  %v993_v32 = vpop.f32.mrb[101].mxu0  ;;  %2926 = vmatmul.mubr.msk.f32.gmra.mrb[206].mxu0 %vm227_vm1, %v144_v27 }
 0x1d9   :  { %v1825_v33 = vadd.f32 %v1824_v31, %v3618_v51  ;;  %v994_v34 = vadd.f32 %v993_v32, %v3620_v52  ;;  %v1826_v35 = vpop.f32.mrb[101].mxu1  ;;  %3056 = vmatmul.mubr.msk.f32.gmra.mrb[206].mxu1 %vm227_vm1, %v144_v27  ;;  %1313 = vmatprep.mubr.f32.mxu0 %v3195_v0  ;;  %v151_v31 = vld [vmem:[%s4675_s0 + $0x370] sm:$0xff] }
 0x1da   :  { %2491 = vst [vmem:[#allocation7 + $0x640] sm:$0xff] %v992_v30  ;;  %v1827_v37 = vadd.f32 %v1826_v35, %v3626_v54  ;;  %2146 = vmatprep.mubr.f32.mxu1 %v3195_v0 }
 0x1db   :  { %2493 = vst [vmem:[#allocation7 + $0x650] sm:$0xff] %v1825_v33  ;;  %2492 = vst [vmem:[#allocation7 + $0x648] sm:$0xff] %v994_v34  ;;  %v997_v38 = vpop.f32.mrb[102].mxu0 }
 0x1dc   :  { %2494 = vst [vmem:[#allocation7 + $0x658] sm:$0xff] %v1827_v37  ;;  %v998_v39 = vadd.f32 %v997_v38, %v3614_v50  ;;  %v1830_v40 = vpop.f32.mrb[102].mxu1  ;;  %v999_v41 = vpop.f32.mrb[103].mxu0  ;;  %2927 = vmatmul.mubr.msk.f32.gmra.mrb[208].mxu0 %vm227_vm1, %v145_v36 }
 0x1dd   :  { %v1831_v42 = vadd.f32 %v1830_v40, %v3618_v51  ;;  %v1000_v43 = vadd.f32 %v999_v41, %v3620_v52  ;;  %v1832_v44 = vpop.f32.mrb[103].mxu1  ;;  %3057 = vmatmul.mubr.msk.f32.gmra.mrb[208].mxu1 %vm227_vm1, %v145_v36  ;;  %1319 = vmatprep.mubr.f32.mxu0 %v3195_v0  ;;  %v152_v40 = vld [vmem:[%s4675_s0 + $0x378] sm:$0xff] }
 0x1de   :  { %2495 = vst [vmem:[#allocation7 + $0x660] sm:$0xff] %v998_v39  ;;  %v1833_v46 = vadd.f32 %v1832_v44, %v3626_v54  ;;  %2152 = vmatprep.mubr.f32.mxu1 %v3195_v0 }
 0x1df   :  { %2497 = vst [vmem:[#allocation7 + $0x670] sm:$0xff] %v1831_v42  ;;  %2496 = vst [vmem:[#allocation7 + $0x668] sm:$0xff] %v1000_v43  ;;  %v1003_v47 = vpop.f32.mrb[104].mxu0 }
 0x1e0   :  { %2498 = vst [vmem:[#allocation7 + $0x678] sm:$0xff] %v1833_v46  ;;  %v1004_v48 = vadd.f32 %v1003_v47, %v3614_v50  ;;  %v1836_v49 = vpop.f32.mrb[104].mxu1  ;;  %v1005_v53 = vpop.f32.mrb[105].mxu0  ;;  %2928 = vmatmul.mubr.msk.f32.gmra.mrb[210].mxu0 %vm227_vm1, %v146_v45 }
 0x1e1   :  { %v1837_v55 = vadd.f32 %v1836_v49, %v3618_v51  ;;  %v1006_v56 = vadd.f32 %v1005_v53, %v3620_v52  ;;  %v1838_v57 = vpop.f32.mrb[105].mxu1  ;;  %3058 = vmatmul.mubr.msk.f32.gmra.mrb[210].mxu1 %vm227_vm1, %v146_v45  ;;  %1325 = vmatprep.mubr.f32.mxu0 %v3195_v0  ;;  %v153_v49 = vld [vmem:[%s4675_s0 + $0x380] sm:$0xff] }
 0x1e2   :  { %2499 = vst [vmem:[#allocation7 + $0x680] sm:$0xff] %v1004_v48  ;;  %v1839_v59 = vadd.f32 %v1838_v57, %v3626_v54  ;;  %2158 = vmatprep.mubr.f32.mxu1 %v3195_v0 }
 0x1e3   :  { %2501 = vst [vmem:[#allocation7 + $0x690] sm:$0xff] %v1837_v55  ;;  %2500 = vst [vmem:[#allocation7 + $0x688] sm:$0xff] %v1006_v56  ;;  %v1009_v60 = vpop.f32.mrb[106].mxu0 }
 0x1e4   :  { %2502 = vst [vmem:[#allocation7 + $0x698] sm:$0xff] %v1839_v59  ;;  %v1010_v61 = vadd.f32 %v1009_v60, %v3614_v50  ;;  %v1842_v62 = vpop.f32.mrb[106].mxu1  ;;  %v1011_v63 = vpop.f32.mrb[107].mxu0  ;;  %2929 = vmatmul.mubr.msk.f32.gmra.mrb[212].mxu0 %vm227_vm1, %v147_v58 }
 0x1e5   :  { %v1843_v1 = vadd.f32 %v1842_v62, %v3618_v51  ;;  %v1012_v2 = vadd.f32 %v1011_v63, %v3620_v52  ;;  %v1844_v3 = vpop.f32.mrb[107].mxu1  ;;  %3059 = vmatmul.mubr.msk.f32.gmra.mrb[212].mxu1 %vm227_vm1, %v147_v58  ;;  %1331 = vmatprep.mubr.f32.mxu0 %v3195_v0  ;;  %v154_v62 = vld [vmem:[%s4675_s0 + $0x388] sm:$0xff] }
 0x1e6   :  { %2503 = vst [vmem:[#allocation7 + $0x6a0] sm:$0xff] %v1010_v61  ;;  %v1845_v5 = vadd.f32 %v1844_v3, %v3626_v54  ;;  %2164 = vmatprep.mubr.f32.mxu1 %v3195_v0 }
 0x1e7   :  { %2505 = vst [vmem:[#allocation7 + $0x6b0] sm:$0xff] %v1843_v1  ;;  %2504 = vst [vmem:[#allocation7 + $0x6a8] sm:$0xff] %v1012_v2  ;;  %v1015_v6 = vpop.f32.mrb[108].mxu0 }
 0x1e8   :  { %2506 = vst [vmem:[#allocation7 + $0x6b8] sm:$0xff] %v1845_v5  ;;  %v1016_v7 = vadd.f32 %v1015_v6, %v3614_v50  ;;  %v1848_v8 = vpop.f32.mrb[108].mxu1  ;;  %v1017_v9 = vpop.f32.mrb[109].mxu0  ;;  %2930 = vmatmul.mubr.msk.f32.gmra.mrb[214].mxu0 %vm227_vm1, %v148_v4 }
 0x1e9   :  { %v1849_v10 = vadd.f32 %v1848_v8, %v3618_v51  ;;  %v1018_v11 = vadd.f32 %v1017_v9, %v3620_v52  ;;  %v1850_v12 = vpop.f32.mrb[109].mxu1  ;;  %3060 = vmatmul.mubr.msk.f32.gmra.mrb[214].mxu1 %vm227_vm1, %v148_v4  ;;  %1337 = vmatprep.mubr.f32.mxu0 %v3195_v0  ;;  %v155_v8 = vld [vmem:[%s4675_s0 + $0x390] sm:$0xff] }
 0x1ea   :  { %2507 = vst [vmem:[#allocation7 + $0x6c0] sm:$0xff] %v1016_v7  ;;  %v1851_v14 = vadd.f32 %v1850_v12, %v3626_v54  ;;  %2170 = vmatprep.mubr.f32.mxu1 %v3195_v0 }
 0x1eb   :  { %2509 = vst [vmem:[#allocation7 + $0x6d0] sm:$0xff] %v1849_v10  ;;  %2508 = vst [vmem:[#allocation7 + $0x6c8] sm:$0xff] %v1018_v11  ;;  %v1021_v15 = vpop.f32.mrb[110].mxu0 }
 0x1ec   :  { %2510 = vst [vmem:[#allocation7 + $0x6d8] sm:$0xff] %v1851_v14  ;;  %v1022_v16 = vadd.f32 %v1021_v15, %v3614_v50  ;;  %v1854_v17 = vpop.f32.mrb[110].mxu1  ;;  %v1023_v18 = vpop.f32.mrb[111].mxu0  ;;  %2931 = vmatmul.mubr.msk.f32.gmra.mrb[216].mxu0 %vm227_vm1, %v149_v13 }
 0x1ed   :  { %v1855_v19 = vadd.f32 %v1854_v17, %v3618_v51  ;;  %v1024_v20 = vadd.f32 %v1023_v18, %v3620_v52  ;;  %v1856_v21 = vpop.f32.mrb[111].mxu1  ;;  %3061 = vmatmul.mubr.msk.f32.gmra.mrb[216].mxu1 %vm227_vm1, %v149_v13  ;;  %1343 = vmatprep.mubr.f32.mxu0 %v3195_v0  ;;  %v156_v17 = vld [vmem:[%s4675_s0 + $0x398] sm:$0xff] }
 0x1ee   :  { %2511 = vst [vmem:[#allocation7 + $0x6e0] sm:$0xff] %v1022_v16  ;;  %v1857_v23 = vadd.f32 %v1856_v21, %v3626_v54  ;;  %2176 = vmatprep.mubr.f32.mxu1 %v3195_v0 }
 0x1ef   :  { %2513 = vst [vmem:[#allocation7 + $0x6f0] sm:$0xff] %v1855_v19  ;;  %2512 = vst [vmem:[#allocation7 + $0x6e8] sm:$0xff] %v1024_v20  ;;  %v1027_v24 = vpop.f32.mrb[112].mxu0 }
 0x1f0   :  { %2514 = vst [vmem:[#allocation7 + $0x6f8] sm:$0xff] %v1857_v23  ;;  %v1028_v25 = vadd.f32 %v1027_v24, %v3614_v50  ;;  %v1860_v26 = vpop.f32.mrb[112].mxu1  ;;  %v1029_v27 = vpop.f32.mrb[113].mxu0  ;;  %2932 = vmatmul.mubr.msk.f32.gmra.mrb[218].mxu0 %vm227_vm1, %v150_v22 }
 0x1f1   :  { %v1861_v28 = vadd.f32 %v1860_v26, %v3618_v51  ;;  %v1030_v29 = vadd.f32 %v1029_v27, %v3620_v52  ;;  %v1862_v30 = vpop.f32.mrb[113].mxu1  ;;  %3062 = vmatmul.mubr.msk.f32.gmra.mrb[218].mxu1 %vm227_vm1, %v150_v22  ;;  %1349 = vmatprep.mubr.f32.mxu0 %v3195_v0  ;;  %v157_v26 = vld [vmem:[%s4675_s0 + $0x3a0] sm:$0xff] }
 0x1f2   :  { %2515 = vst [vmem:[#allocation7 + $0x700] sm:$0xff] %v1028_v25  ;;  %v1863_v32 = vadd.f32 %v1862_v30, %v3626_v54  ;;  %2182 = vmatprep.mubr.f32.mxu1 %v3195_v0 }
 0x1f3   :  { %2517 = vst [vmem:[#allocation7 + $0x710] sm:$0xff] %v1861_v28  ;;  %2516 = vst [vmem:[#allocation7 + $0x708] sm:$0xff] %v1030_v29  ;;  %v1033_v33 = vpop.f32.mrb[114].mxu0 }
 0x1f4   :  { %2518 = vst [vmem:[#allocation7 + $0x718] sm:$0xff] %v1863_v32  ;;  %v1034_v34 = vadd.f32 %v1033_v33, %v3614_v50  ;;  %v1866_v35 = vpop.f32.mrb[114].mxu1  ;;  %v1035_v36 = vpop.f32.mrb[115].mxu0  ;;  %2933 = vmatmul.mubr.msk.f32.gmra.mrb[220].mxu0 %vm227_vm1, %v151_v31 }
 0x1f5   :  { %v1867_v37 = vadd.f32 %v1866_v35, %v3618_v51  ;;  %v1036_v38 = vadd.f32 %v1035_v36, %v3620_v52  ;;  %v1868_v39 = vpop.f32.mrb[115].mxu1  ;;  %3063 = vmatmul.mubr.msk.f32.gmra.mrb[220].mxu1 %vm227_vm1, %v151_v31  ;;  %1355 = vmatprep.mubr.f32.mxu0 %v3195_v0  ;;  %v158_v35 = vld [vmem:[%s4675_s0 + $0x3a8] sm:$0xff] }
 0x1f6   :  { %2519 = vst [vmem:[#allocation7 + $0x720] sm:$0xff] %v1034_v34  ;;  %v1869_v41 = vadd.f32 %v1868_v39, %v3626_v54  ;;  %2188 = vmatprep.mubr.f32.mxu1 %v3195_v0 }
 0x1f7   :  { %2521 = vst [vmem:[#allocation7 + $0x730] sm:$0xff] %v1867_v37  ;;  %2520 = vst [vmem:[#allocation7 + $0x728] sm:$0xff] %v1036_v38  ;;  %v1039_v42 = vpop.f32.mrb[116].mxu0 }
 0x1f8   :  { %2522 = vst [vmem:[#allocation7 + $0x738] sm:$0xff] %v1869_v41  ;;  %v1040_v43 = vadd.f32 %v1039_v42, %v3614_v50  ;;  %v1872_v44 = vpop.f32.mrb[116].mxu1  ;;  %v1041_v45 = vpop.f32.mrb[117].mxu0  ;;  %2934 = vmatmul.mubr.msk.f32.gmra.mrb[222].mxu0 %vm227_vm1, %v152_v40 }
 0x1f9   :  { %v1873_v46 = vadd.f32 %v1872_v44, %v3618_v51  ;;  %v1042_v47 = vadd.f32 %v1041_v45, %v3620_v52  ;;  %v1874_v48 = vpop.f32.mrb[117].mxu1  ;;  %3064 = vmatmul.mubr.msk.f32.gmra.mrb[222].mxu1 %vm227_vm1, %v152_v40  ;;  %1361 = vmatprep.mubr.f32.mxu0 %v3195_v0  ;;  %v159_v44 = vld [vmem:[%s4675_s0 + $0x3b0] sm:$0xff] }
 0x1fa   :  { %2523 = vst [vmem:[#allocation7 + $0x740] sm:$0xff] %v1040_v43  ;;  %v1875_v53 = vadd.f32 %v1874_v48, %v3626_v54  ;;  %2194 = vmatprep.mubr.f32.mxu1 %v3195_v0 }
 0x1fb   :  { %2525 = vst [vmem:[#allocation7 + $0x750] sm:$0xff] %v1873_v46  ;;  %2524 = vst [vmem:[#allocation7 + $0x748] sm:$0xff] %v1042_v47  ;;  %v1045_v55 = vpop.f32.mrb[118].mxu0 }
 0x1fc   :  { %2526 = vst [vmem:[#allocation7 + $0x758] sm:$0xff] %v1875_v53  ;;  %v1046_v56 = vadd.f32 %v1045_v55, %v3614_v50  ;;  %v1878_v57 = vpop.f32.mrb[118].mxu1  ;;  %v1047_v58 = vpop.f32.mrb[119].mxu0  ;;  %2935 = vmatmul.mubr.msk.f32.gmra.mrb[224].mxu0 %vm227_vm1, %v153_v49 }
 0x1fd   :  { %v1879_v59 = vadd.f32 %v1878_v57, %v3618_v51  ;;  %v1048_v60 = vadd.f32 %v1047_v58, %v3620_v52  ;;  %v1880_v61 = vpop.f32.mrb[119].mxu1  ;;  %3065 = vmatmul.mubr.msk.f32.gmra.mrb[224].mxu1 %vm227_vm1, %v153_v49  ;;  %1367 = vmatprep.mubr.f32.mxu0 %v3195_v0  ;;  %v160_v57 = vld [vmem:[%s4675_s0 + $0x3b8] sm:$0xff] }
 0x1fe   :  { %2527 = vst [vmem:[#allocation7 + $0x760] sm:$0xff] %v1046_v56  ;;  %v1881_v63 = vadd.f32 %v1880_v61, %v3626_v54  ;;  %2200 = vmatprep.mubr.f32.mxu1 %v3195_v0 }
 0x1ff   :  { %2529 = vst [vmem:[#allocation7 + $0x770] sm:$0xff] %v1879_v59  ;;  %2528 = vst [vmem:[#allocation7 + $0x768] sm:$0xff] %v1048_v60  ;;  %v1051_v1 = vpop.f32.mrb[120].mxu0 }
 0x200   :  { %2530 = vst [vmem:[#allocation7 + $0x778] sm:$0xff] %v1881_v63  ;;  %v1052_v2 = vadd.f32 %v1051_v1, %v3614_v50  ;;  %v1884_v3 = vpop.f32.mrb[120].mxu1  ;;  %v1053_v4 = vpop.f32.mrb[121].mxu0  ;;  %2936 = vmatmul.mubr.msk.f32.gmra.mrb[226].mxu0 %vm227_vm1, %v154_v62 }
 0x201   :  { %v1885_v5 = vadd.f32 %v1884_v3, %v3618_v51  ;;  %v1054_v6 = vadd.f32 %v1053_v4, %v3620_v52  ;;  %v1886_v7 = vpop.f32.mrb[121].mxu1  ;;  %3066 = vmatmul.mubr.msk.f32.gmra.mrb[226].mxu1 %vm227_vm1, %v154_v62  ;;  %1373 = vmatprep.mubr.f32.mxu0 %v3195_v0  ;;  %v161_v3 = vld [vmem:[%s4675_s0 + $0x3c0] sm:$0xff] }
 0x202   :  { %2531 = vst [vmem:[#allocation7 + $0x780] sm:$0xff] %v1052_v2  ;;  %v1887_v9 = vadd.f32 %v1886_v7, %v3626_v54  ;;  %2206 = vmatprep.mubr.f32.mxu1 %v3195_v0 }
 0x203   :  { %2533 = vst [vmem:[#allocation7 + $0x790] sm:$0xff] %v1885_v5  ;;  %2532 = vst [vmem:[#allocation7 + $0x788] sm:$0xff] %v1054_v6  ;;  %v1057_v10 = vpop.f32.mrb[122].mxu0 }
 0x204   :  { %2534 = vst [vmem:[#allocation7 + $0x798] sm:$0xff] %v1887_v9  ;;  %v1058_v11 = vadd.f32 %v1057_v10, %v3614_v50  ;;  %v1890_v12 = vpop.f32.mrb[122].mxu1  ;;  %v1059_v13 = vpop.f32.mrb[123].mxu0  ;;  %2937 = vmatmul.mubr.msk.f32.gmra.mrb[228].mxu0 %vm227_vm1, %v155_v8 }
 0x205   :  { %v1891_v14 = vadd.f32 %v1890_v12, %v3618_v51  ;;  %v1060_v15 = vadd.f32 %v1059_v13, %v3620_v52  ;;  %v1892_v16 = vpop.f32.mrb[123].mxu1  ;;  %3067 = vmatmul.mubr.msk.f32.gmra.mrb[228].mxu1 %vm227_vm1, %v155_v8  ;;  %1379 = vmatprep.mubr.f32.mxu0 %v3195_v0  ;;  %v162_v12 = vld [vmem:[%s4675_s0 + $0x3c8] sm:$0xff] }
 0x206   :  { %2535 = vst [vmem:[#allocation7 + $0x7a0] sm:$0xff] %v1058_v11  ;;  %v1893_v18 = vadd.f32 %v1892_v16, %v3626_v54  ;;  %2212 = vmatprep.mubr.f32.mxu1 %v3195_v0 }
 0x207   :  { %2537 = vst [vmem:[#allocation7 + $0x7b0] sm:$0xff] %v1891_v14  ;;  %2536 = vst [vmem:[#allocation7 + $0x7a8] sm:$0xff] %v1060_v15  ;;  %v1063_v19 = vpop.f32.mrb[124].mxu0 }
 0x208   :  { %2538 = vst [vmem:[#allocation7 + $0x7b8] sm:$0xff] %v1893_v18  ;;  %v1064_v20 = vadd.f32 %v1063_v19, %v3614_v50  ;;  %v1896_v21 = vpop.f32.mrb[124].mxu1  ;;  %v1065_v22 = vpop.f32.mrb[125].mxu0  ;;  %2938 = vmatmul.mubr.msk.f32.gmra.mrb[230].mxu0 %vm227_vm1, %v156_v17 }
 0x209   :  { %v1897_v23 = vadd.f32 %v1896_v21, %v3618_v51  ;;  %v1066_v24 = vadd.f32 %v1065_v22, %v3620_v52  ;;  %v1898_v25 = vpop.f32.mrb[125].mxu1  ;;  %3068 = vmatmul.mubr.msk.f32.gmra.mrb[230].mxu1 %vm227_vm1, %v156_v17  ;;  %1385 = vmatprep.mubr.f32.mxu0 %v3195_v0  ;;  %v163_v21 = vld [vmem:[%s4675_s0 + $0x3d0] sm:$0xff] }
 0x20a   :  { %2539 = vst [vmem:[#allocation7 + $0x7c0] sm:$0xff] %v1064_v20  ;;  %v1899_v27 = vadd.f32 %v1898_v25, %v3626_v54  ;;  %2218 = vmatprep.mubr.f32.mxu1 %v3195_v0 }
 0x20b   :  { %2541 = vst [vmem:[#allocation7 + $0x7d0] sm:$0xff] %v1897_v23  ;;  %2540 = vst [vmem:[#allocation7 + $0x7c8] sm:$0xff] %v1066_v24  ;;  %v1069_v28 = vpop.f32.mrb[126].mxu0 }
 0x20c   :  { %2542 = vst [vmem:[#allocation7 + $0x7d8] sm:$0xff] %v1899_v27  ;;  %v1070_v29 = vadd.f32 %v1069_v28, %v3614_v50  ;;  %v1902_v30 = vpop.f32.mrb[126].mxu1  ;;  %v1071_v31 = vpop.f32.mrb[127].mxu0  ;;  %2939 = vmatmul.mubr.msk.f32.gmra.mrb[232].mxu0 %vm227_vm1, %v157_v26 }
 0x20d   :  { %v1903_v32 = vadd.f32 %v1902_v30, %v3618_v51  ;;  %v1072_v33 = vadd.f32 %v1071_v31, %v3620_v52  ;;  %v1904_v34 = vpop.f32.mrb[127].mxu1  ;;  %3069 = vmatmul.mubr.msk.f32.gmra.mrb[232].mxu1 %vm227_vm1, %v157_v26  ;;  %1391 = vmatprep.mubr.f32.mxu0 %v3195_v0  ;;  %v164_v30 = vld [vmem:[%s4675_s0 + $0x3d8] sm:$0xff] }
 0x20e   :  { %2543 = vst [vmem:[#allocation7 + $0x7e0] sm:$0xff] %v1070_v29  ;;  %v1905_v36 = vadd.f32 %v1904_v34, %v3626_v54  ;;  %2224 = vmatprep.mubr.f32.mxu1 %v3195_v0 }
 0x20f   :  { %2545 = vst [vmem:[#allocation7 + $0x7f0] sm:$0xff] %v1903_v32  ;;  %2544 = vst [vmem:[#allocation7 + $0x7e8] sm:$0xff] %v1072_v33  ;;  %v1075_v37 = vpop.f32.mrb[128].mxu0 }
 0x210   :  { %2546 = vst [vmem:[#allocation7 + $0x7f8] sm:$0xff] %v1905_v36  ;;  %v1076_v38 = vadd.f32 %v1075_v37, %v3614_v50  ;;  %v1908_v39 = vpop.f32.mrb[128].mxu1  ;;  %v1077_v40 = vpop.f32.mrb[129].mxu0  ;;  %2940 = vmatmul.mubr.msk.f32.gmra.mrb[234].mxu0 %vm227_vm1, %v158_v35 }
 0x211   :  { %v1909_v41 = vadd.f32 %v1908_v39, %v3618_v51  ;;  %v1078_v42 = vadd.f32 %v1077_v40, %v3620_v52  ;;  %v1910_v43 = vpop.f32.mrb[129].mxu1  ;;  %3070 = vmatmul.mubr.msk.f32.gmra.mrb[234].mxu1 %vm227_vm1, %v158_v35  ;;  %1397 = vmatprep.mubr.f32.mxu0 %v3195_v0  ;;  %v165_v39 = vld [vmem:[%s4675_s0 + $0x3e0] sm:$0xff] }
 0x212   :  { %2547 = vst [vmem:[#allocation7 + $0x800] sm:$0xff] %v1076_v38  ;;  %v1911_v45 = vadd.f32 %v1910_v43, %v3626_v54  ;;  %2230 = vmatprep.mubr.f32.mxu1 %v3195_v0 }
 0x213   :  { %2549 = vst [vmem:[#allocation7 + $0x810] sm:$0xff] %v1909_v41  ;;  %2548 = vst [vmem:[#allocation7 + $0x808] sm:$0xff] %v1078_v42  ;;  %v1081_v46 = vpop.f32.mrb[130].mxu0 }
 0x214   :  { %2550 = vst [vmem:[#allocation7 + $0x818] sm:$0xff] %v1911_v45  ;;  %v1082_v47 = vadd.f32 %v1081_v46, %v3614_v50  ;;  %v1914_v48 = vpop.f32.mrb[130].mxu1  ;;  %v1083_v49 = vpop.f32.mrb[131].mxu0  ;;  %2941 = vmatmul.mubr.msk.f32.gmra.mrb[236].mxu0 %vm227_vm1, %v159_v44 }
 0x215   :  { %v1915_v53 = vadd.f32 %v1914_v48, %v3618_v51  ;;  %v1084_v55 = vadd.f32 %v1083_v49, %v3620_v52  ;;  %v1916_v56 = vpop.f32.mrb[131].mxu1  ;;  %3071 = vmatmul.mubr.msk.f32.gmra.mrb[236].mxu1 %vm227_vm1, %v159_v44  ;;  %1403 = vmatprep.mubr.f32.mxu0 %v3195_v0  ;;  %v166_v48 = vld [vmem:[%s4675_s0 + $0x3e8] sm:$0xff] }
 0x216   :  { %2551 = vst [vmem:[#allocation7 + $0x820] sm:$0xff] %v1082_v47  ;;  %v1917_v58 = vadd.f32 %v1916_v56, %v3626_v54  ;;  %2236 = vmatprep.mubr.f32.mxu1 %v3195_v0 }
 0x217   :  { %2553 = vst [vmem:[#allocation7 + $0x830] sm:$0xff] %v1915_v53  ;;  %2552 = vst [vmem:[#allocation7 + $0x828] sm:$0xff] %v1084_v55  ;;  %v1087_v59 = vpop.f32.mrb[132].mxu0 }
 0x218   :  { %2554 = vst [vmem:[#allocation7 + $0x838] sm:$0xff] %v1917_v58  ;;  %v1088_v60 = vadd.f32 %v1087_v59, %v3614_v50  ;;  %v1920_v61 = vpop.f32.mrb[132].mxu1  ;;  %v1089_v62 = vpop.f32.mrb[133].mxu0  ;;  %2942 = vmatmul.mubr.msk.f32.gmra.mrb[238].mxu0 %vm227_vm1, %v160_v57 }
 0x219   :  { %v1921_v63 = vadd.f32 %v1920_v61, %v3618_v51  ;;  %v1090_v1 = vadd.f32 %v1089_v62, %v3620_v52  ;;  %v1922_v2 = vpop.f32.mrb[133].mxu1  ;;  %3072 = vmatmul.mubr.msk.f32.gmra.mrb[238].mxu1 %vm227_vm1, %v160_v57  ;;  %1409 = vmatprep.mubr.f32.mxu0 %v3195_v0  ;;  %v167_v61 = vld [vmem:[%s4675_s0 + $0x3f0] sm:$0xff] }
 0x21a   :  { %2555 = vst [vmem:[#allocation7 + $0x840] sm:$0xff] %v1088_v60  ;;  %v1923_v4 = vadd.f32 %v1922_v2, %v3626_v54  ;;  %2242 = vmatprep.mubr.f32.mxu1 %v3195_v0 }
 0x21b   :  { %2557 = vst [vmem:[#allocation7 + $0x850] sm:$0xff] %v1921_v63  ;;  %2556 = vst [vmem:[#allocation7 + $0x848] sm:$0xff] %v1090_v1  ;;  %v1093_v5 = vpop.f32.mrb[134].mxu0 }
 0x21c   :  { %2558 = vst [vmem:[#allocation7 + $0x858] sm:$0xff] %v1923_v4  ;;  %v1094_v6 = vadd.f32 %v1093_v5, %v3614_v50  ;;  %v1926_v7 = vpop.f32.mrb[134].mxu1  ;;  %v1095_v8 = vpop.f32.mrb[135].mxu0  ;;  %2943 = vmatmul.mubr.msk.f32.gmra.mrb[240].mxu0 %vm227_vm1, %v161_v3 }
 0x21d   :  { %v1927_v9 = vadd.f32 %v1926_v7, %v3618_v51  ;;  %v1096_v10 = vadd.f32 %v1095_v8, %v3620_v52  ;;  %v1928_v11 = vpop.f32.mrb[135].mxu1  ;;  %3073 = vmatmul.mubr.msk.f32.gmra.mrb[240].mxu1 %vm227_vm1, %v161_v3  ;;  %1415 = vmatprep.mubr.f32.mxu0 %v3195_v0  ;;  %v168_v7 = vld [vmem:[%s4675_s0 + $0x3f8] sm:$0xff]  ;;  %s3196_s0 = smov [#allocation7]  }
 0x21e   :  { %2559 = vst [vmem:[#allocation7 + $0x860] sm:$0xff] %v1094_v6  ;;  %v1929_v13 = vadd.f32 %v1928_v11, %v3626_v54  ;;  %2248 = vmatprep.mubr.f32.mxu1 %v3195_v0  ;;  %s2808_s24 = sshll.u32 %s3196_s0, 4  ;;  %s2809_s24 = int_to_ptr.vmem [resolvable:$true] %s2808_s24 }
 0x21f   :  { %2561 = vst [vmem:[#allocation7 + $0x870] sm:$0xff] %v1927_v9  ;;  %2560 = vst [vmem:[#allocation7 + $0x868] sm:$0xff] %v1096_v10  ;;  %v1099_v14 = vpop.f32.mrb[136].mxu0  ;;  %s3163_s25 = scalar_lea.vmem %s2809_s24, 65536  ;;  %p3168_p3 = scmp.lt.s32.totalorder %s2809_s24, %s2809_s24 }
 0x220   :  { %2562 = vst [vmem:[#allocation7 + $0x878] sm:$0xff] %v1929_v13  ;;  %v1100_v15 = vadd.f32 %v1099_v14, %v3614_v50  ;;  %v1932_v16 = vpop.f32.mrb[136].mxu1  ;;  %v1101_v17 = vpop.f32.mrb[137].mxu0  ;;  %2944 = vmatmul.mubr.msk.f32.gmra.mrb[242].mxu0 %vm227_vm1, %v162_v12  ;;  %p3164_p2 = scmp.ne.s32.totalorder %s2809_s24, %s3163_s25  ;;  %p3169_p4 = scmp.lt.s32.totalorder %s3163_s25, %s3163_s25 }
 0x221   :  { %v1933_v18 = vadd.f32 %v1932_v16, %v3618_v51  ;;  %v1102_v19 = vadd.f32 %v1101_v17, %v3620_v52  ;;  %v1934_v20 = vpop.f32.mrb[137].mxu1  ;;  %3074 = vmatmul.mubr.msk.f32.gmra.mrb[242].mxu1 %vm227_vm1, %v162_v12  ;;  %1421 = vmatprep.mubr.f32.mxu0 %v3195_v0 }
 0x222   :  { %2563 = vst [vmem:[#allocation7 + $0x880] sm:$0xff] %v1100_v15  ;;  %v1935_v22 = vadd.f32 %v1934_v20, %v3626_v54  ;;  %2254 = vmatprep.mubr.f32.mxu1 %v3195_v0  ;;  %p3170_p5 = por %p3169_p4, %p3168_p3 }
 0x223   :  { %2565 = vst [vmem:[#allocation7 + $0x890] sm:$0xff] %v1933_v18  ;;  %2564 = vst [vmem:[#allocation7 + $0x888] sm:$0xff] %v1102_v19  ;;  %v1105_v23 = vpop.f32.mrb[138].mxu0 }
 0x224   :  { %2566 = vst [vmem:[#allocation7 + $0x898] sm:$0xff] %v1935_v22  ;;  %v1106_v24 = vadd.f32 %v1105_v23, %v3614_v50  ;;  %v1938_v25 = vpop.f32.mrb[138].mxu1  ;;  %v1107_v26 = vpop.f32.mrb[139].mxu0  ;;  %2945 = vmatmul.mubr.msk.f32.gmra.mrb[244].mxu0 %vm227_vm1, %v163_v21  ;;  %p3171_p6 = pnand %p3170_p5, %p3164_p2 }
 0x225   :  { %v1939_v27 = vadd.f32 %v1938_v25, %v3618_v51  ;;  %v1108_v28 = vadd.f32 %v1107_v26, %v3620_v52  ;;  %v1940_v29 = vpop.f32.mrb[139].mxu1  ;;  %3075 = vmatmul.mubr.msk.f32.gmra.mrb[244].mxu1 %vm227_vm1, %v163_v21  ;;  %1427 = vmatprep.mubr.f32.mxu0 %v3195_v0 }
 0x226   :  { %2567 = vst [vmem:[#allocation7 + $0x8a0] sm:$0xff] %v1106_v24  ;;  %v1941_v31 = vadd.f32 %v1940_v29, %v3626_v54  ;;  %2260 = vmatprep.mubr.f32.mxu1 %v3195_v0 }
 0x227   :  { %2569 = vst [vmem:[#allocation7 + $0x8b0] sm:$0xff] %v1939_v27  ;;  %2568 = vst [vmem:[#allocation7 + $0x8a8] sm:$0xff] %v1108_v28  ;;  %v1111_v32 = vpop.f32.mrb[140].mxu0 }
 0x228   :  { %2570 = vst [vmem:[#allocation7 + $0x8b8] sm:$0xff] %v1941_v31  ;;  %v1112_v33 = vadd.f32 %v1111_v32, %v3614_v50  ;;  %v1944_v34 = vpop.f32.mrb[140].mxu1  ;;  %v1113_v35 = vpop.f32.mrb[141].mxu0  ;;  %2946 = vmatmul.mubr.msk.f32.gmra.mrb[246].mxu0 %vm227_vm1, %v164_v30 }
 0x229   :  { %v1945_v36 = vadd.f32 %v1944_v34, %v3618_v51  ;;  %v1114_v37 = vadd.f32 %v1113_v35, %v3620_v52  ;;  %v1946_v38 = vpop.f32.mrb[141].mxu1  ;;  %3076 = vmatmul.mubr.msk.f32.gmra.mrb[246].mxu1 %vm227_vm1, %v164_v30  ;;  %1433 = vmatprep.mubr.f32.mxu0 %v3195_v0 }
 0x22a   :  { %2571 = vst [vmem:[#allocation7 + $0x8c0] sm:$0xff] %v1112_v33  ;;  %v1947_v40 = vadd.f32 %v1946_v38, %v3626_v54  ;;  %2266 = vmatprep.mubr.f32.mxu1 %v3195_v0 }
 0x22b   :  { %2573 = vst [vmem:[#allocation7 + $0x8d0] sm:$0xff] %v1945_v36  ;;  %2572 = vst [vmem:[#allocation7 + $0x8c8] sm:$0xff] %v1114_v37  ;;  %v1117_v41 = vpop.f32.mrb[142].mxu0 }
 0x22c   :  { %2574 = vst [vmem:[#allocation7 + $0x8d8] sm:$0xff] %v1947_v40  ;;  %v1118_v42 = vadd.f32 %v1117_v41, %v3614_v50  ;;  %v1950_v43 = vpop.f32.mrb[142].mxu1  ;;  %v1119_v44 = vpop.f32.mrb[143].mxu0  ;;  %2947 = vmatmul.mubr.msk.f32.gmra.mrb[248].mxu0 %vm227_vm1, %v165_v39 }
 0x22d   :  { %v1951_v45 = vadd.f32 %v1950_v43, %v3618_v51  ;;  %v1120_v46 = vadd.f32 %v1119_v44, %v3620_v52  ;;  %v1952_v47 = vpop.f32.mrb[143].mxu1  ;;  %3077 = vmatmul.mubr.msk.f32.gmra.mrb[248].mxu1 %vm227_vm1, %v165_v39  ;;  %1439 = vmatprep.mubr.f32.mxu0 %v3195_v0 }
 0x22e   :  { %2575 = vst [vmem:[#allocation7 + $0x8e0] sm:$0xff] %v1118_v42  ;;  %v1953_v49 = vadd.f32 %v1952_v47, %v3626_v54  ;;  %2272 = vmatprep.mubr.f32.mxu1 %v3195_v0 }
 0x22f   :  { %2577 = vst [vmem:[#allocation7 + $0x8f0] sm:$0xff] %v1951_v45  ;;  %2576 = vst [vmem:[#allocation7 + $0x8e8] sm:$0xff] %v1120_v46  ;;  %v1123_v53 = vpop.f32.mrb[144].mxu0 }
 0x230   :  { %2578 = vst [vmem:[#allocation7 + $0x8f8] sm:$0xff] %v1953_v49  ;;  %v1124_v55 = vadd.f32 %v1123_v53, %v3614_v50  ;;  %v1956_v56 = vpop.f32.mrb[144].mxu1  ;;  %v1125_v57 = vpop.f32.mrb[145].mxu0  ;;  %2948 = vmatmul.mubr.msk.f32.gmra.mrb[250].mxu0 %vm227_vm1, %v166_v48 }
 0x231   :  { %v1957_v58 = vadd.f32 %v1956_v56, %v3618_v51  ;;  %v1126_v59 = vadd.f32 %v1125_v57, %v3620_v52  ;;  %v1958_v60 = vpop.f32.mrb[145].mxu1  ;;  %3078 = vmatmul.mubr.msk.f32.gmra.mrb[250].mxu1 %vm227_vm1, %v166_v48  ;;  %1445 = vmatprep.mubr.f32.mxu0 %v3195_v0 }
 0x232   :  { %2579 = vst [vmem:[#allocation7 + $0x900] sm:$0xff] %v1124_v55  ;;  %v1959_v62 = vadd.f32 %v1958_v60, %v3626_v54  ;;  %2278 = vmatprep.mubr.f32.mxu1 %v3195_v0 }
 0x233   :  { %2581 = vst [vmem:[#allocation7 + $0x910] sm:$0xff] %v1957_v58  ;;  %2580 = vst [vmem:[#allocation7 + $0x908] sm:$0xff] %v1126_v59  ;;  %v1129_v63 = vpop.f32.mrb[146].mxu0 }
 0x234   :  { %2582 = vst [vmem:[#allocation7 + $0x918] sm:$0xff] %v1959_v62  ;;  %v1130_v1 = vadd.f32 %v1129_v63, %v3614_v50  ;;  %v1962_v2 = vpop.f32.mrb[146].mxu1  ;;  %v1131_v3 = vpop.f32.mrb[147].mxu0  ;;  %2949 = vmatmul.mubr.msk.f32.gmra.mrb[252].mxu0 %vm227_vm1, %v167_v61 }
 0x235   :  { %v1963_v4 = vadd.f32 %v1962_v2, %v3618_v51  ;;  %v1132_v5 = vadd.f32 %v1131_v3, %v3620_v52  ;;  %v1964_v6 = vpop.f32.mrb[147].mxu1  ;;  %3079 = vmatmul.mubr.msk.f32.gmra.mrb[252].mxu1 %vm227_vm1, %v167_v61  ;;  %1451 = vmatprep.mubr.f32.mxu0 %v3195_v0 }
 0x236   :  { %2583 = vst [vmem:[#allocation7 + $0x920] sm:$0xff] %v1130_v1  ;;  %v1965_v8 = vadd.f32 %v1964_v6, %v3626_v54  ;;  %2284 = vmatprep.mubr.f32.mxu1 %v3195_v0 }
 0x237   :  { %2585 = vst [vmem:[#allocation7 + $0x930] sm:$0xff] %v1963_v4  ;;  %2584 = vst [vmem:[#allocation7 + $0x928] sm:$0xff] %v1132_v5  ;;  %v1135_v9 = vpop.f32.mrb[148].mxu0 }
 0x238   :  { %2586 = vst [vmem:[#allocation7 + $0x938] sm:$0xff] %v1965_v8  ;;  %v1136_v10 = vadd.f32 %v1135_v9, %v3614_v50  ;;  %v1968_v11 = vpop.f32.mrb[148].mxu1  ;;  %v1137_v12 = vpop.f32.mrb[149].mxu0  ;;  %2950 = vmatmul.mubr.msk.f32.gmra.mrb[254].mxu0 %vm227_vm1, %v168_v7 }
 0x239   :  { %v1969_v13 = vadd.f32 %v1968_v11, %v3618_v51  ;;  %v1138_v14 = vadd.f32 %v1137_v12, %v3620_v52  ;;  %v1970_v15 = vpop.f32.mrb[149].mxu1  ;;  %3080 = vmatmul.mubr.msk.f32.gmra.mrb[254].mxu1 %vm227_vm1, %v168_v7 }
 0x23a   :  { %2587 = vst [vmem:[#allocation7 + $0x940] sm:$0xff] %v1136_v10  ;;  %v1971_v0 = vadd.f32 %v1970_v15, %v3626_v54 }
 0x23b   :  { %2589 = vst [vmem:[#allocation7 + $0x950] sm:$0xff] %v1969_v13  ;;  %2588 = vst [vmem:[#allocation7 + $0x948] sm:$0xff] %v1138_v14  ;;  %v1141_v16 = vpop.f32.mrb[150].mxu0 }
 0x23c   :  { %2590 = vst [vmem:[#allocation7 + $0x958] sm:$0xff] %v1971_v0  ;;  %v1142_v17 = vadd.f32 %v1141_v16, %v3614_v50  ;;  %v1974_v18 = vpop.f32.mrb[150].mxu1  ;;  %v1143_v19 = vpop.f32.mrb[151].mxu0 }
 0x23d   :  { %v1975_v20 = vadd.f32 %v1974_v18, %v3618_v51  ;;  %v1144_v21 = vadd.f32 %v1143_v19, %v3620_v52  ;;  %v1976_v22 = vpop.f32.mrb[151].mxu1 }
 0x23e   :  { %2591 = vst [vmem:[#allocation7 + $0x960] sm:$0xff] %v1142_v17  ;;  %v1977_v23 = vadd.f32 %v1976_v22, %v3626_v54 }
 0x23f   :  { %2593 = vst [vmem:[#allocation7 + $0x970] sm:$0xff] %v1975_v20  ;;  %2592 = vst [vmem:[#allocation7 + $0x968] sm:$0xff] %v1144_v21  ;;  %v1147_v24 = vpop.f32.mrb[152].mxu0 }
 0x240   :  { %2594 = vst [vmem:[#allocation7 + $0x978] sm:$0xff] %v1977_v23  ;;  %v1148_v25 = vadd.f32 %v1147_v24, %v3614_v50  ;;  %v1980_v26 = vpop.f32.mrb[152].mxu1  ;;  %v1149_v27 = vpop.f32.mrb[153].mxu0 }
 0x241   :  { %v1981_v28 = vadd.f32 %v1980_v26, %v3618_v51  ;;  %v1150_v29 = vadd.f32 %v1149_v27, %v3620_v52  ;;  %v1982_v30 = vpop.f32.mrb[153].mxu1 }
 0x242   :  { %2595 = vst [vmem:[#allocation7 + $0x980] sm:$0xff] %v1148_v25  ;;  %v1983_v31 = vadd.f32 %v1982_v30, %v3626_v54 }
 0x243   :  { %2597 = vst [vmem:[#allocation7 + $0x990] sm:$0xff] %v1981_v28  ;;  %2596 = vst [vmem:[#allocation7 + $0x988] sm:$0xff] %v1150_v29  ;;  %v1153_v32 = vpop.f32.mrb[154].mxu0 }
 0x244   :  { %2598 = vst [vmem:[#allocation7 + $0x998] sm:$0xff] %v1983_v31  ;;  %v1154_v33 = vadd.f32 %v1153_v32, %v3614_v50  ;;  %v1986_v34 = vpop.f32.mrb[154].mxu1  ;;  %v1155_v35 = vpop.f32.mrb[155].mxu0 }
 0x245   :  { %v1987_v36 = vadd.f32 %v1986_v34, %v3618_v51  ;;  %v1156_v37 = vadd.f32 %v1155_v35, %v3620_v52  ;;  %v1988_v38 = vpop.f32.mrb[155].mxu1 }
 0x246   :  { %2599 = vst [vmem:[#allocation7 + $0x9a0] sm:$0xff] %v1154_v33  ;;  %v1989_v39 = vadd.f32 %v1988_v38, %v3626_v54 }
 0x247   :  { %2601 = vst [vmem:[#allocation7 + $0x9b0] sm:$0xff] %v1987_v36  ;;  %2600 = vst [vmem:[#allocation7 + $0x9a8] sm:$0xff] %v1156_v37  ;;  %v1159_v40 = vpop.f32.mrb[156].mxu0 }
 0x248   :  { %2602 = vst [vmem:[#allocation7 + $0x9b8] sm:$0xff] %v1989_v39  ;;  %v1160_v41 = vadd.f32 %v1159_v40, %v3614_v50  ;;  %v1992_v42 = vpop.f32.mrb[156].mxu1  ;;  %v1161_v43 = vpop.f32.mrb[157].mxu0 }
 0x249   :  { %v1993_v44 = vadd.f32 %v1992_v42, %v3618_v51  ;;  %v1162_v45 = vadd.f32 %v1161_v43, %v3620_v52  ;;  %v1994_v46 = vpop.f32.mrb[157].mxu1 }
 0x24a   :  { %2603 = vst [vmem:[#allocation7 + $0x9c0] sm:$0xff] %v1160_v41  ;;  %v1995_v47 = vadd.f32 %v1994_v46, %v3626_v54 }
 0x24b   :  { %2605 = vst [vmem:[#allocation7 + $0x9d0] sm:$0xff] %v1993_v44  ;;  %2604 = vst [vmem:[#allocation7 + $0x9c8] sm:$0xff] %v1162_v45  ;;  %v1165_v48 = vpop.f32.mrb[158].mxu0 }
 0x24c   :  { %2606 = vst [vmem:[#allocation7 + $0x9d8] sm:$0xff] %v1995_v47  ;;  %v1166_v49 = vadd.f32 %v1165_v48, %v3614_v50  ;;  %v1998_v53 = vpop.f32.mrb[158].mxu1  ;;  %v1167_v55 = vpop.f32.mrb[159].mxu0 }
 0x24d   :  { %v1999_v56 = vadd.f32 %v1998_v53, %v3618_v51  ;;  %v1168_v57 = vadd.f32 %v1167_v55, %v3620_v52  ;;  %v2000_v58 = vpop.f32.mrb[159].mxu1 }
 0x24e   :  { %2607 = vst [vmem:[#allocation7 + $0x9e0] sm:$0xff] %v1166_v49  ;;  %v2001_v59 = vadd.f32 %v2000_v58, %v3626_v54 }
 0x24f   :  { %2609 = vst [vmem:[#allocation7 + $0x9f0] sm:$0xff] %v1999_v56  ;;  %2608 = vst [vmem:[#allocation7 + $0x9e8] sm:$0xff] %v1168_v57  ;;  %v1171_v60 = vpop.f32.mrb[160].mxu0 }
 0x250   :  { %2610 = vst [vmem:[#allocation7 + $0x9f8] sm:$0xff] %v2001_v59  ;;  %v1172_v61 = vadd.f32 %v1171_v60, %v3614_v50  ;;  %v2004_v62 = vpop.f32.mrb[160].mxu1  ;;  %v1173_v63 = vpop.f32.mrb[161].mxu0 }
 0x251   :  { %v2005_v1 = vadd.f32 %v2004_v62, %v3618_v51  ;;  %v1174_v2 = vadd.f32 %v1173_v63, %v3620_v52  ;;  %v2006_v3 = vpop.f32.mrb[161].mxu1 }
 0x252   :  { %2611 = vst [vmem:[#allocation7 + $0xa00] sm:$0xff] %v1172_v61  ;;  %v2007_v4 = vadd.f32 %v2006_v3, %v3626_v54 }
 0x253   :  { %2613 = vst [vmem:[#allocation7 + $0xa10] sm:$0xff] %v2005_v1  ;;  %2612 = vst [vmem:[#allocation7 + $0xa08] sm:$0xff] %v1174_v2  ;;  %v1177_v5 = vpop.f32.mrb[162].mxu0 }
 0x254   :  { %2614 = vst [vmem:[#allocation7 + $0xa18] sm:$0xff] %v2007_v4  ;;  %v1178_v6 = vadd.f32 %v1177_v5, %v3614_v50  ;;  %v2010_v7 = vpop.f32.mrb[162].mxu1  ;;  %v1179_v8 = vpop.f32.mrb[163].mxu0 }
 0x255   :  { %v2011_v9 = vadd.f32 %v2010_v7, %v3618_v51  ;;  %v1180_v10 = vadd.f32 %v1179_v8, %v3620_v52  ;;  %v2012_v11 = vpop.f32.mrb[163].mxu1 }
 0x256   :  { %2615 = vst [vmem:[#allocation7 + $0xa20] sm:$0xff] %v1178_v6  ;;  %v2013_v12 = vadd.f32 %v2012_v11, %v3626_v54 }
 0x257   :  { %2617 = vst [vmem:[#allocation7 + $0xa30] sm:$0xff] %v2011_v9  ;;  %2616 = vst [vmem:[#allocation7 + $0xa28] sm:$0xff] %v1180_v10  ;;  %v1183_v13 = vpop.f32.mrb[164].mxu0 }
 0x258   :  { %2618 = vst [vmem:[#allocation7 + $0xa38] sm:$0xff] %v2013_v12  ;;  %v1184_v14 = vadd.f32 %v1183_v13, %v3614_v50  ;;  %v2016_v15 = vpop.f32.mrb[164].mxu1  ;;  %v1185_v0 = vpop.f32.mrb[165].mxu0 }
 0x259   :  { %v2017_v16 = vadd.f32 %v2016_v15, %v3618_v51  ;;  %v1186_v17 = vadd.f32 %v1185_v0, %v3620_v52  ;;  %v2018_v18 = vpop.f32.mrb[165].mxu1 }
 0x25a   :  { %2619 = vst [vmem:[#allocation7 + $0xa40] sm:$0xff] %v1184_v14  ;;  %v2019_v19 = vadd.f32 %v2018_v18, %v3626_v54 }
 0x25b   :  { %2621 = vst [vmem:[#allocation7 + $0xa50] sm:$0xff] %v2017_v16  ;;  %2620 = vst [vmem:[#allocation7 + $0xa48] sm:$0xff] %v1186_v17  ;;  %v1189_v20 = vpop.f32.mrb[166].mxu0 }
 0x25c   :  { %2622 = vst [vmem:[#allocation7 + $0xa58] sm:$0xff] %v2019_v19  ;;  %v1190_v21 = vadd.f32 %v1189_v20, %v3614_v50  ;;  %v2022_v22 = vpop.f32.mrb[166].mxu1  ;;  %v1191_v23 = vpop.f32.mrb[167].mxu0 }
 0x25d   :  { %v2023_v24 = vadd.f32 %v2022_v22, %v3618_v51  ;;  %v1192_v25 = vadd.f32 %v1191_v23, %v3620_v52  ;;  %v2024_v26 = vpop.f32.mrb[167].mxu1 }
 0x25e   :  { %2623 = vst [vmem:[#allocation7 + $0xa60] sm:$0xff] %v1190_v21  ;;  %v2025_v27 = vadd.f32 %v2024_v26, %v3626_v54 }
 0x25f   :  { %2625 = vst [vmem:[#allocation7 + $0xa70] sm:$0xff] %v2023_v24  ;;  %2624 = vst [vmem:[#allocation7 + $0xa68] sm:$0xff] %v1192_v25  ;;  %v1195_v28 = vpop.f32.mrb[168].mxu0 }
 0x260   :  { %2626 = vst [vmem:[#allocation7 + $0xa78] sm:$0xff] %v2025_v27  ;;  %v1196_v29 = vadd.f32 %v1195_v28, %v3614_v50  ;;  %v2028_v30 = vpop.f32.mrb[168].mxu1  ;;  %v1197_v31 = vpop.f32.mrb[169].mxu0 }
 0x261   :  { %v2029_v32 = vadd.f32 %v2028_v30, %v3618_v51  ;;  %v1198_v33 = vadd.f32 %v1197_v31, %v3620_v52  ;;  %v2030_v34 = vpop.f32.mrb[169].mxu1 }
 0x262   :  { %2627 = vst [vmem:[#allocation7 + $0xa80] sm:$0xff] %v1196_v29  ;;  %v2031_v35 = vadd.f32 %v2030_v34, %v3626_v54 }
 0x263   :  { %2629 = vst [vmem:[#allocation7 + $0xa90] sm:$0xff] %v2029_v32  ;;  %2628 = vst [vmem:[#allocation7 + $0xa88] sm:$0xff] %v1198_v33  ;;  %v1201_v36 = vpop.f32.mrb[170].mxu0 }
 0x264   :  { %2630 = vst [vmem:[#allocation7 + $0xa98] sm:$0xff] %v2031_v35  ;;  %v1202_v37 = vadd.f32 %v1201_v36, %v3614_v50  ;;  %v2034_v38 = vpop.f32.mrb[170].mxu1  ;;  %v1203_v39 = vpop.f32.mrb[171].mxu0 }
 0x265   :  { %v2035_v40 = vadd.f32 %v2034_v38, %v3618_v51  ;;  %v1204_v41 = vadd.f32 %v1203_v39, %v3620_v52  ;;  %v2036_v42 = vpop.f32.mrb[171].mxu1 }
 0x266   :  { %2631 = vst [vmem:[#allocation7 + $0xaa0] sm:$0xff] %v1202_v37  ;;  %v2037_v43 = vadd.f32 %v2036_v42, %v3626_v54 }
 0x267   :  { %2633 = vst [vmem:[#allocation7 + $0xab0] sm:$0xff] %v2035_v40  ;;  %2632 = vst [vmem:[#allocation7 + $0xaa8] sm:$0xff] %v1204_v41  ;;  %v1207_v44 = vpop.f32.mrb[172].mxu0 }
 0x268   :  { %2634 = vst [vmem:[#allocation7 + $0xab8] sm:$0xff] %v2037_v43  ;;  %v1208_v45 = vadd.f32 %v1207_v44, %v3614_v50  ;;  %v2040_v46 = vpop.f32.mrb[172].mxu1  ;;  %v1209_v47 = vpop.f32.mrb[173].mxu0 }
 0x269   :  { %v2041_v48 = vadd.f32 %v2040_v46, %v3618_v51  ;;  %v1210_v49 = vadd.f32 %v1209_v47, %v3620_v52  ;;  %v2042_v53 = vpop.f32.mrb[173].mxu1 }
 0x26a   :  { %2635 = vst [vmem:[#allocation7 + $0xac0] sm:$0xff] %v1208_v45  ;;  %v2043_v55 = vadd.f32 %v2042_v53, %v3626_v54 }
 0x26b   :  { %2637 = vst [vmem:[#allocation7 + $0xad0] sm:$0xff] %v2041_v48  ;;  %2636 = vst [vmem:[#allocation7 + $0xac8] sm:$0xff] %v1210_v49  ;;  %v1213_v56 = vpop.f32.mrb[174].mxu0 }
 0x26c   :  { %2638 = vst [vmem:[#allocation7 + $0xad8] sm:$0xff] %v2043_v55  ;;  %v1214_v57 = vadd.f32 %v1213_v56, %v3614_v50  ;;  %v2046_v58 = vpop.f32.mrb[174].mxu1  ;;  %v1215_v59 = vpop.f32.mrb[175].mxu0 }
 0x26d   :  { %v2047_v60 = vadd.f32 %v2046_v58, %v3618_v51  ;;  %v1216_v61 = vadd.f32 %v1215_v59, %v3620_v52  ;;  %v2048_v62 = vpop.f32.mrb[175].mxu1 }
 0x26e   :  { %2639 = vst [vmem:[#allocation7 + $0xae0] sm:$0xff] %v1214_v57  ;;  %v2049_v63 = vadd.f32 %v2048_v62, %v3626_v54 }
 0x26f   :  { %2641 = vst [vmem:[#allocation7 + $0xaf0] sm:$0xff] %v2047_v60  ;;  %2640 = vst [vmem:[#allocation7 + $0xae8] sm:$0xff] %v1216_v61  ;;  %v1219_v1 = vpop.f32.mrb[176].mxu0 }
 0x270   :  { %2642 = vst [vmem:[#allocation7 + $0xaf8] sm:$0xff] %v2049_v63  ;;  %v1220_v2 = vadd.f32 %v1219_v1, %v3614_v50  ;;  %v2052_v3 = vpop.f32.mrb[176].mxu1  ;;  %v1221_v4 = vpop.f32.mrb[177].mxu0 }
 0x271   :  { %v2053_v5 = vadd.f32 %v2052_v3, %v3618_v51  ;;  %v1222_v6 = vadd.f32 %v1221_v4, %v3620_v52  ;;  %v2054_v7 = vpop.f32.mrb[177].mxu1 }
 0x272   :  { %2643 = vst [vmem:[#allocation7 + $0xb00] sm:$0xff] %v1220_v2  ;;  %v2055_v8 = vadd.f32 %v2054_v7, %v3626_v54 }
 0x273   :  { %2645 = vst [vmem:[#allocation7 + $0xb10] sm:$0xff] %v2053_v5  ;;  %2644 = vst [vmem:[#allocation7 + $0xb08] sm:$0xff] %v1222_v6  ;;  %v1225_v9 = vpop.f32.mrb[178].mxu0 }
 0x274   :  { %2646 = vst [vmem:[#allocation7 + $0xb18] sm:$0xff] %v2055_v8  ;;  %v1226_v10 = vadd.f32 %v1225_v9, %v3614_v50  ;;  %v2058_v11 = vpop.f32.mrb[178].mxu1  ;;  %v1227_v12 = vpop.f32.mrb[179].mxu0 }
 0x275   :  { %v2059_v13 = vadd.f32 %v2058_v11, %v3618_v51  ;;  %v1228_v14 = vadd.f32 %v1227_v12, %v3620_v52  ;;  %v2060_v15 = vpop.f32.mrb[179].mxu1 }
 0x276   :  { %2647 = vst [vmem:[#allocation7 + $0xb20] sm:$0xff] %v1226_v10  ;;  %v2061_v0 = vadd.f32 %v2060_v15, %v3626_v54 }
 0x277   :  { %2649 = vst [vmem:[#allocation7 + $0xb30] sm:$0xff] %v2059_v13  ;;  %2648 = vst [vmem:[#allocation7 + $0xb28] sm:$0xff] %v1228_v14  ;;  %v1231_v16 = vpop.f32.mrb[180].mxu0 }
 0x278   :  { %2650 = vst [vmem:[#allocation7 + $0xb38] sm:$0xff] %v2061_v0  ;;  %v1232_v17 = vadd.f32 %v1231_v16, %v3614_v50  ;;  %v2064_v18 = vpop.f32.mrb[180].mxu1  ;;  %v1233_v19 = vpop.f32.mrb[181].mxu0 }
 0x279   :  { %v2065_v20 = vadd.f32 %v2064_v18, %v3618_v51  ;;  %v1234_v21 = vadd.f32 %v1233_v19, %v3620_v52  ;;  %v2066_v22 = vpop.f32.mrb[181].mxu1 }
 0x27a   :  { %2651 = vst [vmem:[#allocation7 + $0xb40] sm:$0xff] %v1232_v17  ;;  %v2067_v23 = vadd.f32 %v2066_v22, %v3626_v54 }
 0x27b   :  { %2653 = vst [vmem:[#allocation7 + $0xb50] sm:$0xff] %v2065_v20  ;;  %2652 = vst [vmem:[#allocation7 + $0xb48] sm:$0xff] %v1234_v21  ;;  %v1237_v24 = vpop.f32.mrb[182].mxu0 }
 0x27c   :  { %2654 = vst [vmem:[#allocation7 + $0xb58] sm:$0xff] %v2067_v23  ;;  %v1238_v25 = vadd.f32 %v1237_v24, %v3614_v50  ;;  %v2070_v26 = vpop.f32.mrb[182].mxu1  ;;  %v1239_v27 = vpop.f32.mrb[183].mxu0 }
 0x27d   :  { %v2071_v28 = vadd.f32 %v2070_v26, %v3618_v51  ;;  %v1240_v29 = vadd.f32 %v1239_v27, %v3620_v52  ;;  %v2072_v30 = vpop.f32.mrb[183].mxu1 }
 0x27e   :  { %2655 = vst [vmem:[#allocation7 + $0xb60] sm:$0xff] %v1238_v25  ;;  %v2073_v31 = vadd.f32 %v2072_v30, %v3626_v54 }
 0x27f   :  { %2657 = vst [vmem:[#allocation7 + $0xb70] sm:$0xff] %v2071_v28  ;;  %2656 = vst [vmem:[#allocation7 + $0xb68] sm:$0xff] %v1240_v29  ;;  %v1243_v32 = vpop.f32.mrb[184].mxu0 }
 0x280   :  { %2658 = vst [vmem:[#allocation7 + $0xb78] sm:$0xff] %v2073_v31  ;;  %v1244_v33 = vadd.f32 %v1243_v32, %v3614_v50  ;;  %v2076_v34 = vpop.f32.mrb[184].mxu1  ;;  %v1245_v35 = vpop.f32.mrb[185].mxu0 }
 0x281   :  { %v2077_v36 = vadd.f32 %v2076_v34, %v3618_v51  ;;  %v1246_v37 = vadd.f32 %v1245_v35, %v3620_v52  ;;  %v2078_v38 = vpop.f32.mrb[185].mxu1 }
 0x282   :  { %2659 = vst [vmem:[#allocation7 + $0xb80] sm:$0xff] %v1244_v33  ;;  %v2079_v39 = vadd.f32 %v2078_v38, %v3626_v54 }
 0x283   :  { %2661 = vst [vmem:[#allocation7 + $0xb90] sm:$0xff] %v2077_v36  ;;  %2660 = vst [vmem:[#allocation7 + $0xb88] sm:$0xff] %v1246_v37  ;;  %v1249_v40 = vpop.f32.mrb[186].mxu0 }
 0x284   :  { %2662 = vst [vmem:[#allocation7 + $0xb98] sm:$0xff] %v2079_v39  ;;  %v1250_v41 = vadd.f32 %v1249_v40, %v3614_v50  ;;  %v2082_v42 = vpop.f32.mrb[186].mxu1  ;;  %v1251_v43 = vpop.f32.mrb[187].mxu0 }
 0x285   :  { %v2083_v44 = vadd.f32 %v2082_v42, %v3618_v51  ;;  %v1252_v45 = vadd.f32 %v1251_v43, %v3620_v52  ;;  %v2084_v46 = vpop.f32.mrb[187].mxu1 }
 0x286   :  { %2663 = vst [vmem:[#allocation7 + $0xba0] sm:$0xff] %v1250_v41  ;;  %v2085_v47 = vadd.f32 %v2084_v46, %v3626_v54 }
 0x287   :  { %2665 = vst [vmem:[#allocation7 + $0xbb0] sm:$0xff] %v2083_v44  ;;  %2664 = vst [vmem:[#allocation7 + $0xba8] sm:$0xff] %v1252_v45  ;;  %v1255_v48 = vpop.f32.mrb[188].mxu0 }
 0x288   :  { %2666 = vst [vmem:[#allocation7 + $0xbb8] sm:$0xff] %v2085_v47  ;;  %v1256_v49 = vadd.f32 %v1255_v48, %v3614_v50  ;;  %v2088_v53 = vpop.f32.mrb[188].mxu1  ;;  %v1257_v55 = vpop.f32.mrb[189].mxu0 }
 0x289   :  { %v2089_v56 = vadd.f32 %v2088_v53, %v3618_v51  ;;  %v1258_v57 = vadd.f32 %v1257_v55, %v3620_v52  ;;  %v2090_v58 = vpop.f32.mrb[189].mxu1 }
 0x28a   :  { %2667 = vst [vmem:[#allocation7 + $0xbc0] sm:$0xff] %v1256_v49  ;;  %v2091_v59 = vadd.f32 %v2090_v58, %v3626_v54 }
 0x28b   :  { %2669 = vst [vmem:[#allocation7 + $0xbd0] sm:$0xff] %v2089_v56  ;;  %2668 = vst [vmem:[#allocation7 + $0xbc8] sm:$0xff] %v1258_v57  ;;  %v1261_v60 = vpop.f32.mrb[190].mxu0 }
 0x28c   :  { %2670 = vst [vmem:[#allocation7 + $0xbd8] sm:$0xff] %v2091_v59  ;;  %v1262_v61 = vadd.f32 %v1261_v60, %v3614_v50  ;;  %v2094_v62 = vpop.f32.mrb[190].mxu1  ;;  %v1263_v63 = vpop.f32.mrb[191].mxu0 }
 0x28d   :  { %v2095_v1 = vadd.f32 %v2094_v62, %v3618_v51  ;;  %v1264_v2 = vadd.f32 %v1263_v63, %v3620_v52  ;;  %v2096_v3 = vpop.f32.mrb[191].mxu1 }
 0x28e   :  { %2671 = vst [vmem:[#allocation7 + $0xbe0] sm:$0xff] %v1262_v61  ;;  %v2097_v4 = vadd.f32 %v2096_v3, %v3626_v54 }
 0x28f   :  { %2673 = vst [vmem:[#allocation7 + $0xbf0] sm:$0xff] %v2095_v1  ;;  %2672 = vst [vmem:[#allocation7 + $0xbe8] sm:$0xff] %v1264_v2  ;;  %v1267_v5 = vpop.f32.mrb[192].mxu0 }
 0x290   :  { %2674 = vst [vmem:[#allocation7 + $0xbf8] sm:$0xff] %v2097_v4  ;;  %v1268_v6 = vadd.f32 %v1267_v5, %v3614_v50  ;;  %v2100_v7 = vpop.f32.mrb[192].mxu1  ;;  %v1269_v8 = vpop.f32.mrb[193].mxu0 }
 0x291   :  { %v2101_v9 = vadd.f32 %v2100_v7, %v3618_v51  ;;  %v1270_v10 = vadd.f32 %v1269_v8, %v3620_v52  ;;  %v2102_v11 = vpop.f32.mrb[193].mxu1 }
 0x292   :  { %2675 = vst [vmem:[#allocation7 + $0xc00] sm:$0xff] %v1268_v6  ;;  %v2103_v12 = vadd.f32 %v2102_v11, %v3626_v54 }
 0x293   :  { %2677 = vst [vmem:[#allocation7 + $0xc10] sm:$0xff] %v2101_v9  ;;  %2676 = vst [vmem:[#allocation7 + $0xc08] sm:$0xff] %v1270_v10  ;;  %v1273_v13 = vpop.f32.mrb[194].mxu0 }
 0x294   :  { %2678 = vst [vmem:[#allocation7 + $0xc18] sm:$0xff] %v2103_v12  ;;  %v1274_v14 = vadd.f32 %v1273_v13, %v3614_v50  ;;  %v2106_v15 = vpop.f32.mrb[194].mxu1  ;;  %v1275_v0 = vpop.f32.mrb[195].mxu0 }
 0x295   :  { %v2107_v16 = vadd.f32 %v2106_v15, %v3618_v51  ;;  %v1276_v17 = vadd.f32 %v1275_v0, %v3620_v52  ;;  %v2108_v18 = vpop.f32.mrb[195].mxu1 }
 0x296   :  { %2679 = vst [vmem:[#allocation7 + $0xc20] sm:$0xff] %v1274_v14  ;;  %v2109_v19 = vadd.f32 %v2108_v18, %v3626_v54 }
 0x297   :  { %2681 = vst [vmem:[#allocation7 + $0xc30] sm:$0xff] %v2107_v16  ;;  %2680 = vst [vmem:[#allocation7 + $0xc28] sm:$0xff] %v1276_v17  ;;  %v1279_v20 = vpop.f32.mrb[196].mxu0 }
 0x298   :  { %2682 = vst [vmem:[#allocation7 + $0xc38] sm:$0xff] %v2109_v19  ;;  %v1280_v21 = vadd.f32 %v1279_v20, %v3614_v50  ;;  %v2112_v22 = vpop.f32.mrb[196].mxu1  ;;  %v1281_v23 = vpop.f32.mrb[197].mxu0 }
 0x299   :  { %v2113_v24 = vadd.f32 %v2112_v22, %v3618_v51  ;;  %v1282_v25 = vadd.f32 %v1281_v23, %v3620_v52  ;;  %v2114_v26 = vpop.f32.mrb[197].mxu1 }
 0x29a   :  { %2683 = vst [vmem:[#allocation7 + $0xc40] sm:$0xff] %v1280_v21  ;;  %v2115_v27 = vadd.f32 %v2114_v26, %v3626_v54 }
 0x29b   :  { %2685 = vst [vmem:[#allocation7 + $0xc50] sm:$0xff] %v2113_v24  ;;  %2684 = vst [vmem:[#allocation7 + $0xc48] sm:$0xff] %v1282_v25  ;;  %v1285_v28 = vpop.f32.mrb[198].mxu0 }
 0x29c   :  { %2686 = vst [vmem:[#allocation7 + $0xc58] sm:$0xff] %v2115_v27  ;;  %v1286_v29 = vadd.f32 %v1285_v28, %v3614_v50  ;;  %v2118_v30 = vpop.f32.mrb[198].mxu1  ;;  %v1287_v31 = vpop.f32.mrb[199].mxu0 }
 0x29d   :  { %v2119_v32 = vadd.f32 %v2118_v30, %v3618_v51  ;;  %v1288_v33 = vadd.f32 %v1287_v31, %v3620_v52  ;;  %v2120_v34 = vpop.f32.mrb[199].mxu1 }
 0x29e   :  { %2687 = vst [vmem:[#allocation7 + $0xc60] sm:$0xff] %v1286_v29  ;;  %v2121_v35 = vadd.f32 %v2120_v34, %v3626_v54 }
 0x29f   :  { %2689 = vst [vmem:[#allocation7 + $0xc70] sm:$0xff] %v2119_v32  ;;  %2688 = vst [vmem:[#allocation7 + $0xc68] sm:$0xff] %v1288_v33  ;;  %v1291_v36 = vpop.f32.mrb[200].mxu0 }
 0x2a0   :  { %2690 = vst [vmem:[#allocation7 + $0xc78] sm:$0xff] %v2121_v35  ;;  %v1292_v37 = vadd.f32 %v1291_v36, %v3614_v50  ;;  %v2124_v38 = vpop.f32.mrb[200].mxu1  ;;  %v1293_v39 = vpop.f32.mrb[201].mxu0 }
 0x2a1   :  { %v2125_v40 = vadd.f32 %v2124_v38, %v3618_v51  ;;  %v1294_v41 = vadd.f32 %v1293_v39, %v3620_v52  ;;  %v2126_v42 = vpop.f32.mrb[201].mxu1 }
 0x2a2   :  { %2691 = vst [vmem:[#allocation7 + $0xc80] sm:$0xff] %v1292_v37  ;;  %v2127_v43 = vadd.f32 %v2126_v42, %v3626_v54 }
 0x2a3   :  { %2693 = vst [vmem:[#allocation7 + $0xc90] sm:$0xff] %v2125_v40  ;;  %2692 = vst [vmem:[#allocation7 + $0xc88] sm:$0xff] %v1294_v41  ;;  %v1297_v44 = vpop.f32.mrb[202].mxu0 }
 0x2a4   :  { %2694 = vst [vmem:[#allocation7 + $0xc98] sm:$0xff] %v2127_v43  ;;  %v1298_v45 = vadd.f32 %v1297_v44, %v3614_v50  ;;  %v2130_v46 = vpop.f32.mrb[202].mxu1  ;;  %v1299_v47 = vpop.f32.mrb[203].mxu0 }
 0x2a5   :  { %v2131_v48 = vadd.f32 %v2130_v46, %v3618_v51  ;;  %v1300_v49 = vadd.f32 %v1299_v47, %v3620_v52  ;;  %v2132_v53 = vpop.f32.mrb[203].mxu1 }
 0x2a6   :  { %2695 = vst [vmem:[#allocation7 + $0xca0] sm:$0xff] %v1298_v45  ;;  %v2133_v55 = vadd.f32 %v2132_v53, %v3626_v54 }
 0x2a7   :  { %2697 = vst [vmem:[#allocation7 + $0xcb0] sm:$0xff] %v2131_v48  ;;  %2696 = vst [vmem:[#allocation7 + $0xca8] sm:$0xff] %v1300_v49  ;;  %v1303_v56 = vpop.f32.mrb[204].mxu0 }
 0x2a8   :  { %2698 = vst [vmem:[#allocation7 + $0xcb8] sm:$0xff] %v2133_v55  ;;  %v1304_v57 = vadd.f32 %v1303_v56, %v3614_v50  ;;  %v2136_v58 = vpop.f32.mrb[204].mxu1  ;;  %v1305_v59 = vpop.f32.mrb[205].mxu0 }
 0x2a9   :  { %v2137_v60 = vadd.f32 %v2136_v58, %v3618_v51  ;;  %v1306_v61 = vadd.f32 %v1305_v59, %v3620_v52  ;;  %v2138_v62 = vpop.f32.mrb[205].mxu1 }
 0x2aa   :  { %2699 = vst [vmem:[#allocation7 + $0xcc0] sm:$0xff] %v1304_v57  ;;  %v2139_v63 = vadd.f32 %v2138_v62, %v3626_v54 }
 0x2ab   :  { %2701 = vst [vmem:[#allocation7 + $0xcd0] sm:$0xff] %v2137_v60  ;;  %2700 = vst [vmem:[#allocation7 + $0xcc8] sm:$0xff] %v1306_v61  ;;  %v1309_v1 = vpop.f32.mrb[206].mxu0 }
 0x2ac   :  { %2702 = vst [vmem:[#allocation7 + $0xcd8] sm:$0xff] %v2139_v63  ;;  %v1310_v2 = vadd.f32 %v1309_v1, %v3614_v50  ;;  %v2142_v3 = vpop.f32.mrb[206].mxu1  ;;  %v1311_v4 = vpop.f32.mrb[207].mxu0 }
 0x2ad   :  { %v2143_v5 = vadd.f32 %v2142_v3, %v3618_v51  ;;  %v1312_v6 = vadd.f32 %v1311_v4, %v3620_v52  ;;  %v2144_v7 = vpop.f32.mrb[207].mxu1 }
 0x2ae   :  { %2703 = vst [vmem:[#allocation7 + $0xce0] sm:$0xff] %v1310_v2  ;;  %v2145_v8 = vadd.f32 %v2144_v7, %v3626_v54 }
 0x2af   :  { %2705 = vst [vmem:[#allocation7 + $0xcf0] sm:$0xff] %v2143_v5  ;;  %2704 = vst [vmem:[#allocation7 + $0xce8] sm:$0xff] %v1312_v6  ;;  %v1315_v9 = vpop.f32.mrb[208].mxu0 }
 0x2b0   :  { %2706 = vst [vmem:[#allocation7 + $0xcf8] sm:$0xff] %v2145_v8  ;;  %v1316_v10 = vadd.f32 %v1315_v9, %v3614_v50  ;;  %v2148_v11 = vpop.f32.mrb[208].mxu1  ;;  %v1317_v12 = vpop.f32.mrb[209].mxu0 }
 0x2b1   :  { %v2149_v13 = vadd.f32 %v2148_v11, %v3618_v51  ;;  %v1318_v14 = vadd.f32 %v1317_v12, %v3620_v52  ;;  %v2150_v15 = vpop.f32.mrb[209].mxu1 }
 0x2b2   :  { %2707 = vst [vmem:[#allocation7 + $0xd00] sm:$0xff] %v1316_v10  ;;  %v2151_v0 = vadd.f32 %v2150_v15, %v3626_v54 }
 0x2b3   :  { %2709 = vst [vmem:[#allocation7 + $0xd10] sm:$0xff] %v2149_v13  ;;  %2708 = vst [vmem:[#allocation7 + $0xd08] sm:$0xff] %v1318_v14  ;;  %v1321_v16 = vpop.f32.mrb[210].mxu0 }
 0x2b4   :  { %2710 = vst [vmem:[#allocation7 + $0xd18] sm:$0xff] %v2151_v0  ;;  %v1322_v17 = vadd.f32 %v1321_v16, %v3614_v50  ;;  %v2154_v18 = vpop.f32.mrb[210].mxu1  ;;  %v1323_v19 = vpop.f32.mrb[211].mxu0 }
 0x2b5   :  { %v2155_v20 = vadd.f32 %v2154_v18, %v3618_v51  ;;  %v1324_v21 = vadd.f32 %v1323_v19, %v3620_v52  ;;  %v2156_v22 = vpop.f32.mrb[211].mxu1 }
 0x2b6   :  { %2711 = vst [vmem:[#allocation7 + $0xd20] sm:$0xff] %v1322_v17  ;;  %v2157_v23 = vadd.f32 %v2156_v22, %v3626_v54 }
 0x2b7   :  { %2713 = vst [vmem:[#allocation7 + $0xd30] sm:$0xff] %v2155_v20  ;;  %2712 = vst [vmem:[#allocation7 + $0xd28] sm:$0xff] %v1324_v21  ;;  %v1327_v24 = vpop.f32.mrb[212].mxu0 }
 0x2b8   :  { %2714 = vst [vmem:[#allocation7 + $0xd38] sm:$0xff] %v2157_v23  ;;  %v1328_v25 = vadd.f32 %v1327_v24, %v3614_v50  ;;  %v2160_v26 = vpop.f32.mrb[212].mxu1  ;;  %v1329_v27 = vpop.f32.mrb[213].mxu0 }
 0x2b9   :  { %v2161_v28 = vadd.f32 %v2160_v26, %v3618_v51  ;;  %v1330_v29 = vadd.f32 %v1329_v27, %v3620_v52  ;;  %v2162_v30 = vpop.f32.mrb[213].mxu1 }
 0x2ba   :  { %2715 = vst [vmem:[#allocation7 + $0xd40] sm:$0xff] %v1328_v25  ;;  %v2163_v31 = vadd.f32 %v2162_v30, %v3626_v54 }
 0x2bb   :  { %2717 = vst [vmem:[#allocation7 + $0xd50] sm:$0xff] %v2161_v28  ;;  %2716 = vst [vmem:[#allocation7 + $0xd48] sm:$0xff] %v1330_v29  ;;  %v1333_v32 = vpop.f32.mrb[214].mxu0 }
 0x2bc   :  { %2718 = vst [vmem:[#allocation7 + $0xd58] sm:$0xff] %v2163_v31  ;;  %v1334_v33 = vadd.f32 %v1333_v32, %v3614_v50  ;;  %v2166_v34 = vpop.f32.mrb[214].mxu1  ;;  %v1335_v35 = vpop.f32.mrb[215].mxu0 }
 0x2bd   :  { %v2167_v36 = vadd.f32 %v2166_v34, %v3618_v51  ;;  %v1336_v37 = vadd.f32 %v1335_v35, %v3620_v52  ;;  %v2168_v38 = vpop.f32.mrb[215].mxu1 }
 0x2be   :  { %2719 = vst [vmem:[#allocation7 + $0xd60] sm:$0xff] %v1334_v33  ;;  %v2169_v39 = vadd.f32 %v2168_v38, %v3626_v54 }
 0x2bf   :  { %2721 = vst [vmem:[#allocation7 + $0xd70] sm:$0xff] %v2167_v36  ;;  %2720 = vst [vmem:[#allocation7 + $0xd68] sm:$0xff] %v1336_v37  ;;  %v1339_v40 = vpop.f32.mrb[216].mxu0 }
 0x2c0   :  { %2722 = vst [vmem:[#allocation7 + $0xd78] sm:$0xff] %v2169_v39  ;;  %v1340_v41 = vadd.f32 %v1339_v40, %v3614_v50  ;;  %v2172_v42 = vpop.f32.mrb[216].mxu1  ;;  %v1341_v43 = vpop.f32.mrb[217].mxu0 }
 0x2c1   :  { %v2173_v44 = vadd.f32 %v2172_v42, %v3618_v51  ;;  %v1342_v45 = vadd.f32 %v1341_v43, %v3620_v52  ;;  %v2174_v46 = vpop.f32.mrb[217].mxu1 }
 0x2c2   :  { %2723 = vst [vmem:[#allocation7 + $0xd80] sm:$0xff] %v1340_v41  ;;  %v2175_v47 = vadd.f32 %v2174_v46, %v3626_v54 }
 0x2c3   :  { %2725 = vst [vmem:[#allocation7 + $0xd90] sm:$0xff] %v2173_v44  ;;  %2724 = vst [vmem:[#allocation7 + $0xd88] sm:$0xff] %v1342_v45  ;;  %v1345_v48 = vpop.f32.mrb[218].mxu0 }
 0x2c4   :  { %2726 = vst [vmem:[#allocation7 + $0xd98] sm:$0xff] %v2175_v47  ;;  %v1346_v49 = vadd.f32 %v1345_v48, %v3614_v50  ;;  %v2178_v53 = vpop.f32.mrb[218].mxu1  ;;  %v1347_v55 = vpop.f32.mrb[219].mxu0 }
 0x2c5   :  { %v2179_v56 = vadd.f32 %v2178_v53, %v3618_v51  ;;  %v1348_v57 = vadd.f32 %v1347_v55, %v3620_v52  ;;  %v2180_v58 = vpop.f32.mrb[219].mxu1 }
 0x2c6   :  { %2727 = vst [vmem:[#allocation7 + $0xda0] sm:$0xff] %v1346_v49  ;;  %v2181_v59 = vadd.f32 %v2180_v58, %v3626_v54 }
 0x2c7   :  { %2729 = vst [vmem:[#allocation7 + $0xdb0] sm:$0xff] %v2179_v56  ;;  %2728 = vst [vmem:[#allocation7 + $0xda8] sm:$0xff] %v1348_v57  ;;  %v1351_v60 = vpop.f32.mrb[220].mxu0 }
 0x2c8   :  { %2730 = vst [vmem:[#allocation7 + $0xdb8] sm:$0xff] %v2181_v59  ;;  %v1352_v61 = vadd.f32 %v1351_v60, %v3614_v50  ;;  %v2184_v62 = vpop.f32.mrb[220].mxu1  ;;  %v1353_v63 = vpop.f32.mrb[221].mxu0 }
 0x2c9   :  { %v2185_v1 = vadd.f32 %v2184_v62, %v3618_v51  ;;  %v1354_v2 = vadd.f32 %v1353_v63, %v3620_v52  ;;  %v2186_v3 = vpop.f32.mrb[221].mxu1 }
 0x2ca   :  { %2731 = vst [vmem:[#allocation7 + $0xdc0] sm:$0xff] %v1352_v61  ;;  %v2187_v4 = vadd.f32 %v2186_v3, %v3626_v54 }
 0x2cb   :  { %2733 = vst [vmem:[#allocation7 + $0xdd0] sm:$0xff] %v2185_v1  ;;  %2732 = vst [vmem:[#allocation7 + $0xdc8] sm:$0xff] %v1354_v2  ;;  %v1357_v5 = vpop.f32.mrb[222].mxu0 }
 0x2cc   :  { %2734 = vst [vmem:[#allocation7 + $0xdd8] sm:$0xff] %v2187_v4  ;;  %v1358_v6 = vadd.f32 %v1357_v5, %v3614_v50  ;;  %v2190_v7 = vpop.f32.mrb[222].mxu1  ;;  %v1359_v8 = vpop.f32.mrb[223].mxu0 }
 0x2cd   :  { %v2191_v9 = vadd.f32 %v2190_v7, %v3618_v51  ;;  %v1360_v10 = vadd.f32 %v1359_v8, %v3620_v52  ;;  %v2192_v11 = vpop.f32.mrb[223].mxu1 }
 0x2ce   :  { %2735 = vst [vmem:[#allocation7 + $0xde0] sm:$0xff] %v1358_v6  ;;  %v2193_v12 = vadd.f32 %v2192_v11, %v3626_v54 }
 0x2cf   :  { %2737 = vst [vmem:[#allocation7 + $0xdf0] sm:$0xff] %v2191_v9  ;;  %2736 = vst [vmem:[#allocation7 + $0xde8] sm:$0xff] %v1360_v10  ;;  %v1363_v13 = vpop.f32.mrb[224].mxu0 }
 0x2d0   :  { %2738 = vst [vmem:[#allocation7 + $0xdf8] sm:$0xff] %v2193_v12  ;;  %v1364_v14 = vadd.f32 %v1363_v13, %v3614_v50  ;;  %v2196_v15 = vpop.f32.mrb[224].mxu1  ;;  %v1365_v0 = vpop.f32.mrb[225].mxu0 }
 0x2d1   :  { %v2197_v16 = vadd.f32 %v2196_v15, %v3618_v51  ;;  %v1366_v17 = vadd.f32 %v1365_v0, %v3620_v52  ;;  %v2198_v18 = vpop.f32.mrb[225].mxu1 }
 0x2d2   :  { %2739 = vst [vmem:[#allocation7 + $0xe00] sm:$0xff] %v1364_v14  ;;  %v2199_v19 = vadd.f32 %v2198_v18, %v3626_v54 }
 0x2d3   :  { %2741 = vst [vmem:[#allocation7 + $0xe10] sm:$0xff] %v2197_v16  ;;  %2740 = vst [vmem:[#allocation7 + $0xe08] sm:$0xff] %v1366_v17  ;;  %v1369_v20 = vpop.f32.mrb[226].mxu0 }
 0x2d4   :  { %2742 = vst [vmem:[#allocation7 + $0xe18] sm:$0xff] %v2199_v19  ;;  %v1370_v21 = vadd.f32 %v1369_v20, %v3614_v50  ;;  %v2202_v22 = vpop.f32.mrb[226].mxu1  ;;  %v1371_v23 = vpop.f32.mrb[227].mxu0 }
 0x2d5   :  { %v2203_v24 = vadd.f32 %v2202_v22, %v3618_v51  ;;  %v1372_v25 = vadd.f32 %v1371_v23, %v3620_v52  ;;  %v2204_v26 = vpop.f32.mrb[227].mxu1 }
 0x2d6   :  { %2743 = vst [vmem:[#allocation7 + $0xe20] sm:$0xff] %v1370_v21  ;;  %v2205_v27 = vadd.f32 %v2204_v26, %v3626_v54 }
 0x2d7   :  { %2745 = vst [vmem:[#allocation7 + $0xe30] sm:$0xff] %v2203_v24  ;;  %2744 = vst [vmem:[#allocation7 + $0xe28] sm:$0xff] %v1372_v25  ;;  %v1375_v28 = vpop.f32.mrb[228].mxu0 }
 0x2d8   :  { %2746 = vst [vmem:[#allocation7 + $0xe38] sm:$0xff] %v2205_v27  ;;  %v1376_v29 = vadd.f32 %v1375_v28, %v3614_v50  ;;  %v2208_v30 = vpop.f32.mrb[228].mxu1  ;;  %v1377_v31 = vpop.f32.mrb[229].mxu0 }
 0x2d9   :  { %v2209_v32 = vadd.f32 %v2208_v30, %v3618_v51  ;;  %v1378_v33 = vadd.f32 %v1377_v31, %v3620_v52  ;;  %v2210_v34 = vpop.f32.mrb[229].mxu1 }
 0x2da   :  { %2747 = vst [vmem:[#allocation7 + $0xe40] sm:$0xff] %v1376_v29  ;;  %v2211_v35 = vadd.f32 %v2210_v34, %v3626_v54 }
 0x2db   :  { %2749 = vst [vmem:[#allocation7 + $0xe50] sm:$0xff] %v2209_v32  ;;  %2748 = vst [vmem:[#allocation7 + $0xe48] sm:$0xff] %v1378_v33  ;;  %v1381_v36 = vpop.f32.mrb[230].mxu0 }
 0x2dc   :  { %2750 = vst [vmem:[#allocation7 + $0xe58] sm:$0xff] %v2211_v35  ;;  %v1382_v37 = vadd.f32 %v1381_v36, %v3614_v50  ;;  %v2214_v38 = vpop.f32.mrb[230].mxu1  ;;  %v1383_v39 = vpop.f32.mrb[231].mxu0 }
 0x2dd   :  { %v2215_v40 = vadd.f32 %v2214_v38, %v3618_v51  ;;  %v1384_v41 = vadd.f32 %v1383_v39, %v3620_v52  ;;  %v2216_v42 = vpop.f32.mrb[231].mxu1 }
 0x2de   :  { %2751 = vst [vmem:[#allocation7 + $0xe60] sm:$0xff] %v1382_v37  ;;  %v2217_v43 = vadd.f32 %v2216_v42, %v3626_v54 }
 0x2df   :  { %2753 = vst [vmem:[#allocation7 + $0xe70] sm:$0xff] %v2215_v40  ;;  %2752 = vst [vmem:[#allocation7 + $0xe68] sm:$0xff] %v1384_v41  ;;  %v1387_v44 = vpop.f32.mrb[232].mxu0 }
 0x2e0   :  { %2754 = vst [vmem:[#allocation7 + $0xe78] sm:$0xff] %v2217_v43  ;;  %v1388_v45 = vadd.f32 %v1387_v44, %v3614_v50  ;;  %v2220_v46 = vpop.f32.mrb[232].mxu1  ;;  %v1389_v47 = vpop.f32.mrb[233].mxu0 }
 0x2e1   :  { %v2221_v48 = vadd.f32 %v2220_v46, %v3618_v51  ;;  %v1390_v49 = vadd.f32 %v1389_v47, %v3620_v52  ;;  %v2222_v53 = vpop.f32.mrb[233].mxu1 }
 0x2e2   :  { %2755 = vst [vmem:[#allocation7 + $0xe80] sm:$0xff] %v1388_v45  ;;  %v2223_v55 = vadd.f32 %v2222_v53, %v3626_v54 }
 0x2e3   :  { %2757 = vst [vmem:[#allocation7 + $0xe90] sm:$0xff] %v2221_v48  ;;  %2756 = vst [vmem:[#allocation7 + $0xe88] sm:$0xff] %v1390_v49  ;;  %v1393_v56 = vpop.f32.mrb[234].mxu0 }
 0x2e4   :  { %2758 = vst [vmem:[#allocation7 + $0xe98] sm:$0xff] %v2223_v55  ;;  %v1394_v57 = vadd.f32 %v1393_v56, %v3614_v50  ;;  %v2226_v58 = vpop.f32.mrb[234].mxu1  ;;  %v1395_v59 = vpop.f32.mrb[235].mxu0 }
 0x2e5   :  { %v2227_v60 = vadd.f32 %v2226_v58, %v3618_v51  ;;  %v1396_v61 = vadd.f32 %v1395_v59, %v3620_v52  ;;  %v2228_v62 = vpop.f32.mrb[235].mxu1 }
 0x2e6   :  { %2759 = vst [vmem:[#allocation7 + $0xea0] sm:$0xff] %v1394_v57  ;;  %v2229_v63 = vadd.f32 %v2228_v62, %v3626_v54 }
 0x2e7   :  { %2761 = vst [vmem:[#allocation7 + $0xeb0] sm:$0xff] %v2227_v60  ;;  %2760 = vst [vmem:[#allocation7 + $0xea8] sm:$0xff] %v1396_v61  ;;  %v1399_v1 = vpop.f32.mrb[236].mxu0 }
 0x2e8   :  { %2762 = vst [vmem:[#allocation7 + $0xeb8] sm:$0xff] %v2229_v63  ;;  %v1400_v2 = vadd.f32 %v1399_v1, %v3614_v50  ;;  %v2232_v3 = vpop.f32.mrb[236].mxu1  ;;  %v1401_v4 = vpop.f32.mrb[237].mxu0 }
 0x2e9   :  { %v2233_v5 = vadd.f32 %v2232_v3, %v3618_v51  ;;  %v1402_v6 = vadd.f32 %v1401_v4, %v3620_v52  ;;  %v2234_v7 = vpop.f32.mrb[237].mxu1 }
 0x2ea   :  { %2763 = vst [vmem:[#allocation7 + $0xec0] sm:$0xff] %v1400_v2  ;;  %v2235_v8 = vadd.f32 %v2234_v7, %v3626_v54 }
 0x2eb   :  { %2765 = vst [vmem:[#allocation7 + $0xed0] sm:$0xff] %v2233_v5  ;;  %2764 = vst [vmem:[#allocation7 + $0xec8] sm:$0xff] %v1402_v6  ;;  %v1405_v9 = vpop.f32.mrb[238].mxu0 }
 0x2ec   :  { %2766 = vst [vmem:[#allocation7 + $0xed8] sm:$0xff] %v2235_v8  ;;  %v1406_v10 = vadd.f32 %v1405_v9, %v3614_v50  ;;  %v2238_v11 = vpop.f32.mrb[238].mxu1  ;;  %v1407_v12 = vpop.f32.mrb[239].mxu0 }
 0x2ed   :  { %v2239_v13 = vadd.f32 %v2238_v11, %v3618_v51  ;;  %v1408_v14 = vadd.f32 %v1407_v12, %v3620_v52  ;;  %v2240_v15 = vpop.f32.mrb[239].mxu1 }
 0x2ee   :  { %2767 = vst [vmem:[#allocation7 + $0xee0] sm:$0xff] %v1406_v10  ;;  %v2241_v0 = vadd.f32 %v2240_v15, %v3626_v54 }
 0x2ef   :  { %2769 = vst [vmem:[#allocation7 + $0xef0] sm:$0xff] %v2239_v13  ;;  %2768 = vst [vmem:[#allocation7 + $0xee8] sm:$0xff] %v1408_v14  ;;  %v1411_v16 = vpop.f32.mrb[240].mxu0 }
 0x2f0   :  { %2770 = vst [vmem:[#allocation7 + $0xef8] sm:$0xff] %v2241_v0  ;;  %v1412_v17 = vadd.f32 %v1411_v16, %v3614_v50  ;;  %v2244_v18 = vpop.f32.mrb[240].mxu1  ;;  %v1413_v19 = vpop.f32.mrb[241].mxu0 }
 0x2f1   :  { %v2245_v20 = vadd.f32 %v2244_v18, %v3618_v51  ;;  %v1414_v21 = vadd.f32 %v1413_v19, %v3620_v52  ;;  %v2246_v22 = vpop.f32.mrb[241].mxu1 }
 0x2f2   :  { %2771 = vst [vmem:[#allocation7 + $0xf00] sm:$0xff] %v1412_v17  ;;  %v2247_v23 = vadd.f32 %v2246_v22, %v3626_v54 }
 0x2f3   :  { %2773 = vst [vmem:[#allocation7 + $0xf10] sm:$0xff] %v2245_v20  ;;  %2772 = vst [vmem:[#allocation7 + $0xf08] sm:$0xff] %v1414_v21  ;;  %v1417_v24 = vpop.f32.mrb[242].mxu0 }
 0x2f4   :  { %2774 = vst [vmem:[#allocation7 + $0xf18] sm:$0xff] %v2247_v23  ;;  %v1418_v25 = vadd.f32 %v1417_v24, %v3614_v50  ;;  %v2250_v26 = vpop.f32.mrb[242].mxu1  ;;  %v1419_v27 = vpop.f32.mrb[243].mxu0 }
 0x2f5   :  { %v2251_v28 = vadd.f32 %v2250_v26, %v3618_v51  ;;  %v1420_v29 = vadd.f32 %v1419_v27, %v3620_v52  ;;  %v2252_v30 = vpop.f32.mrb[243].mxu1 }
 0x2f6   :  { %2775 = vst [vmem:[#allocation7 + $0xf20] sm:$0xff] %v1418_v25  ;;  %v2253_v31 = vadd.f32 %v2252_v30, %v3626_v54 }
 0x2f7   :  { %2777 = vst [vmem:[#allocation7 + $0xf30] sm:$0xff] %v2251_v28  ;;  %2776 = vst [vmem:[#allocation7 + $0xf28] sm:$0xff] %v1420_v29  ;;  %v1423_v32 = vpop.f32.mrb[244].mxu0 }
 0x2f8   :  { %2778 = vst [vmem:[#allocation7 + $0xf38] sm:$0xff] %v2253_v31  ;;  %v1424_v33 = vadd.f32 %v1423_v32, %v3614_v50  ;;  %v2256_v34 = vpop.f32.mrb[244].mxu1  ;;  %v1425_v35 = vpop.f32.mrb[245].mxu0 }
 0x2f9   :  { %v2257_v36 = vadd.f32 %v2256_v34, %v3618_v51  ;;  %v1426_v37 = vadd.f32 %v1425_v35, %v3620_v52  ;;  %v2258_v38 = vpop.f32.mrb[245].mxu1 }
 0x2fa   :  { %2779 = vst [vmem:[#allocation7 + $0xf40] sm:$0xff] %v1424_v33  ;;  %v2259_v39 = vadd.f32 %v2258_v38, %v3626_v54 }
 0x2fb   :  { %2781 = vst [vmem:[#allocation7 + $0xf50] sm:$0xff] %v2257_v36  ;;  %2780 = vst [vmem:[#allocation7 + $0xf48] sm:$0xff] %v1426_v37  ;;  %v1429_v40 = vpop.f32.mrb[246].mxu0 }
 0x2fc   :  { %2782 = vst [vmem:[#allocation7 + $0xf58] sm:$0xff] %v2259_v39  ;;  %v1430_v41 = vadd.f32 %v1429_v40, %v3614_v50  ;;  %v2262_v42 = vpop.f32.mrb[246].mxu1  ;;  %v1431_v43 = vpop.f32.mrb[247].mxu0 }
 0x2fd   :  { %v2263_v44 = vadd.f32 %v2262_v42, %v3618_v51  ;;  %v1432_v45 = vadd.f32 %v1431_v43, %v3620_v52  ;;  %v2264_v46 = vpop.f32.mrb[247].mxu1 }
 0x2fe   :  { %2783 = vst [vmem:[#allocation7 + $0xf60] sm:$0xff] %v1430_v41  ;;  %v2265_v47 = vadd.f32 %v2264_v46, %v3626_v54 }
 0x2ff   :  { %2785 = vst [vmem:[#allocation7 + $0xf70] sm:$0xff] %v2263_v44  ;;  %2784 = vst [vmem:[#allocation7 + $0xf68] sm:$0xff] %v1432_v45  ;;  %v1435_v48 = vpop.f32.mrb[248].mxu0 }
 0x300   :  { %2786 = vst [vmem:[#allocation7 + $0xf78] sm:$0xff] %v2265_v47  ;;  %v1436_v49 = vadd.f32 %v1435_v48, %v3614_v50  ;;  %v2268_v53 = vpop.f32.mrb[248].mxu1  ;;  %v1437_v55 = vpop.f32.mrb[249].mxu0 }
 0x301   :  { %v2269_v56 = vadd.f32 %v2268_v53, %v3618_v51  ;;  %v1438_v57 = vadd.f32 %v1437_v55, %v3620_v52  ;;  %v2270_v58 = vpop.f32.mrb[249].mxu1 }
 0x302   :  { %2787 = vst [vmem:[#allocation7 + $0xf80] sm:$0xff] %v1436_v49  ;;  %v2271_v59 = vadd.f32 %v2270_v58, %v3626_v54 }
 0x303   :  { %2789 = vst [vmem:[#allocation7 + $0xf90] sm:$0xff] %v2269_v56  ;;  %2788 = vst [vmem:[#allocation7 + $0xf88] sm:$0xff] %v1438_v57  ;;  %v1441_v60 = vpop.f32.mrb[250].mxu0 }
 0x304   :  { %2790 = vst [vmem:[#allocation7 + $0xf98] sm:$0xff] %v2271_v59  ;;  %v1442_v61 = vadd.f32 %v1441_v60, %v3614_v50  ;;  %v2274_v62 = vpop.f32.mrb[250].mxu1  ;;  %v1443_v63 = vpop.f32.mrb[251].mxu0 }
 0x305   :  { %v2275_v1 = vadd.f32 %v2274_v62, %v3618_v51  ;;  %v1444_v2 = vadd.f32 %v1443_v63, %v3620_v52  ;;  %v2276_v3 = vpop.f32.mrb[251].mxu1 }
 0x306   :  { %2791 = vst [vmem:[#allocation7 + $0xfa0] sm:$0xff] %v1442_v61  ;;  %v2277_v4 = vadd.f32 %v2276_v3, %v3626_v54 }
 0x307   :  { %2793 = vst [vmem:[#allocation7 + $0xfb0] sm:$0xff] %v2275_v1  ;;  %2792 = vst [vmem:[#allocation7 + $0xfa8] sm:$0xff] %v1444_v2  ;;  %v1447_v5 = vpop.f32.mrb[252].mxu0 }
 0x308   :  { %2794 = vst [vmem:[#allocation7 + $0xfb8] sm:$0xff] %v2277_v4  ;;  %v1448_v6 = vadd.f32 %v1447_v5, %v3614_v50  ;;  %v2280_v7 = vpop.f32.mrb[252].mxu1  ;;  %v1449_v8 = vpop.f32.mrb[253].mxu0 }
 0x309   :  { %v2281_v9 = vadd.f32 %v2280_v7, %v3618_v51  ;;  %v1450_v10 = vadd.f32 %v1449_v8, %v3620_v52  ;;  %v2282_v11 = vpop.f32.mrb[253].mxu1 }
 0x30a   :  { %2795 = vst [vmem:[#allocation7 + $0xfc0] sm:$0xff] %v1448_v6  ;;  %v2283_v12 = vadd.f32 %v2282_v11, %v3626_v54 }
 0x30b   :  { %2797 = vst [vmem:[#allocation7 + $0xfd0] sm:$0xff] %v2281_v9  ;;  %2796 = vst [vmem:[#allocation7 + $0xfc8] sm:$0xff] %v1450_v10  ;;  %v1453_v13 = vpop.f32.mrb[254].mxu0 }
 0x30c   :  { %2798 = vst [vmem:[#allocation7 + $0xfd8] sm:$0xff] %v2283_v12  ;;  %v1454_v14 = vadd.f32 %v1453_v13, %v3614_v50  ;;  %v2286_v15 = vpop.f32.mrb[254].mxu1  ;;  %v1455_v0 = vpop.f32.mrb[255].mxu0 }
 0x30d   :  { %v2287_v16 = vadd.f32 %v2286_v15, %v3618_v51  ;;  %v1456_v17 = vadd.f32 %v1455_v0, %v3620_v52  ;;  %v2288_v18 = vpop.f32.mrb[255].mxu1 }
 0x30e   :  { %2799 = vst [vmem:[#allocation7 + $0xfe0] sm:$0xff] %v1454_v14  ;;  %v2289_v19 = vadd.f32 %v2288_v18, %v3626_v54 }
 0x30f   :  { %2801 = vst [vmem:[#allocation7 + $0xff0] sm:$0xff] %v2287_v16  ;;  %2800 = vst [vmem:[#allocation7 + $0xfe8] sm:$0xff] %v1456_v17 }
 0x310   :  { %2802 = vst [vmem:[#allocation7 + $0xff8] sm:$0xff] %v2289_v19 }
 0x311   :  { %3174 = shalt.err (!%p3171_p6)
}
 0x312   :  { %s3175_s28 = scalar_lea.hbm %s4678_s3, 65536 }
 0x313   :  { %p3176_p7 = scmp.ne.s32.totalorder %s4678_s3, %s3175_s28  ;;  %p3179_p8 = scmp.lt.u32.totalorder %s3175_s28, %s4678_s3 }
 0x315   :  { %p3181_p9 = pnand %p3179_p8, %p3176_p7 }
 0x317   :  { %3184 = shalt.err (!%p3181_p9)
}
 0x318   :  { %2814 = dma.vmem_to_hbm [thread:$0]  %s2809_s24, 65536, %s4678_s3, [#allocation4], %s3192_s22, %s3192_s22, %s3193_s23  }
 0x319   :  { %3189 = dma.done.wait [#allocation4], 65536  }
 0x31a   :  { %3190 = vsyncadd [#allocation4], 4294901760 }
 0x31b   :  { %2818 = vsyncpa [#allocation3], 1 }
 0x31c   :  { %2819 = vsyncpa [#allocation6], 1 }
 0x31d   :  { %2820 = vsyncpa [#allocation4], 1 }

</bundles_post_ra>
